<compile_context>
chip_gen: v6e
topology: v6e:2x2x1
jax: 0.10.0
libtpu: 0.0.40
codegen_flags: <defaults>
</compile_context>

<pallas_src>
import re
from functools import partial

import jax
import jax.numpy as jnp
from jax.experimental import pallas as pl
from jax.experimental.pallas import tpu as pltpu


# ----------------------------------------------------------------------------
# In-kernel helpers
# ----------------------------------------------------------------------------
def _layernorm(x, gamma, beta, eps=1e-5):
    mu = jnp.mean(x, axis=-1, keepdims=True)
    var = jnp.mean((x - mu) ** 2, axis=-1, keepdims=True)
    return (x - mu) * jax.lax.rsqrt(var + eps) * gamma + beta


def _split_heads(t2d, nb, L, H, D):
    """(nb*L, E) -> (nb*H, L, D): cast to bf16, one reshape + one transpose."""
    t = t2d.astype(jnp.bfloat16).reshape(nb, L, H, D)
    t = jnp.transpose(t, (0, 2, 1, 3))            # (nb, H, L, D) — single relayout
    return t.reshape(nb * H, L, D)


def _merge_heads(ctx, nb, L, H, D):
    """(nb*H, L, D) -> (nb*L, E): inverse transpose + reshape."""
    c = ctx.reshape(nb, H, L, D)
    c = jnp.transpose(c, (0, 2, 1, 3))            # (nb, L, H, D)
    return c.reshape(nb * L, H * D)


# ----------------------------------------------------------------------------
# Fused per-layer kernel: x = x + MHA(LN1(x)); x = x + MLP(LN2(x))
# ----------------------------------------------------------------------------
def layer_kernel(x_ref, g1_ref, b1_ref, wqkv_ref, bqkv_ref, wout_ref, bout_ref,
                 g2_ref, b2_ref, wfc_ref, bfc_ref, wproj_ref, bproj_ref,
                 o_ref, *, n_head, bf16_elementwise):
    x = x_ref[...]                                  # (nb, L, E) float32
    nb, L, E = x.shape
    H = n_head
    D = E // H

    # Hoist small parameter vectors once per invocation.
    g1, b1 = g1_ref[0], b1_ref[0]
    g2, b2 = g2_ref[0], b2_ref[0]
    bqkv, bout = bqkv_ref[0], bout_ref[0]
    bfc, bproj = bfc_ref[0], bproj_ref[0]

    # ------------- Attention: x + out_proj(softmax(q k^T / sqrt(D)) v) -------------
    xn = _layernorm(x, g1, b1).astype(jnp.bfloat16).reshape(nb * L, E)
    # Fused QKV projection (weights stored (in, out), bf16; 1/sqrt(D) already
    # folded into the Q columns host-side).
    qkv = jnp.dot(xn, wqkv_ref[...], preferred_element_type=jnp.float32) + bqkv  # (nb*L, 3E)

    q = _split_heads(qkv[:, :E], nb, L, H, D)          # (nb*H, L, D) bf16
    k = _split_heads(qkv[:, E:2 * E], nb, L, H, D)
    v = _split_heads(qkv[:, 2 * E:], nb, L, H, D)

    # Head-batched score matmul; contraction over the minor D axis of both
    # operands, so dot_general needs no per-head K transpose.
    s = jnp.einsum('bqd,bkd->bqk', q, k,
                   preferred_element_type=jnp.float32)                    # (nb*H, L, L)
    s = s - jnp.max(s, axis=-1, keepdims=True)
    if bf16_elementwise:                       # v6e/v7x: bf16 EUP/VPU
        p = jnp.exp(s.astype(jnp.bfloat16))
    else:                                      # v5e: no bf16 VPU/EUP
        p = jnp.exp(s)
    rowsum = jnp.sum(p, axis=-1, keepdims=True, dtype=jnp.float32)
    # Un-normalized probs into the PV matmul; normalize the (much smaller) ctx.
    ctx = jnp.einsum('bqk,bkd->bqd', p.astype(jnp.bfloat16), v,
                     preferred_element_type=jnp.float32)                  # (nb*H, L, D)
    ctx = (ctx * pl.reciprocal(rowsum, approx=True)).astype(jnp.bfloat16)

    attn = _merge_heads(ctx, nb, L, H, D)                                 # (nb*L, E) bf16
    attn_out = jnp.dot(attn, wout_ref[...],
                       preferred_element_type=jnp.float32) + bout         # (nb*L, E)
    x = x + attn_out.reshape(nb, L, E)                                    # residual (f32)

    # TODO(synk): Adaptor(width) undefined in the provided source -> identity.

    # ------------- MLP: x + c_proj(QuickGELU(c_fc(LN2(x)))) -------------
    xn2 = _layernorm(x, g2, b2).astype(jnp.bfloat16).reshape(nb * L, E)
    h = jnp.dot(xn2, wfc_ref[...], preferred_element_type=jnp.float32) + bfc     # (nb*L, 4E)
    if bf16_elementwise:
        hb = h.astype(jnp.bfloat16)
        act = hb * jax.nn.sigmoid(1.702 * hb)                              # bf16 QuickGELU
    else:
        act = (h * jax.nn.sigmoid(1.702 * h)).astype(jnp.bfloat16)         # f32 QuickGELU
    mlp_out = jnp.dot(act, wproj_ref[...], preferred_element_type=jnp.float32) + bproj
    # Single fused store: residual + MLP output.
    o_ref[...] = x + mlp_out.reshape(nb, L, E)


# ----------------------------------------------------------------------------
# Host-side sizing helpers (generation aware)
# ----------------------------------------------------------------------------
def _tpu_generation_and_vmem():
    gen = 6
    try:
        kind = jax.devices()[0].device_kind
        m = re.search(r"(\d+)", kind)
        if m:
            gen = int(m.group(1))
    except Exception:
        pass
    vmem_cap = (64 << 20) if gen >= 7 else (128 << 20)
    try:
        vmem_cap = int(pltpu.get_tpu_info().vmem_capacity_bytes)
    except Exception:
        pass
    return gen, vmem_cap


def _vmem_budget(gen, vmem_cap):
    # v7x: leave headroom below the 64 MiB physical VMEM; v5e/v6e: use up to ~100 MiB.
    cap = (56 << 20) if gen >= 7 else (100 << 20)
    return min(int(0.85 * vmem_cap), cap)


def _workspace_bytes(nb, L, E, H, bf16_elem):
    """In-kernel temporaries; dominated by the L^2 score/prob tensors."""
    p_bytes = 2 if bf16_elem else 4
    att = nb * H * L * L * (4 + p_bytes)                 # s (f32) + p
    qkv = nb * L * 3 * E * (4 + 2)                       # qkv f32 + q/k/v bf16
    ctx = nb * L * E * (4 + 2)                           # ctx f32 + merged bf16
    mlp = nb * L * 4 * E * (4 + 2) + nb * L * E * 4      # h f32 + act bf16 + mlp_out f32
    misc = 4 * nb * L * E * 4                            # LN temps, residual, attn_out
    return att + qkv + ctx + mlp + misc


def _weight_bytes(E, single_buffer_weights):
    wb = 12 * E * E * 2                                  # bf16 (3E^2 + E^2 + 4E^2 + 4E^2)
    sb = 16 * E * 4                                      # LN params + biases (f32)
    return (1 if single_buffer_weights else 2) * wb + 2 * sb


def _vmem_need(nb, L, E, H, bf16_elem, single_buffer_weights):
    act = 2 * 2 * nb * L * E * 4                         # double-buffered x-in + out blocks
    return (act + _weight_bytes(E, single_buffer_weights)
            + _workspace_bytes(nb, L, E, H, bf16_elem) + (2 << 20))


def _pick_batch_block(N, L, E, H, gen, budget, bf16_elem, single_buffer_weights):
    nb_max = N
    if gen >= 7 and N >= 2:
        nb_max = max(1, N // 2)      # keep >= 2 grid steps so both v7x TCs get work
    for cand in range(nb_max, 0, -1):
        if N % cand == 0 and _vmem_need(cand, L, E, H, bf16_elem,
                                        single_buffer_weights) <= budget:
            return cand
    return 1


# ----------------------------------------------------------------------------
# pallas_call builder (cached) + per-layer wrapper with safe fallback
# ----------------------------------------------------------------------------
def _const_spec(shape, single_buffer):
    n = len(shape)
    idx = lambda b, n=n: (0,) * n
    if single_buffer:
        # Constant-index weight block: no need to double-buffer.
        return pl.BlockSpec(shape, idx, pipeline_mode=pl.Buffered(1))
    return pl.BlockSpec(shape, idx)


_LAYER_CALL_CACHE = {}
_AGGRESSIVE_OK = True


def _build_layer_call(N, L, E, n_head, dtype, aggressive):
    key = (N, L, E, n_head, jnp.dtype(dtype).name, aggressive)
    if key in _LAYER_CALL_CACHE:
        return _LAYER_CALL_CACHE[key]

    gen, vmem_cap = _tpu_generation_and_vmem()
    bf16_elem = gen >= 6                       # v5e keeps the f32 elementwise path
    budget = _vmem_budget(gen, vmem_cap)
    nb = _pick_batch_block(N, L, E, n_head, gen, budget, bf16_elem, aggressive)
    vmem_limit = int(min(max(_vmem_need(nb, L, E, n_head, bf16_elem, aggressive),
                             32 << 20), budget))

    H = n_head
    T = N * L
    flops = (2 * T * E * 3 * E            # qkv projection
             + 4 * N * L * L * E          # scores + p@v (all heads)
             + 2 * T * E * E              # out projection
             + 2 * T * E * 4 * E          # c_fc
             + 2 * T * 4 * E * E)         # c_proj
    transcendentals = N * H * L * L + T * 4 * E + N * H * L + 2 * T
    bytes_accessed = 2 * T * E * 4 + 12 * E * E * 2 + 16 * E * 4

    cs = lambda shape: _const_spec(shape, aggressive)
    call = pl.pallas_call(
        partial(layer_kernel, n_head=n_head, bf16_elementwise=bf16_elem),
        out_shape=jax.ShapeDtypeStruct((N, L, E), dtype),
        grid=(N // nb,),
        in_specs=[
            pl.BlockSpec((nb, L, E), lambda b: (b, 0, 0)),   # x
            cs((1, E)), cs((1, E)),                          # ln_1 gamma/beta
            cs((E, 3 * E)), cs((1, 3 * E)),                  # in_proj (bf16 W, f32 b)
            cs((E, E)), cs((1, E)),                          # out_proj
            cs((1, E)), cs((1, E)),                          # ln_2 gamma/beta
            cs((E, 4 * E)), cs((1, 4 * E)),                  # c_fc
            cs((4 * E, E)), cs((1, E)),                      # c_proj
        ],
        out_specs=pl.BlockSpec((nb, L, E), lambda b: (b, 0, 0)),
        input_output_aliases={0: 0} if aggressive else {},
        compiler_params=pltpu.CompilerParams(
            dimension_semantics=("parallel",),
            vmem_limit_bytes=vmem_limit),
        cost_estimate=pl.CostEstimate(flops=flops,
                                      transcendentals=transcendentals,
                                      bytes_accessed=bytes_accessed),
    )
    _LAYER_CALL_CACHE[key] = call
    return call


def run_layer(x_nle, p, n_head):
    global _AGGRESSIVE_OK
    N, L, E = x_nle.shape
    args = (x_nle,
            p["ln1_g"], p["ln1_b"], p["wqkv"], p["bqkv"], p["wout"], p["bout"],
            p["ln2_g"], p["ln2_b"], p["wfc"], p["bfc"], p["wproj"], p["bproj"])
    if _AGGRESSIVE_OK:
        try:
            call = _build_layer_call(N, L, E, n_head, x_nle.dtype, aggressive=True)
            return jax.block_until_ready(call(*args))
        except Exception:
            _AGGRESSIVE_OK = False   # drop Buffered(1)/aliasing once and for all
    call = _build_layer_call(N, L, E, n_head, x_nle.dtype, aggressive=False)
    return call(*args)


def transformer_forward(x_lne, prepared_params, n_head):
    """x_lne: (L, N, E), same layout as nn.MultiheadAttention with batch_first=False."""
    x = jnp.transpose(x_lne, (1, 0, 2))           # -> (N, L, E) for the kernels
    for p in prepared_params:
        x = run_layer(x, p, n_head)               # fused: attn-residual + (Adaptor=id) + mlp-residual
    return jnp.transpose(x, (1, 0, 2))            # back to (L, N, E)


# ----------------------------------------------------------------------------
# Parameters: init (PyTorch-equivalent, f32) + one-time prepare (fold scale, cast)
# ----------------------------------------------------------------------------
def init_params(key, width, layers):
    E = width
    params = []
    for _ in range(layers):
        key, k1, k2, k3, k4 = jax.random.split(key, 5)
        params.append({
            "ln1_g": jnp.ones((1, E), jnp.float32),
            "ln1_b": jnp.zeros((1, E), jnp.float32),
            "wqkv": 0.02 * jax.random.normal(k1, (E, 3 * E), jnp.float32),  # (in, out)
            "bqkv": jnp.zeros((1, 3 * E), jnp.float32),
            "wout": 0.02 * jax.random.normal(k2, (E, E), jnp.float32),
            "bout": jnp.zeros((1, E), jnp.float32),
            "ln2_g": jnp.ones((1, E), jnp.float32),
            "ln2_b": jnp.zeros((1, E), jnp.float32),
            "wfc": 0.02 * jax.random.normal(k3, (E, 4 * E), jnp.float32),
            "bfc": jnp.zeros((1, 4 * E), jnp.float32),
            "wproj": 0.02 * jax.random.normal(k4, (4 * E, E), jnp.float32),
            "bproj": jnp.zeros((1, E), jnp.float32),
        })
    return params


def prepare_params(params, n_head):
    """One-time host-side prep: fold 1/sqrt(D) into the Q weights/bias (f32) and
    cast matmul weights to bf16 (f32 accumulation happens inside the kernel)."""
    prepped = []
    for p in params:
        E = p["wqkv"].shape[0]
        D = E // n_head
        scale = 1.0 / (float(D) ** 0.5)
        wqkv = p["wqkv"].at[:, :E].multiply(scale)
        bqkv = p["bqkv"].at[:, :E].multiply(scale)
        prepped.append({
            "ln1_g": p["ln1_g"], "ln1_b": p["ln1_b"],
            "wqkv": wqkv.astype(jnp.bfloat16), "bqkv": bqkv,
            "wout": p["wout"].astype(jnp.bfloat16), "bout": p["bout"],
            "ln2_g": p["ln2_g"], "ln2_b": p["ln2_b"],
            "wfc": p["wfc"].astype(jnp.bfloat16), "bfc": p["bfc"],
            "wproj": p["wproj"].astype(jnp.bfloat16), "bproj": p["bproj"],
        })
    return prepped


# ----------------------------------------------------------------------------
if __name__ == "__main__":
    width, layers, heads = 32, 2, 4
    seq_len, batch = 8, 2

    key = jax.random.PRNGKey(0)
    key, kx = jax.random.split(key)
    x = jax.random.normal(kx, (seq_len, batch, width), jnp.float32)  # (L, N, E)

    params = init_params(key, width, layers)
    prepped = prepare_params(params, heads)

    out = transformer_forward(x, prepped, heads)
    out = jax.block_until_ready(out)
    assert out.shape == (seq_len, batch, width)
    assert jnp.all(jnp.isfinite(out))
    print("KERNEL_OK")
</pallas_src>

<mosaic_0001>
module attributes {stable_mosaic.version = 11 : i64} {
  func.func @layer_kernel(%arg0: i32, %arg1: memref<2x8x32xf32, #tpu.memory_space<vmem>>, %arg2: memref<1x32xf32, #tpu.memory_space<vmem>>, %arg3: memref<1x32xf32, #tpu.memory_space<vmem>>, %arg4: memref<32x96xbf16, #tpu.memory_space<vmem>>, %arg5: memref<1x96xf32, #tpu.memory_space<vmem>>, %arg6: memref<32x32xbf16, #tpu.memory_space<vmem>>, %arg7: memref<1x32xf32, #tpu.memory_space<vmem>>, %arg8: memref<1x32xf32, #tpu.memory_space<vmem>>, %arg9: memref<1x32xf32, #tpu.memory_space<vmem>>, %arg10: memref<32x128xbf16, #tpu.memory_space<vmem>>, %arg11: memref<1x128xf32, #tpu.memory_space<vmem>>, %arg12: memref<128x32xbf16, #tpu.memory_space<vmem>>, %arg13: memref<1x32xf32, #tpu.memory_space<vmem>>, %arg14: memref<2x8x32xf32, #tpu.memory_space<vmem>>) attributes {dimension_semantics = [#tpu.dimension_semantics<parallel>], iteration_bounds = array<i64: 1>, scalar_prefetch = 0 : i64, scratch_operands = 0 : i64, tpu.core_type = #tpu.core_type<tc>, window_params = [{transform_indices = @transform_0, window_bounds = array<i64: 2, 8, 32>}, {pipeline_mode = #tpu.pipeline_mode<synchronous>, transform_indices = @transform_1, window_bounds = array<i64: 1, 32>}, {pipeline_mode = #tpu.pipeline_mode<synchronous>, transform_indices = @transform_2, window_bounds = array<i64: 1, 32>}, {pipeline_mode = #tpu.pipeline_mode<synchronous>, transform_indices = @transform_3, window_bounds = array<i64: 32, 96>}, {pipeline_mode = #tpu.pipeline_mode<synchronous>, transform_indices = @transform_4, window_bounds = array<i64: 1, 96>}, {pipeline_mode = #tpu.pipeline_mode<synchronous>, transform_indices = @transform_5, window_bounds = array<i64: 32, 32>}, {pipeline_mode = #tpu.pipeline_mode<synchronous>, transform_indices = @transform_6, window_bounds = array<i64: 1, 32>}, {pipeline_mode = #tpu.pipeline_mode<synchronous>, transform_indices = @transform_7, window_bounds = array<i64: 1, 32>}, {pipeline_mode = #tpu.pipeline_mode<synchronous>, transform_indices = @transform_8, window_bounds = array<i64: 1, 32>}, {pipeline_mode = #tpu.pipeline_mode<synchronous>, transform_indices = @transform_9, window_bounds = array<i64: 32, 128>}, {pipeline_mode = #tpu.pipeline_mode<synchronous>, transform_indices = @transform_10, window_bounds = array<i64: 1, 128>}, {pipeline_mode = #tpu.pipeline_mode<synchronous>, transform_indices = @transform_11, window_bounds = array<i64: 128, 32>}, {pipeline_mode = #tpu.pipeline_mode<synchronous>, transform_indices = @transform_12, window_bounds = array<i64: 1, 32>}, {transform_indices = @transform_13, window_bounds = array<i64: 2, 8, 32>}]} {
    %c0 = arith.constant 0 : index
    %c0_0 = arith.constant 0 : index
    %c0_1 = arith.constant 0 : index
    %0 = vector.load %arg1[%c0, %c0_0, %c0_1] : memref<2x8x32xf32, #tpu.memory_space<vmem>>, vector<2x8x32xf32>
    %c0_2 = arith.constant 0 : index
    %c0_3 = arith.constant 0 : index
    %1 = vector.load %arg2[%c0_2, %c0_3] : memref<1x32xf32, #tpu.memory_space<vmem>>, vector<1x32xf32>
    %2 = vector.shape_cast %1 : vector<1x32xf32> to vector<32xf32>
    %c0_4 = arith.constant 0 : index
    %c0_5 = arith.constant 0 : index
    %3 = vector.load %arg3[%c0_4, %c0_5] : memref<1x32xf32, #tpu.memory_space<vmem>>, vector<1x32xf32>
    %4 = vector.shape_cast %3 : vector<1x32xf32> to vector<32xf32>
    %c0_6 = arith.constant 0 : index
    %c0_7 = arith.constant 0 : index
    %5 = vector.load %arg8[%c0_6, %c0_7] : memref<1x32xf32, #tpu.memory_space<vmem>>, vector<1x32xf32>
    %6 = vector.shape_cast %5 : vector<1x32xf32> to vector<32xf32>
    %c0_8 = arith.constant 0 : index
    %c0_9 = arith.constant 0 : index
    %7 = vector.load %arg9[%c0_8, %c0_9] : memref<1x32xf32, #tpu.memory_space<vmem>>, vector<1x32xf32>
    %8 = vector.shape_cast %7 : vector<1x32xf32> to vector<32xf32>
    %c0_10 = arith.constant 0 : index
    %c0_11 = arith.constant 0 : index
    %9 = vector.load %arg5[%c0_10, %c0_11] : memref<1x96xf32, #tpu.memory_space<vmem>>, vector<1x96xf32>
    %10 = vector.shape_cast %9 : vector<1x96xf32> to vector<96xf32>
    %c0_12 = arith.constant 0 : index
    %c0_13 = arith.constant 0 : index
    %11 = vector.load %arg7[%c0_12, %c0_13] : memref<1x32xf32, #tpu.memory_space<vmem>>, vector<1x32xf32>
    %12 = vector.shape_cast %11 : vector<1x32xf32> to vector<32xf32>
    %c0_14 = arith.constant 0 : index
    %c0_15 = arith.constant 0 : index
    %13 = vector.load %arg11[%c0_14, %c0_15] : memref<1x128xf32, #tpu.memory_space<vmem>>, vector<1x128xf32>
    %14 = vector.shape_cast %13 : vector<1x128xf32> to vector<128xf32>
    %c0_16 = arith.constant 0 : index
    %c0_17 = arith.constant 0 : index
    %15 = vector.load %arg13[%c0_16, %c0_17] : memref<1x32xf32, #tpu.memory_space<vmem>>, vector<1x32xf32>
    %16 = vector.shape_cast %15 : vector<1x32xf32> to vector<32xf32>
    %cst = arith.constant dense<0.000000e+00> : vector<2x8xf32>
    %17 = vector.multi_reduction <add>, %0, %cst [2] : vector<2x8x32xf32> to vector<2x8xf32>
    %18 = vector.shape_cast %17 : vector<2x8xf32> to vector<2x8x1xf32>
    %cst_18 = arith.constant 3.200000e+01 : f32
    %19 = vector.broadcast %cst_18 : f32 to vector<2x8x1xf32>
    %20 = arith.divf %18, %19 : vector<2x8x1xf32>
    %21 = vector.broadcast %20 : vector<2x8x1xf32> to vector<2x8x32xf32>
    %22 = arith.subf %0, %21 : vector<2x8x32xf32>
    %23 = arith.mulf %22, %22 : vector<2x8x32xf32>
    %cst_19 = arith.constant dense<0.000000e+00> : vector<2x8xf32>
    %24 = vector.multi_reduction <add>, %23, %cst_19 [2] : vector<2x8x32xf32> to vector<2x8xf32>
    %25 = vector.shape_cast %24 : vector<2x8xf32> to vector<2x8x1xf32>
    %cst_20 = arith.constant 3.200000e+01 : f32
    %26 = vector.broadcast %cst_20 : f32 to vector<2x8x1xf32>
    %27 = arith.divf %25, %26 : vector<2x8x1xf32>
    %28 = vector.broadcast %20 : vector<2x8x1xf32> to vector<2x8x32xf32>
    %29 = arith.subf %0, %28 : vector<2x8x32xf32>
    %cst_21 = arith.constant 9.99999974E-6 : f32
    %30 = vector.broadcast %cst_21 : f32 to vector<2x8x1xf32>
    %31 = arith.addf %27, %30 : vector<2x8x1xf32>
    %32 = math.rsqrt %31 : vector<2x8x1xf32>
    %33 = vector.broadcast %32 : vector<2x8x1xf32> to vector<2x8x32xf32>
    %34 = arith.mulf %29, %33 : vector<2x8x32xf32>
    %35 = vector.shape_cast %2 : vector<32xf32> to vector<1x1x32xf32>
    %36 = vector.broadcast %35 : vector<1x1x32xf32> to vector<2x8x32xf32>
    %37 = arith.mulf %34, %36 : vector<2x8x32xf32>
    %38 = vector.shape_cast %4 : vector<32xf32> to vector<1x1x32xf32>
    %39 = vector.broadcast %38 : vector<1x1x32xf32> to vector<2x8x32xf32>
    %40 = arith.addf %37, %39 : vector<2x8x32xf32>
    %41 = arith.truncf %40 : vector<2x8x32xf32> to vector<2x8x32xbf16>
    %42 = vector.shape_cast %41 : vector<2x8x32xbf16> to vector<16x32xbf16>
    %c0_22 = arith.constant 0 : index
    %c0_23 = arith.constant 0 : index
    %43 = vector.load %arg4[%c0_22, %c0_23] : memref<32x96xbf16, #tpu.memory_space<vmem>>, vector<32x96xbf16>
    %cst_24 = arith.constant dense<0.000000e+00> : vector<16x96xf32>
    %44 = tpu.matmul %42, %43, %cst_24 {dimension_numbers = #tpu.dot_dimension_numbers<[1], [0], [0], [1], [0, 0, 1, 1], [], []>} : vector<16x32xbf16>, vector<32x96xbf16>, vector<16x96xf32> -> vector<16x96xf32>
    %45 = vector.shape_cast %10 : vector<96xf32> to vector<1x96xf32>
    %46 = vector.broadcast %45 : vector<1x96xf32> to vector<16x96xf32>
    %47 = arith.addf %44, %46 : vector<16x96xf32>
    %48 = vector.extract_strided_slice %47 {offsets = [0, 0], sizes = [16, 32], strides = [1, 1]} : vector<16x96xf32> to vector<16x32xf32>
    %49 = arith.truncf %48 : vector<16x32xf32> to vector<16x32xbf16>
    %50 = vector.shape_cast %49 : vector<16x32xbf16> to vector<2x8x4x8xbf16>
    %51 = tpu.transpose %50, [0, 2, 1, 3] : vector<2x8x4x8xbf16> -> vector<2x4x8x8xbf16>
    %52 = vector.shape_cast %51 : vector<2x4x8x8xbf16> to vector<8x8x8xbf16>
    %53 = vector.extract_strided_slice %47 {offsets = [0, 32], sizes = [16, 32], strides = [1, 1]} : vector<16x96xf32> to vector<16x32xf32>
    %54 = arith.truncf %53 : vector<16x32xf32> to vector<16x32xbf16>
    %55 = vector.shape_cast %54 : vector<16x32xbf16> to vector<2x8x4x8xbf16>
    %56 = tpu.transpose %55, [0, 2, 1, 3] : vector<2x8x4x8xbf16> -> vector<2x4x8x8xbf16>
    %57 = vector.shape_cast %56 : vector<2x4x8x8xbf16> to vector<8x8x8xbf16>
    %58 = vector.extract_strided_slice %47 {offsets = [0, 64], sizes = [16, 32], strides = [1, 1]} : vector<16x96xf32> to vector<16x32xf32>
    %59 = arith.truncf %58 : vector<16x32xf32> to vector<16x32xbf16>
    %60 = vector.shape_cast %59 : vector<16x32xbf16> to vector<2x8x4x8xbf16>
    %61 = tpu.transpose %60, [0, 2, 1, 3] : vector<2x8x4x8xbf16> -> vector<2x4x8x8xbf16>
    %62 = vector.shape_cast %61 : vector<2x4x8x8xbf16> to vector<8x8x8xbf16>
    "tpu.trace_start"() <{level = 10 : i32, message = "bqd,bkd->bqk"}> : () -> ()
    %cst_25 = arith.constant dense<0.000000e+00> : vector<8x8x8xf32>
    %63 = tpu.matmul %52, %57, %cst_25 {dimension_numbers = #tpu.dot_dimension_numbers<[2], [2], [1], [1], [0, 0, 0, 1, 1, 1], [0], [0]>} : vector<8x8x8xbf16>, vector<8x8x8xbf16>, vector<8x8x8xf32> -> vector<8x8x8xf32>
    "tpu.trace_stop"() : () -> ()
    %cst_26 = arith.constant dense<0xFF800000> : vector<8x8xf32>
    %64 = vector.multi_reduction <maximumf>, %63, %cst_26 [2] : vector<8x8x8xf32> to vector<8x8xf32>
    %65 = vector.shape_cast %64 : vector<8x8xf32> to vector<8x8x1xf32>
    %66 = vector.broadcast %65 : vector<8x8x1xf32> to vector<8x8x8xf32>
    %67 = arith.subf %63, %66 : vector<8x8x8xf32>
    %68 = arith.truncf %67 : vector<8x8x8xf32> to vector<8x8x8xbf16>
    %69 = math.exp %68 : vector<8x8x8xbf16>
    %70 = arith.extf %69 : vector<8x8x8xbf16> to vector<8x8x8xf32>
    %cst_27 = arith.constant dense<0.000000e+00> : vector<8x8xf32>
    %71 = vector.multi_reduction <add>, %70, %cst_27 [2] : vector<8x8x8xf32> to vector<8x8xf32>
    %72 = vector.shape_cast %71 : vector<8x8xf32> to vector<8x8x1xf32>
    "tpu.trace_start"() <{level = 10 : i32, message = "bqk,bkd->bqd"}> : () -> ()
    %cst_28 = arith.constant dense<0.000000e+00> : vector<8x8x8xf32>
    %73 = tpu.matmul %69, %62, %cst_28 {dimension_numbers = #tpu.dot_dimension_numbers<[2], [1], [1], [2], [0, 0, 0, 1, 1, 2], [0], [0]>} : vector<8x8x8xbf16>, vector<8x8x8xbf16>, vector<8x8x8xf32> -> vector<8x8x8xf32>
    "tpu.trace_stop"() : () -> ()
    %74 = tpu.reciprocal %72 {approx = true} : vector<8x8x1xf32> -> vector<8x8x1xf32>
    %75 = vector.broadcast %74 : vector<8x8x1xf32> to vector<8x8x8xf32>
    %76 = arith.mulf %73, %75 : vector<8x8x8xf32>
    %77 = arith.truncf %76 : vector<8x8x8xf32> to vector<8x8x8xbf16>
    %78 = vector.shape_cast %77 : vector<8x8x8xbf16> to vector<2x4x8x8xbf16>
    %79 = tpu.transpose %78, [0, 2, 1, 3] : vector<2x4x8x8xbf16> -> vector<2x8x4x8xbf16>
    %80 = vector.shape_cast %79 : vector<2x8x4x8xbf16> to vector<16x32xbf16>
    %c0_29 = arith.constant 0 : index
    %c0_30 = arith.constant 0 : index
    %81 = vector.load %arg6[%c0_29, %c0_30] : memref<32x32xbf16, #tpu.memory_space<vmem>>, vector<32x32xbf16>
    %cst_31 = arith.constant dense<0.000000e+00> : vector<16x32xf32>
    %82 = tpu.matmul %80, %81, %cst_31 {dimension_numbers = #tpu.dot_dimension_numbers<[1], [0], [0], [1], [0, 0, 1, 1], [], []>} : vector<16x32xbf16>, vector<32x32xbf16>, vector<16x32xf32> -> vector<16x32xf32>
    %83 = vector.shape_cast %12 : vector<32xf32> to vector<1x32xf32>
    %84 = vector.broadcast %83 : vector<1x32xf32> to vector<16x32xf32>
    %85 = arith.addf %82, %84 : vector<16x32xf32>
    %86 = vector.shape_cast %85 : vector<16x32xf32> to vector<2x8x32xf32>
    %87 = arith.addf %0, %86 : vector<2x8x32xf32>
    %cst_32 = arith.constant dense<0.000000e+00> : vector<2x8xf32>
    %88 = vector.multi_reduction <add>, %87, %cst_32 [2] : vector<2x8x32xf32> to vector<2x8xf32>
    %89 = vector.shape_cast %88 : vector<2x8xf32> to vector<2x8x1xf32>
    %cst_33 = arith.constant 3.200000e+01 : f32
    %90 = vector.broadcast %cst_33 : f32 to vector<2x8x1xf32>
    %91 = arith.divf %89, %90 : vector<2x8x1xf32>
    %92 = vector.broadcast %91 : vector<2x8x1xf32> to vector<2x8x32xf32>
    %93 = arith.subf %87, %92 : vector<2x8x32xf32>
    %94 = arith.mulf %93, %93 : vector<2x8x32xf32>
    %cst_34 = arith.constant dense<0.000000e+00> : vector<2x8xf32>
    %95 = vector.multi_reduction <add>, %94, %cst_34 [2] : vector<2x8x32xf32> to vector<2x8xf32>
    %96 = vector.shape_cast %95 : vector<2x8xf32> to vector<2x8x1xf32>
    %cst_35 = arith.constant 3.200000e+01 : f32
    %97 = vector.broadcast %cst_35 : f32 to vector<2x8x1xf32>
    %98 = arith.divf %96, %97 : vector<2x8x1xf32>
    %99 = vector.broadcast %91 : vector<2x8x1xf32> to vector<2x8x32xf32>
    %100 = arith.subf %87, %99 : vector<2x8x32xf32>
    %cst_36 = arith.constant 9.99999974E-6 : f32
    %101 = vector.broadcast %cst_36 : f32 to vector<2x8x1xf32>
    %102 = arith.addf %98, %101 : vector<2x8x1xf32>
    %103 = math.rsqrt %102 : vector<2x8x1xf32>
    %104 = vector.broadcast %103 : vector<2x8x1xf32> to vector<2x8x32xf32>
    %105 = arith.mulf %100, %104 : vector<2x8x32xf32>
    %106 = vector.shape_cast %6 : vector<32xf32> to vector<1x1x32xf32>
    %107 = vector.broadcast %106 : vector<1x1x32xf32> to vector<2x8x32xf32>
    %108 = arith.mulf %105, %107 : vector<2x8x32xf32>
    %109 = vector.shape_cast %8 : vector<32xf32> to vector<1x1x32xf32>
    %110 = vector.broadcast %109 : vector<1x1x32xf32> to vector<2x8x32xf32>
    %111 = arith.addf %108, %110 : vector<2x8x32xf32>
    %112 = arith.truncf %111 : vector<2x8x32xf32> to vector<2x8x32xbf16>
    %113 = vector.shape_cast %112 : vector<2x8x32xbf16> to vector<16x32xbf16>
    %c0_37 = arith.constant 0 : index
    %c0_38 = arith.constant 0 : index
    %114 = vector.load %arg10[%c0_37, %c0_38] : memref<32x128xbf16, #tpu.memory_space<vmem>>, vector<32x128xbf16>
    %cst_39 = arith.constant dense<0.000000e+00> : vector<16x128xf32>
    %115 = tpu.matmul %113, %114, %cst_39 {dimension_numbers = #tpu.dot_dimension_numbers<[1], [0], [0], [1], [0, 0, 1, 1], [], []>} : vector<16x32xbf16>, vector<32x128xbf16>, vector<16x128xf32> -> vector<16x128xf32>
    %116 = vector.shape_cast %14 : vector<128xf32> to vector<1x128xf32>
    %117 = vector.broadcast %116 : vector<1x128xf32> to vector<16x128xf32>
    %118 = arith.addf %115, %117 : vector<16x128xf32>
    %119 = arith.truncf %118 : vector<16x128xf32> to vector<16x128xbf16>
    %cst_40 = arith.constant 1.703130e+00 : bf16
    %120 = vector.broadcast %cst_40 : bf16 to vector<16x128xbf16>
    %121 = arith.mulf %120, %119 : vector<16x128xbf16>
    %122 = arith.negf %121 : vector<16x128xbf16>
    %123 = math.exp %122 : vector<16x128xbf16>
    %cst_41 = arith.constant 1.000000e+00 : bf16
    %124 = vector.broadcast %cst_41 : bf16 to vector<16x128xbf16>
    %125 = arith.addf %124, %123 : vector<16x128xbf16>
    %126 = arith.divf %124, %125 : vector<16x128xbf16>
    %127 = arith.mulf %119, %126 : vector<16x128xbf16>
    %c0_42 = arith.constant 0 : index
    %c0_43 = arith.constant 0 : index
    %128 = vector.load %arg12[%c0_42, %c0_43] : memref<128x32xbf16, #tpu.memory_space<vmem>>, vector<128x32xbf16>
    %cst_44 = arith.constant dense<0.000000e+00> : vector<16x32xf32>
    %129 = tpu.matmul %127, %128, %cst_44 {dimension_numbers = #tpu.dot_dimension_numbers<[1], [0], [0], [1], [0, 0, 1, 1], [], []>} : vector<16x128xbf16>, vector<128x32xbf16>, vector<16x32xf32> -> vector<16x32xf32>
    %130 = vector.shape_cast %16 : vector<32xf32> to vector<1x32xf32>
    %131 = vector.broadcast %130 : vector<1x32xf32> to vector<16x32xf32>
    %132 = arith.addf %129, %131 : vector<16x32xf32>
    %133 = vector.shape_cast %132 : vector<16x32xf32> to vector<2x8x32xf32>
    %134 = arith.addf %87, %133 : vector<2x8x32xf32>
    %c0_45 = arith.constant 0 : index
    %c0_46 = arith.constant 0 : index
    %c0_47 = arith.constant 0 : index
    %135 = vector.load %arg14[%c0_45, %c0_46, %c0_47] : memref<2x8x32xf32, #tpu.memory_space<vmem>>, vector<2x8x32xf32>
    tpu.vector_store %arg14[%c0_45, %c0_46, %c0_47], %134 {strides = array<i32>} : memref<2x8x32xf32, #tpu.memory_space<vmem>>, vector<2x8x32xf32>,
    return
  }
  func.func @transform_0(%arg0: i32) -> (i32, i32, i32) {
    %c0_i32 = arith.constant 0 : i32
    %c0_i32_0 = arith.constant 0 : i32
    %c0_i32_1 = arith.constant 0 : i32
    return %arg0, %c0_i32, %c0_i32_0 : i32, i32, i32
  }
  func.func @transform_1(%arg0: i32) -> (i32, i32) {
    %c0_i32 = arith.constant 0 : i32
    %c0_i32_0 = arith.constant 0 : i32
    %c0_i32_1 = arith.constant 0 : i32
    return %c0_i32, %c0_i32_0 : i32, i32
  }
  func.func @transform_2(%arg0: i32) -> (i32, i32) {
    %c0_i32 = arith.constant 0 : i32
    %c0_i32_0 = arith.constant 0 : i32
    %c0_i32_1 = arith.constant 0 : i32
    return %c0_i32, %c0_i32_0 : i32, i32
  }
  func.func @transform_3(%arg0: i32) -> (i32, i32) {
    %c0_i32 = arith.constant 0 : i32
    %c0_i32_0 = arith.constant 0 : i32
    %c0_i32_1 = arith.constant 0 : i32
    return %c0_i32, %c0_i32_0 : i32, i32
  }
  func.func @transform_4(%arg0: i32) -> (i32, i32) {
    %c0_i32 = arith.constant 0 : i32
    %c0_i32_0 = arith.constant 0 : i32
    %c0_i32_1 = arith.constant 0 : i32
    return %c0_i32, %c0_i32_0 : i32, i32
  }
  func.func @transform_5(%arg0: i32) -> (i32, i32) {
    %c0_i32 = arith.constant 0 : i32
    %c0_i32_0 = arith.constant 0 : i32
    %c0_i32_1 = arith.constant 0 : i32
    return %c0_i32, %c0_i32_0 : i32, i32
  }
  func.func @transform_6(%arg0: i32) -> (i32, i32) {
    %c0_i32 = arith.constant 0 : i32
    %c0_i32_0 = arith.constant 0 : i32
    %c0_i32_1 = arith.constant 0 : i32
    return %c0_i32, %c0_i32_0 : i32, i32
  }
  func.func @transform_7(%arg0: i32) -> (i32, i32) {
    %c0_i32 = arith.constant 0 : i32
    %c0_i32_0 = arith.constant 0 : i32
    %c0_i32_1 = arith.constant 0 : i32
    return %c0_i32, %c0_i32_0 : i32, i32
  }
  func.func @transform_8(%arg0: i32) -> (i32, i32) {
    %c0_i32 = arith.constant 0 : i32
    %c0_i32_0 = arith.constant 0 : i32
    %c0_i32_1 = arith.constant 0 : i32
    return %c0_i32, %c0_i32_0 : i32, i32
  }
  func.func @transform_9(%arg0: i32) -> (i32, i32) {
    %c0_i32 = arith.constant 0 : i32
    %c0_i32_0 = arith.constant 0 : i32
    %c0_i32_1 = arith.constant 0 : i32
    return %c0_i32, %c0_i32_0 : i32, i32
  }
  func.func @transform_10(%arg0: i32) -> (i32, i32) {
    %c0_i32 = arith.constant 0 : i32
    %c0_i32_0 = arith.constant 0 : i32
    %c0_i32_1 = arith.constant 0 : i32
    return %c0_i32, %c0_i32_0 : i32, i32
  }
  func.func @transform_11(%arg0: i32) -> (i32, i32) {
    %c0_i32 = arith.constant 0 : i32
    %c0_i32_0 = arith.constant 0 : i32
    %c0_i32_1 = arith.constant 0 : i32
    return %c0_i32, %c0_i32_0 : i32, i32
  }
  func.func @transform_12(%arg0: i32) -> (i32, i32) {
    %c0_i32 = arith.constant 0 : i32
    %c0_i32_0 = arith.constant 0 : i32
    %c0_i32_1 = arith.constant 0 : i32
    return %c0_i32, %c0_i32_0 : i32, i32
  }
  func.func @transform_13(%arg0: i32) -> (i32, i32, i32) {
    %c0_i32 = arith.constant 0 : i32
    %c0_i32_0 = arith.constant 0 : i32
    %c0_i32_1 = arith.constant 0 : i32
    return %arg0, %c0_i32, %c0_i32_0 : i32, i32, i32
  }
}

module attributes {stable_mosaic.version = 11 : i64} {
  func.func @layer_kernel(%arg0: i32, %arg1: memref<2x8x32xf32, #tpu.memory_space<vmem>>, %arg2: memref<1x32xf32, #tpu.memory_space<vmem>>, %arg3: memref<1x32xf32, #tpu.memory_space<vmem>>, %arg4: memref<32x96xbf16, #tpu.memory_space<vmem>>, %arg5: memref<1x96xf32, #tpu.memory_space<vmem>>, %arg6: memref<32x32xbf16, #tpu.memory_space<vmem>>, %arg7: memref<1x32xf32, #tpu.memory_space<vmem>>, %arg8: memref<1x32xf32, #tpu.memory_space<vmem>>, %arg9: memref<1x32xf32, #tpu.memory_space<vmem>>, %arg10: memref<32x128xbf16, #tpu.memory_space<vmem>>, %arg11: memref<1x128xf32, #tpu.memory_space<vmem>>, %arg12: memref<128x32xbf16, #tpu.memory_space<vmem>>, %arg13: memref<1x32xf32, #tpu.memory_space<vmem>>, %arg14: memref<2x8x32xf32, #tpu.memory_space<vmem>>) attributes {dimension_semantics = [#tpu.dimension_semantics<parallel>], iteration_bounds = array<i64: 1>, scalar_prefetch = 0 : i64, scratch_operands = 0 : i64, tpu.core_type = #tpu.core_type<tc>, window_params = [{transform_indices = @transform_0, window_bounds = array<i64: 2, 8, 32>}, {pipeline_mode = #tpu.pipeline_mode<synchronous>, transform_indices = @transform_1, window_bounds = array<i64: 1, 32>}, {pipeline_mode = #tpu.pipeline_mode<synchronous>, transform_indices = @transform_2, window_bounds = array<i64: 1, 32>}, {pipeline_mode = #tpu.pipeline_mode<synchronous>, transform_indices = @transform_3, window_bounds = array<i64: 32, 96>}, {pipeline_mode = #tpu.pipeline_mode<synchronous>, transform_indices = @transform_4, window_bounds = array<i64: 1, 96>}, {pipeline_mode = #tpu.pipeline_mode<synchronous>, transform_indices = @transform_5, window_bounds = array<i64: 32, 32>}, {pipeline_mode = #tpu.pipeline_mode<synchronous>, transform_indices = @transform_6, window_bounds = array<i64: 1, 32>}, {pipeline_mode = #tpu.pipeline_mode<synchronous>, transform_indices = @transform_7, window_bounds = array<i64: 1, 32>}, {pipeline_mode = #tpu.pipeline_mode<synchronous>, transform_indices = @transform_8, window_bounds = array<i64: 1, 32>}, {pipeline_mode = #tpu.pipeline_mode<synchronous>, transform_indices = @transform_9, window_bounds = array<i64: 32, 128>}, {pipeline_mode = #tpu.pipeline_mode<synchronous>, transform_indices = @transform_10, window_bounds = array<i64: 1, 128>}, {pipeline_mode = #tpu.pipeline_mode<synchronous>, transform_indices = @transform_11, window_bounds = array<i64: 128, 32>}, {pipeline_mode = #tpu.pipeline_mode<synchronous>, transform_indices = @transform_12, window_bounds = array<i64: 1, 32>}, {transform_indices = @transform_13, window_bounds = array<i64: 2, 8, 32>}]} {
    %c0 = arith.constant 0 : index
    %c0_0 = arith.constant 0 : index
    %c0_1 = arith.constant 0 : index
    %0 = vector.load %arg1[%c0, %c0_0, %c0_1] : memref<2x8x32xf32, #tpu.memory_space<vmem>>, vector<2x8x32xf32>
    %c0_2 = arith.constant 0 : index
    %c0_3 = arith.constant 0 : index
    %1 = vector.load %arg2[%c0_2, %c0_3] : memref<1x32xf32, #tpu.memory_space<vmem>>, vector<1x32xf32>
    %2 = vector.shape_cast %1 : vector<1x32xf32> to vector<32xf32>
    %c0_4 = arith.constant 0 : index
    %c0_5 = arith.constant 0 : index
    %3 = vector.load %arg3[%c0_4, %c0_5] : memref<1x32xf32, #tpu.memory_space<vmem>>, vector<1x32xf32>
    %4 = vector.shape_cast %3 : vector<1x32xf32> to vector<32xf32>
    %c0_6 = arith.constant 0 : index
    %c0_7 = arith.constant 0 : index
    %5 = vector.load %arg8[%c0_6, %c0_7] : memref<1x32xf32, #tpu.memory_space<vmem>>, vector<1x32xf32>
    %6 = vector.shape_cast %5 : vector<1x32xf32> to vector<32xf32>
    %c0_8 = arith.constant 0 : index
    %c0_9 = arith.constant 0 : index
    %7 = vector.load %arg9[%c0_8, %c0_9] : memref<1x32xf32, #tpu.memory_space<vmem>>, vector<1x32xf32>
    %8 = vector.shape_cast %7 : vector<1x32xf32> to vector<32xf32>
    %c0_10 = arith.constant 0 : index
    %c0_11 = arith.constant 0 : index
    %9 = vector.load %arg5[%c0_10, %c0_11] : memref<1x96xf32, #tpu.memory_space<vmem>>, vector<1x96xf32>
    %10 = vector.shape_cast %9 : vector<1x96xf32> to vector<96xf32>
    %c0_12 = arith.constant 0 : index
    %c0_13 = arith.constant 0 : index
    %11 = vector.load %arg7[%c0_12, %c0_13] : memref<1x32xf32, #tpu.memory_space<vmem>>, vector<1x32xf32>
    %12 = vector.shape_cast %11 : vector<1x32xf32> to vector<32xf32>
    %c0_14 = arith.constant 0 : index
    %c0_15 = arith.constant 0 : index
    %13 = vector.load %arg11[%c0_14, %c0_15] : memref<1x128xf32, #tpu.memory_space<vmem>>, vector<1x128xf32>
    %14 = vector.shape_cast %13 : vector<1x128xf32> to vector<128xf32>
    %c0_16 = arith.constant 0 : index
    %c0_17 = arith.constant 0 : index
    %15 = vector.load %arg13[%c0_16, %c0_17] : memref<1x32xf32, #tpu.memory_space<vmem>>, vector<1x32xf32>
    %16 = vector.shape_cast %15 : vector<1x32xf32> to vector<32xf32>
    %cst = arith.constant dense<0.000000e+00> : vector<2x8xf32>
    %17 = vector.multi_reduction <add>, %0, %cst [2] : vector<2x8x32xf32> to vector<2x8xf32>
    %18 = vector.shape_cast %17 : vector<2x8xf32> to vector<2x8x1xf32>
    %cst_18 = arith.constant 3.200000e+01 : f32
    %19 = vector.broadcast %cst_18 : f32 to vector<2x8x1xf32>
    %20 = arith.divf %18, %19 : vector<2x8x1xf32>
    %21 = vector.broadcast %20 : vector<2x8x1xf32> to vector<2x8x32xf32>
    %22 = arith.subf %0, %21 : vector<2x8x32xf32>
    %23 = arith.mulf %22, %22 : vector<2x8x32xf32>
    %cst_19 = arith.constant dense<0.000000e+00> : vector<2x8xf32>
    %24 = vector.multi_reduction <add>, %23, %cst_19 [2] : vector<2x8x32xf32> to vector<2x8xf32>
    %25 = vector.shape_cast %24 : vector<2x8xf32> to vector<2x8x1xf32>
    %cst_20 = arith.constant 3.200000e+01 : f32
    %26 = vector.broadcast %cst_20 : f32 to vector<2x8x1xf32>
    %27 = arith.divf %25, %26 : vector<2x8x1xf32>
    %28 = vector.broadcast %20 : vector<2x8x1xf32> to vector<2x8x32xf32>
    %29 = arith.subf %0, %28 : vector<2x8x32xf32>
    %cst_21 = arith.constant 9.99999974E-6 : f32
    %30 = vector.broadcast %cst_21 : f32 to vector<2x8x1xf32>
    %31 = arith.addf %27, %30 : vector<2x8x1xf32>
    %32 = math.rsqrt %31 : vector<2x8x1xf32>
    %33 = vector.broadcast %32 : vector<2x8x1xf32> to vector<2x8x32xf32>
    %34 = arith.mulf %29, %33 : vector<2x8x32xf32>
    %35 = vector.shape_cast %2 : vector<32xf32> to vector<1x1x32xf32>
    %36 = vector.broadcast %35 : vector<1x1x32xf32> to vector<2x8x32xf32>
    %37 = arith.mulf %34, %36 : vector<2x8x32xf32>
    %38 = vector.shape_cast %4 : vector<32xf32> to vector<1x1x32xf32>
    %39 = vector.broadcast %38 : vector<1x1x32xf32> to vector<2x8x32xf32>
    %40 = arith.addf %37, %39 : vector<2x8x32xf32>
    %41 = arith.truncf %40 : vector<2x8x32xf32> to vector<2x8x32xbf16>
    %42 = vector.shape_cast %41 : vector<2x8x32xbf16> to vector<16x32xbf16>
    %c0_22 = arith.constant 0 : index
    %c0_23 = arith.constant 0 : index
    %43 = vector.load %arg4[%c0_22, %c0_23] : memref<32x96xbf16, #tpu.memory_space<vmem>>, vector<32x96xbf16>
    %cst_24 = arith.constant dense<0.000000e+00> : vector<16x96xf32>
    %44 = tpu.matmul %42, %43, %cst_24 {dimension_numbers = #tpu.dot_dimension_numbers<[1], [0], [0], [1], [0, 0, 1, 1], [], []>} : vector<16x32xbf16>, vector<32x96xbf16>, vector<16x96xf32> -> vector<16x96xf32>
    %45 = vector.shape_cast %10 : vector<96xf32> to vector<1x96xf32>
    %46 = vector.broadcast %45 : vector<1x96xf32> to vector<16x96xf32>
    %47 = arith.addf %44, %46 : vector<16x96xf32>
    %48 = vector.extract_strided_slice %47 {offsets = [0, 0], sizes = [16, 32], strides = [1, 1]} : vector<16x96xf32> to vector<16x32xf32>
    %49 = arith.truncf %48 : vector<16x32xf32> to vector<16x32xbf16>
    %50 = vector.shape_cast %49 : vector<16x32xbf16> to vector<2x8x4x8xbf16>
    %51 = tpu.transpose %50, [0, 2, 1, 3] : vector<2x8x4x8xbf16> -> vector<2x4x8x8xbf16>
    %52 = vector.shape_cast %51 : vector<2x4x8x8xbf16> to vector<8x8x8xbf16>
    %53 = vector.extract_strided_slice %47 {offsets = [0, 32], sizes = [16, 32], strides = [1, 1]} : vector<16x96xf32> to vector<16x32xf32>
    %54 = arith.truncf %53 : vector<16x32xf32> to vector<16x32xbf16>
    %55 = vector.shape_cast %54 : vector<16x32xbf16> to vector<2x8x4x8xbf16>
    %56 = tpu.transpose %55, [0, 2, 1, 3] : vector<2x8x4x8xbf16> -> vector<2x4x8x8xbf16>
    %57 = vector.shape_cast %56 : vector<2x4x8x8xbf16> to vector<8x8x8xbf16>
    %58 = vector.extract_strided_slice %47 {offsets = [0, 64], sizes = [16, 32], strides = [1, 1]} : vector<16x96xf32> to vector<16x32xf32>
    %59 = arith.truncf %58 : vector<16x32xf32> to vector<16x32xbf16>
    %60 = vector.shape_cast %59 : vector<16x32xbf16> to vector<2x8x4x8xbf16>
    %61 = tpu.transpose %60, [0, 2, 1, 3] : vector<2x8x4x8xbf16> -> vector<2x4x8x8xbf16>
    %62 = vector.shape_cast %61 : vector<2x4x8x8xbf16> to vector<8x8x8xbf16>
    "tpu.trace_start"() <{level = 10 : i32, message = "bqd,bkd->bqk"}> : () -> ()
    %cst_25 = arith.constant dense<0.000000e+00> : vector<8x8x8xf32>
    %63 = tpu.matmul %52, %57, %cst_25 {dimension_numbers = #tpu.dot_dimension_numbers<[2], [2], [1], [1], [0, 0, 0, 1, 1, 1], [0], [0]>} : vector<8x8x8xbf16>, vector<8x8x8xbf16>, vector<8x8x8xf32> -> vector<8x8x8xf32>
    "tpu.trace_stop"() : () -> ()
    %cst_26 = arith.constant dense<0xFF800000> : vector<8x8xf32>
    %64 = vector.multi_reduction <maximumf>, %63, %cst_26 [2] : vector<8x8x8xf32> to vector<8x8xf32>
    %65 = vector.shape_cast %64 : vector<8x8xf32> to vector<8x8x1xf32>
    %66 = vector.broadcast %65 : vector<8x8x1xf32> to vector<8x8x8xf32>
    %67 = arith.subf %63, %66 : vector<8x8x8xf32>
    %68 = arith.truncf %67 : vector<8x8x8xf32> to vector<8x8x8xbf16>
    %69 = math.exp %68 : vector<8x8x8xbf16>
    %70 = arith.extf %69 : vector<8x8x8xbf16> to vector<8x8x8xf32>
    %cst_27 = arith.constant dense<0.000000e+00> : vector<8x8xf32>
    %71 = vector.multi_reduction <add>, %70, %cst_27 [2] : vector<8x8x8xf32> to vector<8x8xf32>
    %72 = vector.shape_cast %71 : vector<8x8xf32> to vector<8x8x1xf32>
    "tpu.trace_start"() <{level = 10 : i32, message = "bqk,bkd->bqd"}> : () -> ()
    %cst_28 = arith.constant dense<0.000000e+00> : vector<8x8x8xf32>
    %73 = tpu.matmul %69, %62, %cst_28 {dimension_numbers = #tpu.dot_dimension_numbers<[2], [1], [1], [2], [0, 0, 0, 1, 1, 2], [0], [0]>} : vector<8x8x8xbf16>, vector<8x8x8xbf16>, vector<8x8x8xf32> -> vector<8x8x8xf32>
    "tpu.trace_stop"() : () -> ()
    %74 = tpu.reciprocal %72 {approx = true} : vector<8x8x1xf32> -> vector<8x8x1xf32>
    %75 = vector.broadcast %74 : vector<8x8x1xf32> to vector<8x8x8xf32>
    %76 = arith.mulf %73, %75 : vector<8x8x8xf32>
    %77 = arith.truncf %76 : vector<8x8x8xf32> to vector<8x8x8xbf16>
    %78 = vector.shape_cast %77 : vector<8x8x8xbf16> to vector<2x4x8x8xbf16>
    %79 = tpu.transpose %78, [0, 2, 1, 3] : vector<2x4x8x8xbf16> -> vector<2x8x4x8xbf16>
    %80 = vector.shape_cast %79 : vector<2x8x4x8xbf16> to vector<16x32xbf16>
    %c0_29 = arith.constant 0 : index
    %c0_30 = arith.constant 0 : index
    %81 = vector.load %arg6[%c0_29, %c0_30] : memref<32x32xbf16, #tpu.memory_space<vmem>>, vector<32x32xbf16>
    %cst_31 = arith.constant dense<0.000000e+00> : vector<16x32xf32>
    %82 = tpu.matmul %80, %81, %cst_31 {dimension_numbers = #tpu.dot_dimension_numbers<[1], [0], [0], [1], [0, 0, 1, 1], [], []>} : vector<16x32xbf16>, vector<32x32xbf16>, vector<16x32xf32> -> vector<16x32xf32>
    %83 = vector.shape_cast %12 : vector<32xf32> to vector<1x32xf32>
    %84 = vector.broadcast %83 : vector<1x32xf32> to vector<16x32xf32>
    %85 = arith.addf %82, %84 : vector<16x32xf32>
    %86 = vector.shape_cast %85 : vector<16x32xf32> to vector<2x8x32xf32>
    %87 = arith.addf %0, %86 : vector<2x8x32xf32>
    %cst_32 = arith.constant dense<0.000000e+00> : vector<2x8xf32>
    %88 = vector.multi_reduction <add>, %87, %cst_32 [2] : vector<2x8x32xf32> to vector<2x8xf32>
    %89 = vector.shape_cast %88 : vector<2x8xf32> to vector<2x8x1xf32>
    %cst_33 = arith.constant 3.200000e+01 : f32
    %90 = vector.broadcast %cst_33 : f32 to vector<2x8x1xf32>
    %91 = arith.divf %89, %90 : vector<2x8x1xf32>
    %92 = vector.broadcast %91 : vector<2x8x1xf32> to vector<2x8x32xf32>
    %93 = arith.subf %87, %92 : vector<2x8x32xf32>
    %94 = arith.mulf %93, %93 : vector<2x8x32xf32>
    %cst_34 = arith.constant dense<0.000000e+00> : vector<2x8xf32>
    %95 = vector.multi_reduction <add>, %94, %cst_34 [2] : vector<2x8x32xf32> to vector<2x8xf32>
    %96 = vector.shape_cast %95 : vector<2x8xf32> to vector<2x8x1xf32>
    %cst_35 = arith.constant 3.200000e+01 : f32
    %97 = vector.broadcast %cst_35 : f32 to vector<2x8x1xf32>
    %98 = arith.divf %96, %97 : vector<2x8x1xf32>
    %99 = vector.broadcast %91 : vector<2x8x1xf32> to vector<2x8x32xf32>
    %100 = arith.subf %87, %99 : vector<2x8x32xf32>
    %cst_36 = arith.constant 9.99999974E-6 : f32
    %101 = vector.broadcast %cst_36 : f32 to vector<2x8x1xf32>
    %102 = arith.addf %98, %101 : vector<2x8x1xf32>
    %103 = math.rsqrt %102 : vector<2x8x1xf32>
    %104 = vector.broadcast %103 : vector<2x8x1xf32> to vector<2x8x32xf32>
    %105 = arith.mulf %100, %104 : vector<2x8x32xf32>
    %106 = vector.shape_cast %6 : vector<32xf32> to vector<1x1x32xf32>
    %107 = vector.broadcast %106 : vector<1x1x32xf32> to vector<2x8x32xf32>
    %108 = arith.mulf %105, %107 : vector<2x8x32xf32>
    %109 = vector.shape_cast %8 : vector<32xf32> to vector<1x1x32xf32>
    %110 = vector.broadcast %109 : vector<1x1x32xf32> to vector<2x8x32xf32>
    %111 = arith.addf %108, %110 : vector<2x8x32xf32>
    %112 = arith.truncf %111 : vector<2x8x32xf32> to vector<2x8x32xbf16>
    %113 = vector.shape_cast %112 : vector<2x8x32xbf16> to vector<16x32xbf16>
    %c0_37 = arith.constant 0 : index
    %c0_38 = arith.constant 0 : index
    %114 = vector.load %arg10[%c0_37, %c0_38] : memref<32x128xbf16, #tpu.memory_space<vmem>>, vector<32x128xbf16>
    %cst_39 = arith.constant dense<0.000000e+00> : vector<16x128xf32>
    %115 = tpu.matmul %113, %114, %cst_39 {dimension_numbers = #tpu.dot_dimension_numbers<[1], [0], [0], [1], [0, 0, 1, 1], [], []>} : vector<16x32xbf16>, vector<32x128xbf16>, vector<16x128xf32> -> vector<16x128xf32>
    %116 = vector.shape_cast %14 : vector<128xf32> to vector<1x128xf32>
    %117 = vector.broadcast %116 : vector<1x128xf32> to vector<16x128xf32>
    %118 = arith.addf %115, %117 : vector<16x128xf32>
    %119 = arith.truncf %118 : vector<16x128xf32> to vector<16x128xbf16>
    %cst_40 = arith.constant 1.703130e+00 : bf16
    %120 = vector.broadcast %cst_40 : bf16 to vector<16x128xbf16>
    %121 = arith.mulf %120, %119 : vector<16x128xbf16>
    %122 = arith.negf %121 : vector<16x128xbf16>
    %123 = math.exp %122 : vector<16x128xbf16>
    %cst_41 = arith.constant 1.000000e+00 : bf16
    %124 = vector.broadcast %cst_41 : bf16 to vector<16x128xbf16>
    %125 = arith.addf %124, %123 : vector<16x128xbf16>
    %126 = arith.divf %124, %125 : vector<16x128xbf16>
    %127 = arith.mulf %119, %126 : vector<16x128xbf16>
    %c0_42 = arith.constant 0 : index
    %c0_43 = arith.constant 0 : index
    %128 = vector.load %arg12[%c0_42, %c0_43] : memref<128x32xbf16, #tpu.memory_space<vmem>>, vector<128x32xbf16>
    %cst_44 = arith.constant dense<0.000000e+00> : vector<16x32xf32>
    %129 = tpu.matmul %127, %128, %cst_44 {dimension_numbers = #tpu.dot_dimension_numbers<[1], [0], [0], [1], [0, 0, 1, 1], [], []>} : vector<16x128xbf16>, vector<128x32xbf16>, vector<16x32xf32> -> vector<16x32xf32>
    %130 = vector.shape_cast %16 : vector<32xf32> to vector<1x32xf32>
    %131 = vector.broadcast %130 : vector<1x32xf32> to vector<16x32xf32>
    %132 = arith.addf %129, %131 : vector<16x32xf32>
    %133 = vector.shape_cast %132 : vector<16x32xf32> to vector<2x8x32xf32>
    %134 = arith.addf %87, %133 : vector<2x8x32xf32>
    %c0_45 = arith.constant 0 : index
    %c0_46 = arith.constant 0 : index
    %c0_47 = arith.constant 0 : index
    %135 = vector.load %arg14[%c0_45, %c0_46, %c0_47] : memref<2x8x32xf32, #tpu.memory_space<vmem>>, vector<2x8x32xf32>
    tpu.vector_store %arg14[%c0_45, %c0_46, %c0_47], %134 {strides = array<i32>} : memref<2x8x32xf32, #tpu.memory_space<vmem>>, vector<2x8x32xf32>,
    return
  }
  func.func @transform_0(%arg0: i32) -> (i32, i32, i32) {
    %c0_i32 = arith.constant 0 : i32
    %c0_i32_0 = arith.constant 0 : i32
    %c0_i32_1 = arith.constant 0 : i32
    return %arg0, %c0_i32, %c0_i32_0 : i32, i32, i32
  }
  func.func @transform_1(%arg0: i32) -> (i32, i32) {
    %c0_i32 = arith.constant 0 : i32
    %c0_i32_0 = arith.constant 0 : i32
    %c0_i32_1 = arith.constant 0 : i32
    return %c0_i32, %c0_i32_0 : i32, i32
  }
  func.func @transform_2(%arg0: i32) -> (i32, i32) {
    %c0_i32 = arith.constant 0 : i32
    %c0_i32_0 = arith.constant 0 : i32
    %c0_i32_1 = arith.constant 0 : i32
    return %c0_i32, %c0_i32_0 : i32, i32
  }
  func.func @transform_3(%arg0: i32) -> (i32, i32) {
    %c0_i32 = arith.constant 0 : i32
    %c0_i32_0 = arith.constant 0 : i32
    %c0_i32_1 = arith.constant 0 : i32
    return %c0_i32, %c0_i32_0 : i32, i32
  }
  func.func @transform_4(%arg0: i32) -> (i32, i32) {
    %c0_i32 = arith.constant 0 : i32
    %c0_i32_0 = arith.constant 0 : i32
    %c0_i32_1 = arith.constant 0 : i32
    return %c0_i32, %c0_i32_0 : i32, i32
  }
  func.func @transform_5(%arg0: i32) -> (i32, i32) {
    %c0_i32 = arith.constant 0 : i32
    %c0_i32_0 = arith.constant 0 : i32
    %c0_i32_1 = arith.constant 0 : i32
    return %c0_i32, %c0_i32_0 : i32, i32
  }
  func.func @transform_6(%arg0: i32) -> (i32, i32) {
    %c0_i32 = arith.constant 0 : i32
    %c0_i32_0 = arith.constant 0 : i32
    %c0_i32_1 = arith.constant 0 : i32
    return %c0_i32, %c0_i32_0 : i32, i32
  }
  func.func @transform_7(%arg0: i32) -> (i32, i32) {
    %c0_i32 = arith.constant 0 : i32
    %c0_i32_0 = arith.constant 0 : i32
    %c0_i32_1 = arith.constant 0 : i32
    return %c0_i32, %c0_i32_0 : i32, i32
  }
  func.func @transform_8(%arg0: i32) -> (i32, i32) {
    %c0_i32 = arith.constant 0 : i32
    %c0_i32_0 = arith.constant 0 : i32
    %c0_i32_1 = arith.constant 0 : i32
    return %c0_i32, %c0_i32_0 : i32, i32
  }
  func.func @transform_9(%arg0: i32) -> (i32, i32) {
    %c0_i32 = arith.constant 0 : i32
    %c0_i32_0 = arith.constant 0 : i32
    %c0_i32_1 = arith.constant 0 : i32
    return %c0_i32, %c0_i32_0 : i32, i32
  }
  func.func @transform_10(%arg0: i32) -> (i32, i32) {
    %c0_i32 = arith.constant 0 : i32
    %c0_i32_0 = arith.constant 0 : i32
    %c0_i32_1 = arith.constant 0 : i32
    return %c0_i32, %c0_i32_0 : i32, i32
  }
  func.func @transform_11(%arg0: i32) -> (i32, i32) {
    %c0_i32 = arith.constant 0 : i32
    %c0_i32_0 = arith.constant 0 : i32
    %c0_i32_1 = arith.constant 0 : i32
    return %c0_i32, %c0_i32_0 : i32, i32
  }
  func.func @transform_12(%arg0: i32) -> (i32, i32) {
    %c0_i32 = arith.constant 0 : i32
    %c0_i32_0 = arith.constant 0 : i32
    %c0_i32_1 = arith.constant 0 : i32
    return %c0_i32, %c0_i32_0 : i32, i32
  }
  func.func @transform_13(%arg0: i32) -> (i32, i32, i32) {
    %c0_i32 = arith.constant 0 : i32
    %c0_i32_0 = arith.constant 0 : i32
    %c0_i32_1 = arith.constant 0 : i32
    return %arg0, %c0_i32, %c0_i32_0 : i32, i32, i32
  }
}

</mosaic_0001>

<bundles_post_ra>
// kernel: tpu_custom_call.1
= control target key start
LH: loop header
LB: loop body
LE: loop exit
PB: predicated region body
PF: predicated region fallthrough
CT: control target
= control target key end

     0   :  { %18 = vsyncpa [#allocation3], 0  ;;  %s3442_s0 = inlined_call_operand.hbm [shape: f32[2,8,32], index: 0, kind: input, shape index: {}, may-alias: {0,13}]   ;;  %s3443_s1 = inlined_call_operand.vmem [shape: f32[1,32], index: 1, kind: input, shape index: {}]   ;;  %s3444_s2 = inlined_call_operand.vmem [shape: f32[1,32], index: 2, kind: input, shape index: {}]   ;;  %s3445_s3 = inlined_call_operand.vmem [shape: bf16[32,96], index: 3, kind: input, shape index: {}]   ;;  %s3446_s4 = inlined_call_operand.vmem [shape: f32[1,96], index: 4, kind: input, shape index: {}]   ;;  %s3447_s5 = inlined_call_operand.vmem [shape: bf16[32,32], index: 5, kind: input, shape index: {}]   ;;  %s3448_s6 = inlined_call_operand.vmem [shape: f32[1,32], index: 6, kind: input, shape index: {}]   ;;  %s3449_s7 = inlined_call_operand.vmem [shape: f32[1,32], index: 7, kind: input, shape index: {}]   ;;  %s3450_s8 = inlined_call_operand.vmem [shape: f32[1,32], index: 8, kind: input, shape index: {}]   ;;  %s3451_s9 = inlined_call_operand.vmem [shape: bf16[32,128], index: 9, kind: input, shape index: {}]   ;;  %s3452_s10 = inlined_call_operand.vmem [shape: f32[1,128], index: 10, kind: input, shape index: {}]   ;;  %s3453_s11 = inlined_call_operand.vmem [shape: bf16[128,32], index: 11, kind: input, shape index: {}]   ;;  %s3454_s12 = inlined_call_operand.vmem [shape: f32[1,32], index: 12, kind: input, shape index: {}]   ;;  %s3455_s13 = inlined_call_operand.hbm [shape: f32[2,8,32], index: 13, kind: output, shape index: {}, may-alias: {0,13}]  }
   0x1   :  { %19 = vsyncpa [#allocation4], 0  ;;  %s2904_s25 = smov [#allocation2]  }
   0x2   :  { %s25_s26 = sshll.u32 %s2904_s25, 4  ;;  %s26_s26 = int_to_ptr.vmem [resolvable:$true] %s25_s26 }
   0x3   :  { %s2868_s27 = scalar_lea.vmem %s26_s26, 256  ;;  %p2873_p1 = scmp.lt.s32.totalorder %s26_s26, %s26_s26 }
   0x4   :  { %p2869_p0 = scmp.ne.s32.totalorder %s26_s26, %s2868_s27  ;;  %p2874_p2 = scmp.lt.s32.totalorder %s2868_s27, %s2868_s27 }
   0x6   :  { %p2875_p3 = por %p2874_p2, %p2873_p1 }
   0x8   :  { %p2876_p4 = pnand %p2875_p3, %p2869_p0 }
   0xa   :  { %2879 = shalt.err (!%p2876_p4)
}
   0xb   :  { %s2905_s28 = smov 128   ;;  %s2906_s29 = smov 8  }
   0xc   :  { %31 = dma.hbm_to_vmem [thread:$0]  %s3442_s0, 256, %s26_s26, [#allocation3], %s2905_s28, %s2905_s28, %s2906_s29  }
   0xd   :  { %2900 = dma.done.wait [#allocation3], 256  }
   0xe   :  { %2901 = vsyncadd [#allocation3], 4294967040  ;;  %vm72_vm0 = vcmask 261120   ;;  %v62_v0 = vld [vmem:[#allocation2] sm:$0xff]  ;;  %v63_v1 = vld [vmem:[#allocation2 + $0x8] sm:$0xff]  ;;  %v2907_v15 = vmov 0.0   ;;  %v223_v47 = vlaneseq }
   0xf   :  { %v73_v2 = vsel %vm72_vm0, %v62_v0, 0.0  ;;  %v76_v3 = vsel %vm72_vm0, %v63_v1, 0.0  ;;  %v2800_v14 = vld [vmem:[%s3445_s3 + $0x8] sm:$0xff]   ;;  %2644 = vmatprep.subr.bf16.mxu0 %v2907_v15  ;;  %vm2908_vm1 = vmmov 0   ;;  %v2801_v16 = vld [vmem:[%s3445_s3] sm:$0xff]   ;;  %2664 = vmatprep.subr.bf16.mxu1 %v2907_v15  ;;  %s2911_s23 = smov 104  }
  0x10   :  { %74 = vadd.xlane.f32.xlu0 %v73_v2  ;;  %2648 = vmatprep.mubr.msk.bf16.mxu0 %vm2908_vm1, %v2907_v15  ;;  %v2536_v25 = vld [vmem:[%s3443_s1] ss:$0 sm:$0xff]  ;;  %s2909_s1 = smov 112   ;;  %s2912_s24 = smov 96   ;;  %v2914_v45 = vmov 1983009808  }
  0x11   :  { %2645 = vmatpush3.bf16.msra.mxu0 %v2800_v14  ;;  %2666 = vmatprep.mubr.msk.bf16.mxu1 %vm2908_vm1, %v2907_v15  ;;  %v2537_v29 = vld [vmem:[%s3444_s2] ss:$0 sm:$0xff]  ;;  %s2910_s2 = smov 120   ;;  %v221_v46 = vunpack.c.l.s4 %v2914_v45  ;;  %v224_v49 = vshrl.u32 %v223_v47, 7  ;;  %v2915_v52 = vmov 1934713408  }
  0x12   :  { %2646 = vmatprep.subr.bf16.mxu0 %v2907_v15  ;;  %v2538_v35 = vld [vmem:[%s3446_s4] ss:$0 sm:$0xff]  ;;  %s2913_s4 = smov 64   ;;  %v252_v53 = vunpack.c.l.s4 %v2915_v52  ;;  %v2916_v60 = vmov 0   ;;  %vm1035_vm2 = vcmask 64512   ;;  %vm1503_vm3 = vcmask 1043456  }
  0x13   :  { %v222_v48 = vunpack.c.0.s8 %v221_v46  ;;  %v3042_v61 = vpack.i.b16 %v2916_v60, %v2916_v60  ;;  %s2918_s14 = smov 24   ;;  %vm2206_vm4 = vcmask 130048   ;;  %vm2209_vm5 = vcmask 195584  }
  0x14   :  { %77 = vadd.xlane.f32.xlu0 %v76_v3  ;;  %v253_v63 = vunpack.c.0.s8 %v252_v53 }
  0x15   :  { %2647 = vmatpush3.bf16.msra.mxu0 %v2801_v16  ;;  %v3038_v57 = vsub.s32 %v222_v48, %v224_v49 }
  0x16   :  { %2652 = vmatprep.subr.bf16.mxu0 %v2907_v15 }
  0x99   :  { %v75_v4 = vpop.xlane.xlu0 %74 }
  0x9a   :  { %v80_v5 = vmul.f32 0.03125, %v75_v4 }
  0x9c   :  { %v82_v6 = vsub.f32 %v62_v0, %v80_v5 }
  0x9d   :  { %v78_v7 = vpop.xlane.xlu0 %77 }
  0x9e   :  { %v81_v8 = vmul.f32 0.03125, %v78_v7  ;;  %v84_v9 = vmul.f32 %v82_v6, %v82_v6  ;;  %v3050_v7 = vsub.s32 %v253_v63, %v224_v49 }
  0xa0   :  { %v83_v10 = vsub.f32 %v63_v1, %v81_v8  ;;  %v86_v11 = vsel %vm72_vm0, %v84_v9, 0.0 }
  0xa1   :  { %87 = vadd.xlane.f32.xlu1 %v86_v11 }
  0xa2   :  { %v85_v12 = vmul.f32 %v83_v10, %v83_v10 }
  0xa4   :  { %v89_v13 = vsel %vm72_vm0, %v85_v12, 0.0 }
  0xa5   :  { %90 = vadd.xlane.f32.xlu1 %v89_v13 }
 0x12a   :  { %v88_v17 = vpop.xlane.xlu1 %87 }
 0x12b   :  { %v92_v18 = vmul.f32 0.03125, %v88_v17 }
 0x12d   :  { %v94_v19 = vadd.f32 1e-05, %v92_v18 }
 0x12e   :  { %v91_v20 = vpop.xlane.xlu1 %90 }
 0x12f   :  { %2814 = vrsqrt.f32 %v94_v19  ;;  %v93_v21 = vmul.f32 0.03125, %v91_v20 }
 0x131   :  { %v95_v22 = vadd.f32 1e-05, %v93_v21 }
 0x133   :  { %2816 = vrsqrt.f32 %v95_v22 }
 0x13c   :  { %v2815_v23 = vpop.eup %2814 }
 0x13d   :  { %v98_v24 = vmul.f32 %v2815_v23, %v82_v6 }
 0x13f   :  { %v106_v28 = vmul.f32 %v2536_v25, %v98_v24 }
 0x140   :  { %v2817_v26 = vpop.eup %2816 }
 0x141   :  { %v99_v27 = vmul.f32 %v2817_v26, %v83_v10  ;;  %v114_v31 = vadd.f32 %v2537_v29, %v106_v28 }
 0x143   :  { %v107_v30 = vmul.f32 %v2536_v25, %v99_v27 }
 0x145   :  { %v115_v32 = vadd.f32 %v2537_v29, %v107_v30 }
 0x147   :  { %v2592_v33 = vpack.c.bf16 %v115_v32, %v114_v31 }
 0x149   :  { %2649 = vmatmul.mubr.msk.bf16.vlgmr.msra.gmra.mxu0 %vm72_vm0, %v2592_v33 }
 0x14a   :  { %2654 = vmatprep.mubr.msk.bf16.mxu0 %vm2908_vm1, %v2907_v15 }
 0x209   :  { %v182_v34 = vpop.f32.mrf.mxu0 }
 0x20a   :  { %v183_v38 = vadd.f32 %v2538_v35, %v182_v34 }
 0x20b   :  { %v2650_v36 = vpop.f32.mrf.mxu0 }
 0x20d   :  { %v185_v37 = vpop.f32.mrf.mxu0 }
 0x20e   :  { %v186_v39 = vadd.f32 %v2538_v35, %v185_v37 }
 0x20f   :  { %v2651_v40 = vpop.f32.mrf.mxu0 }
 0x210   :  { %v189_v41 = vpack.c.bf16 %v186_v39, %v183_v38 }
 0x212   :  { %193 = vrot.lane.b32.xlu1 %v189_v41, %s2909_s1  ;;  %191 = vrot.lane.b32.xlu0 %v189_v41, %s2910_s2  ;;  %v201_v56 = vshrl.u32 %v189_v41, 16 }
 0x216   :  { %195 = vrot.lane.b32.xlu1 %v189_v41, %s2911_s23 }
 0x21a   :  { %475 = vrot.lane.b32.xlu1 %v189_v41, %s2912_s24 }
 0x284   :  { %v3026_v42 = vpop.permute.xlu1 %193  ;;  %v192_v43 = vpop.permute.xlu0 %191 }
 0x285   :  { %479 = vrot.lane.b32.xlu1 %v3026_v42, %s2912_s24  ;;  %477 = vrot.lane.b32.xlu0 %v192_v43, %s2912_s24  ;;  %v202_v51 = vshrl.u32 %v192_v43, 16  ;;  %v209_v54 = vshrl.u32 %v3026_v42, 16  ;;  %v199_v58 = vpack.i.b16 %v192_v43, %v189_v41 }
 0x287   :  { %v203_v62 = vpack.i.b16 %v202_v51, %v201_v56  ;;  %v226_v2 = vrot.slane %v199_v58, %v3038_v57  ;;  %v219_v5 = vcombine.high %v199_v58, %v3042_v61 }
 0x288   :  { %v3029_v44 = vpop.permute.xlu1 %195 }
 0x289   :  { %757 = vrot.lane.b32.xlu1 %v192_v43, %s2913_s4  ;;  %481 = vrot.lane.b32.xlu0 %v3029_v44, %s2912_s24  ;;  %v210_v50 = vshrl.u32 %v3029_v44, 16  ;;  %v207_v55 = vpack.i.b16 %v3029_v44, %v3026_v42  ;;  %v292_v6 = vrot.slane %v203_v62, %v3038_v57  ;;  %v285_v13 = vcombine.high %v203_v62, %v3042_v61 }
 0x28a   :  { %v3058_v21 = vrot.slane %v219_v5, %v3038_v57 }
 0x28b   :  { %v211_v59 = vpack.i.b16 %v210_v50, %v209_v54  ;;  %v241_v0 = vrot.slane %v207_v55, %v3038_v57  ;;  %v234_v1 = vcombine.high %v207_v55, %v3042_v61  ;;  %v3068_v27 = vrot.slane %v285_v13, %v3038_v57 }
 0x28c   :  { %v476_v4 = vpop.permute.xlu1 %475 }
 0x28d   :  { %755 = vrot.lane.b32.xlu0 %v189_v41, %s2913_s4  ;;  %v307_v3 = vrot.slane %v211_v59, %v3038_v57  ;;  %v249_v9 = vcombine.low %v226_v2, %v241_v0  ;;  %v250_v10 = vcombine.high %v226_v2, %v241_v0  ;;  %v3054_v14 = vrot.slane %v234_v1, %v3038_v57 }
 0x28e   :  { %v300_v16 = vcombine.high %v211_v59, %v3042_v61  ;;  %v487_v19 = vshrl.u32 %v476_v4, 16 }
 0x28f   :  { %v315_v17 = vcombine.low %v292_v6, %v307_v3  ;;  %v316_v18 = vcombine.high %v292_v6, %v307_v3  ;;  %v3061_v22 = vrot.slane %v249_v9, %v3050_v7  ;;  %v3064_v23 = vrot.slane %v250_v10, %v3050_v7 }
 0x290   :  { %v265_v31 = vcombine.low %v3058_v21, %v3054_v14  ;;  %v314_v32 = vrot.slane %v300_v16, %v3038_v57 }
 0x291   :  { %v323_v33 = vrot.slane %v315_v17, %v3050_v7  ;;  %v330_v34 = vrot.slane %v316_v18, %v3050_v7  ;;  %v351_v39 = vcombine.low %v3061_v22, %v3064_v23  ;;  %v2543_v40 = vcombine.high %v3061_v22, %v3064_v23 }
 0x292   :  { %v331_v9 = vcombine.low %v3068_v27, %v314_v32  ;;  %v332_v10 = vcombine.high %v3068_v27, %v314_v32 }
 0x293   :  { %v376_v49 = vcombine.low %v323_v33, %v330_v34  ;;  %v2544_v50 = vcombine.high %v323_v33, %v330_v34 }
 0x2f7   :  { %v478_v8 = vpop.permute.xlu0 %477  ;;  %v480_v20 = vpop.permute.xlu1 %479 }
 0x2f8   :  { %v485_v11 = vpack.i.b16 %v478_v8, %v476_v4  ;;  %v488_v12 = vshrl.u32 %v478_v8, 16  ;;  %v495_v28 = vshrl.u32 %v480_v20, 16 }
 0x2fa   :  { %v489_v24 = vpack.i.b16 %v488_v12, %v487_v19  ;;  %v499_v25 = vcombine.high %v485_v11, %v3042_v61  ;;  %v506_v35 = vrot.slane %v485_v11, %v3038_v57  ;;  %v383_v19 = vrot.slane %v376_v49, %v3038_v57 }
 0x2fb   :  { %v482_v26 = vpop.permute.xlu0 %481 }
 0x2fc   :  { %v493_v29 = vpack.i.b16 %v482_v26, %v480_v20  ;;  %v496_v30 = vshrl.u32 %v482_v26, 16  ;;  %v513_v41 = vrot.slane %v499_v25, %v3038_v57  ;;  %v565_v43 = vcombine.high %v489_v24, %v3042_v61 }
 0x2fd   :  { %v572_v51 = vrot.slane %v489_v24, %v3038_v57  ;;  %v391_v20 = vrot.slane %v2544_v50, %v3038_v57 }
 0x2fe   :  { %v497_v36 = vpack.i.b16 %v496_v30, %v495_v28  ;;  %v514_v37 = vcombine.high %v493_v29, %v3042_v61  ;;  %v521_v38 = vrot.slane %v493_v29, %v3038_v57  ;;  %v579_v58 = vrot.slane %v565_v43, %v3038_v57 }
 0x2ff   :  { %v266_v28 = vcombine.high %v3058_v21, %v3054_v14  ;;  %v358_v29 = vrot.slane %v351_v39, %v3038_v57  ;;  %v366_v30 = vrot.slane %v2543_v40, %v3038_v57  ;;  %v273_v40 = vrot.slane %v265_v31, %v3050_v7 }
 0x300   :  { %v528_v45 = vrot.slane %v514_v37, %v3038_v57  ;;  %v529_v46 = vcombine.low %v506_v35, %v521_v38  ;;  %v530_v47 = vcombine.high %v506_v35, %v521_v38  ;;  %v580_v48 = vcombine.high %v497_v36, %v3042_v61 }
 0x301   :  { %v587_v52 = vrot.slane %v497_v36, %v3038_v57  ;;  %v339_v36 = vrot.slane %v331_v9, %v3050_v7  ;;  %v346_v37 = vrot.slane %v332_v10, %v3050_v7 }
 0x302   :  { %v537_v53 = vrot.slane %v529_v46, %v3050_v7  ;;  %v544_v54 = vrot.slane %v530_v47, %v3050_v7  ;;  %v545_v55 = vcombine.low %v513_v41, %v528_v45  ;;  %v546_v56 = vcombine.high %v513_v41, %v528_v45 }
 0x303   :  { %v594_v59 = vrot.slane %v580_v48, %v3038_v57  ;;  %v595_v62 = vcombine.low %v572_v51, %v587_v52  ;;  %v596_v63 = vcombine.high %v572_v51, %v587_v52  ;;  %v392_v41 = vcombine.low %v383_v19, %v391_v20 }
 0x304   :  { %v553_v0 = vrot.slane %v545_v55, %v3050_v7  ;;  %v560_v1 = vrot.slane %v546_v56, %v3050_v7  ;;  %v631_v2 = vcombine.low %v537_v53, %v544_v54  ;;  %v2547_v3 = vcombine.high %v537_v53, %v544_v54 }
 0x305   :  { %v603_v4 = vrot.slane %v595_v62, %v3050_v7  ;;  %v610_v5 = vrot.slane %v596_v63, %v3050_v7  ;;  %v611_v6 = vcombine.low %v579_v58, %v594_v59  ;;  %v612_v8 = vcombine.high %v579_v58, %v594_v59 }
 0x306   :  { %v638_v11 = vrot.slane %v631_v2, %v3038_v57  ;;  %v646_v12 = vrot.slane %v2547_v3, %v3038_v57  ;;  %v681_v22 = vcombine.low %v553_v0, %v560_v1  ;;  %v2549_v23 = vcombine.high %v553_v0, %v560_v1 }
 0x307   :  { %v619_v13 = vrot.slane %v611_v6, %v3050_v7  ;;  %v626_v16 = vrot.slane %v612_v8, %v3050_v7  ;;  %v656_v17 = vcombine.low %v603_v4, %v610_v5  ;;  %v2548_v18 = vcombine.high %v603_v4, %v610_v5 }
 0x308   :  { %v647_v32 = vcombine.low %v638_v11, %v646_v12  ;;  %v688_v43 = vrot.slane %v681_v22, %v3038_v57  ;;  %v696_v45 = vrot.slane %v2549_v23, %v3038_v57  ;;  %v280_v46 = vrot.slane %v266_v28, %v3050_v7 }
 0x309   :  { %v663_v24 = vrot.slane %v656_v17, %v3038_v57  ;;  %v671_v25 = vrot.slane %v2548_v18, %v3038_v57  ;;  %v706_v26 = vcombine.low %v619_v13, %v626_v16  ;;  %v2550_v27 = vcombine.high %v619_v13, %v626_v16 }
 0x30a   :  { %v654_v38 = vrot.slane %v647_v32, %v3050_v7  ;;  %v367_v47 = vcombine.low %v358_v29, %v366_v30  ;;  %v426_v52 = vcombine.low %v339_v36, %v346_v37  ;;  %v2546_v53 = vcombine.high %v339_v36, %v346_v37 }
 0x30b   :  { %v672_v33 = vcombine.low %v663_v24, %v671_v25  ;;  %v713_v34 = vrot.slane %v706_v26, %v3038_v57  ;;  %v721_v35 = vrot.slane %v2550_v27, %v3038_v57  ;;  %v399_v54 = vrot.slane %v392_v41, %v3050_v7 }
 0x30c   :  { %v655_v49 = vcombine.high %v654_v38, %v2916_v60  ;;  %v697_v14 = vcombine.low %v688_v43, %v696_v45  ;;  %v401_v21 = vcombine.low %v273_v40, %v280_v46  ;;  %v2545_v31 = vcombine.high %v273_v40, %v280_v46 }
 0x30d   :  { %v679_v39 = vrot.slane %v672_v33, %v3050_v7  ;;  %v722_v51 = vcombine.low %v713_v34, %v721_v35  ;;  %v374_v62 = vrot.slane %v367_v47, %v3050_v7  ;;  %v734_v63 = vshrl.u32 %v654_v38, 16 }
 0x30e   :  { %v433_v1 = vrot.slane %v426_v52, %v3038_v57  ;;  %v441_v2 = vrot.slane %v2546_v53, %v3038_v57  ;;  %v400_v4 = vcombine.high %v399_v54, %v2916_v60  ;;  %v704_v5 = vrot.slane %v697_v14, %v3050_v7 }
 0x30f   :  { %v733_v48 = vpack.i.b16 %v679_v39, %v654_v38  ;;  %v680_v50 = vcombine.high %v679_v39, %v2916_v60  ;;  %v735_v58 = vshrl.u32 %v679_v39, 16  ;;  %v729_v0 = vrot.slane %v722_v51, %v3050_v7 }
 0x310   :  { %v408_v6 = vrot.slane %v401_v21, %v3038_v57  ;;  %v416_v8 = vrot.slane %v2545_v31, %v3038_v57  ;;  %v453_v9 = vpack.i.b16 %v399_v54, %v374_v62  ;;  %v375_v10 = vcombine.high %v374_v62, %v2916_v60 }
 0x311   :  { %v1040_v55 = vsel %vm1035_vm2, %v733_v48, 0  ;;  %v739_v56 = vpack.i.b16 %v680_v50, %v655_v49  ;;  %v736_v3 = vpack.i.b16 %v735_v58, %v734_v63  ;;  %v745_v11 = vpack.i.b16 %v729_v0, %v704_v5 }
 0x312   :  { %2653 = vmatpush3.bf16.xpose.msra.mxu0 %v1040_v55  ;;  %v741_v12 = vshrl.u32 %v680_v50, 16  ;;  %v459_v16 = vpack.i.b16 %v400_v4, %v375_v10  ;;  %v442_v17 = vcombine.low %v433_v1, %v441_v2  ;;  %v417_v18 = vcombine.low %v408_v6, %v416_v8 }
 0x313   :  { %v1132_v59 = vsel %vm1035_vm2, %v739_v56, 0  ;;  %2658 = vmatprep.subr.bf16.mxu0 %v2907_v15  ;;  %v1086_v13 = vsel %vm1035_vm2, %v736_v3, 0  ;;  %v740_v19 = vshrl.u32 %v655_v49, 16  ;;  %v1224_v20 = vsel %vm1035_vm2, %v745_v11, 0 }
 0x314   :  { %2665 = vmatpush3.bf16.xpose.msra.mxu1 %v1132_v59  ;;  %v455_v22 = vshrl.u32 %v399_v54, 16  ;;  %v730_v23 = vcombine.high %v729_v0, %v2916_v60  ;;  %v454_v24 = vshrl.u32 %v374_v62, 16  ;;  %v449_v26 = vrot.slane %v442_v17, %v3050_v7 }
 0x315   :  { %2676 = vmatprep.subr.bf16.mxu1 %v2907_v15  ;;  %v742_v25 = vpack.i.b16 %v741_v12, %v740_v19  ;;  %v705_v27 = vcombine.high %v704_v5, %v2916_v60  ;;  %v424_v29 = vrot.slane %v417_v18, %v3050_v7  ;;  %v747_v34 = vshrl.u32 %v729_v0, 16 }
 0x316   :  { %v456_v28 = vpack.i.b16 %v455_v22, %v454_v24  ;;  %v461_v35 = vshrl.u32 %v400_v4, 16  ;;  %v746_v37 = vshrl.u32 %v704_v5, 16  ;;  %v460_v38 = vshrl.u32 %v375_v10, 16 }
 0x317   :  { %v751_v30 = vpack.i.b16 %v730_v23, %v705_v27  ;;  %v1178_v32 = vsel %vm1035_vm2, %v742_v25, 0  ;;  %v465_v33 = vpack.i.b16 %v449_v26, %v424_v29  ;;  %v450_v43 = vcombine.high %v449_v26, %v2916_v60 }
 0x318   :  { %v748_v41 = vpack.i.b16 %v747_v34, %v746_v37  ;;  %v462_v45 = vpack.i.b16 %v461_v35, %v460_v38  ;;  %v425_v39 = vcombine.high %v424_v29, %v2916_v60  ;;  %v753_v47 = vshrl.u32 %v730_v23, 16 }
 0x319   :  { %2655 = vmatmul.mubr.msk.bf16.vlgmr.msra.gmra.mxu0 %vm1035_vm2, %v453_v9  ;;  %v1316_v36 = vsel %vm1035_vm2, %v751_v30, 0  ;;  %v467_v48 = vshrl.u32 %v449_v26, 16  ;;  %v752_v49 = vshrl.u32 %v705_v27, 16  ;;  %v466_v50 = vshrl.u32 %v424_v29, 16 }
 0x31a   :  { %2659 = vmatpush3.bf16.xpose.msra.mxu0 %v1086_v13  ;;  %2660 = vmatprep.mubr.msk.bf16.mxu0 %vm2908_vm1, %v2907_v15  ;;  %v1270_v40 = vsel %vm1035_vm2, %v748_v41, 0  ;;  %v471_v46 = vpack.i.b16 %v450_v43, %v425_v39  ;;  %v473_v54 = vshrl.u32 %v450_v43, 16  ;;  %v472_v55 = vshrl.u32 %v425_v39, 16  ;;  %v756_v43 = vpop.permute.xlu0 %755 }
 0x31b   :  { %2667 = vmatmul.mubr.msk.bf16.vlgmr.msra.gmra.mxu1 %vm1035_vm2, %v459_v16  ;;  %2670 = vmatprep.subr.bf16.mxu0 %v2907_v15  ;;  %v754_v51 = vpack.i.b16 %v753_v47, %v752_v49  ;;  %v468_v52 = vpack.i.b16 %v467_v48, %v466_v50 }
 0x31c   :  { %2677 = vmatpush3.bf16.xpose.msra.mxu1 %v1224_v20  ;;  %2678 = vmatprep.mubr.msk.bf16.mxu1 %vm2908_vm1, %v2907_v15  ;;  %v474_v56 = vpack.i.b16 %v473_v54, %v472_v55 }
 0x31d   :  { %2688 = vmatprep.subr.bf16.mxu1 %v2907_v15  ;;  %v1362_v53 = vsel %vm1035_vm2, %v754_v51, 0 }
 0x321   :  { %2661 = vmatmul.mubr.msk.bf16.vlgmr.msra.gmra.mxu0 %vm1035_vm2, %v456_v28 }
 0x322   :  { %2671 = vmatpush3.bf16.xpose.msra.mxu0 %v1178_v32  ;;  %2672 = vmatprep.mubr.msk.bf16.mxu0 %vm2908_vm1, %v2907_v15 }
 0x323   :  { %2679 = vmatmul.mubr.msk.bf16.vlgmr.msra.gmra.mxu1 %vm1035_vm2, %v465_v33  ;;  %2682 = vmatprep.subr.bf16.mxu0 %v2907_v15 }
 0x324   :  { %2689 = vmatpush3.bf16.xpose.msra.mxu1 %v1316_v36  ;;  %2690 = vmatprep.mubr.msk.bf16.mxu1 %vm2908_vm1, %v2907_v15  ;;  %v758_v36 = vpop.permute.xlu1 %757 }
 0x325   :  { %2700 = vmatprep.subr.bf16.mxu1 %v2907_v15  ;;  %v3211_v48 = vpack.i.b16 %v758_v36, %v756_v43  ;;  %v768_v50 = vshrl.u32 %v758_v36, 16 }
 0x329   :  { %2673 = vmatmul.mubr.msk.bf16.vlgmr.msra.gmra.mxu0 %vm1035_vm2, %v462_v45 }
 0x32a   :  { %2683 = vmatpush3.bf16.xpose.msra.mxu0 %v1270_v40  ;;  %2684 = vmatprep.mubr.msk.bf16.mxu0 %vm2908_vm1, %v2907_v15 }
 0x32b   :  { %2691 = vmatmul.mubr.msk.bf16.vlgmr.msra.gmra.mxu1 %vm1035_vm2, %v471_v46  ;;  %2694 = vmatprep.subr.bf16.mxu0 %v2907_v15  ;;  %v767_v46 = vshrl.u32 %v756_v43, 16 }
 0x32c   :  { %2702 = vmatprep.mubr.msk.bf16.mxu1 %vm2908_vm1, %v2907_v15 }
 0x331   :  { %2685 = vmatmul.mubr.msk.bf16.vlgmr.msra.gmra.mxu0 %vm1035_vm2, %v468_v52 }
 0x332   :  { %2695 = vmatpush3.bf16.xpose.msra.mxu0 %v1362_v53  ;;  %2696 = vmatprep.mubr.msk.bf16.mxu0 %vm2908_vm1, %v2907_v15 }
 0x333   :  { %2706 = vmatprep.subr.bf16.mxu0 %v2907_v15 }
 0x339   :  { %2697 = vmatmul.mubr.msk.bf16.vlgmr.msra.gmra.mxu0 %vm1035_vm2, %v474_v56  ;;  %v3215_v56 = vpack.i.b16 %v768_v50, %v767_v46 }
 0x33a   :  { %2708 = vmatprep.mubr.msk.bf16.mxu0 %vm2908_vm1, %v2907_v15 }
 0x3d9   :  { %v1076_v58 = vpop.f32.mrf.mxu0 }
 0x3da   :  { %v1404_v14 = vsel %vm1035_vm2, %v1076_v58, -inf }
 0x3db   :  { %v3182_v21 = vpop.f32.mrf.mxu1  ;;  %1405 = vmax.xlane.f32.xlu1 %v1404_v14  ;;  %v2656_v31 = vpop.f32.mrf.mxu0 }
 0x3dd   :  { %v1079_v59 = vpop.f32.mrf.mxu0  ;;  %v2668_v62 = vpop.f32.mrf.mxu1 }
 0x3df   :  { %v2657_v63 = vpop.f32.mrf.mxu0  ;;  %v1171_v0 = vpop.f32.mrf.mxu1 }
 0x3e0   :  { %v852_v63 = vrot.slane %v3215_v56, %v3038_v57 }
 0x3e1   :  { %v1122_v1 = vpop.f32.mrf.mxu0  ;;  %v2669_v2 = vpop.f32.mrf.mxu1 }
 0x3e2   :  { %v1407_v3 = vsel %vm1035_vm2, %v1122_v1, -inf }
 0x3e3   :  { %v3185_v4 = vpop.f32.mrf.mxu1  ;;  %1408 = vmax.xlane.f32.xlu0 %v1407_v3  ;;  %v2662_v5 = vpop.f32.mrf.mxu0 }
 0x3e5   :  { %v1125_v6 = vpop.f32.mrf.mxu0  ;;  %v2680_v8 = vpop.f32.mrf.mxu1 }
 0x3e7   :  { %v2663_v9 = vpop.f32.mrf.mxu0  ;;  %v1263_v10 = vpop.f32.mrf.mxu1 }
 0x3e9   :  { %v3187_v11 = vpop.f32.mrf.mxu0  ;;  %v2681_v12 = vpop.f32.mrf.mxu1 }
 0x3ea   :  { %v1413_v33 = vsel %vm1035_vm2, %v3187_v11, -inf }
 0x3eb   :  { %v2674_v13 = vpop.f32.mrf.mxu0  ;;  %v3189_v16 = vpop.f32.mrf.mxu1 }
 0x3ec   :  { %759 = vrot.lane.b32.xlu1 %v3026_v42, %s2913_s4  ;;  %v1410_v42 = vsel %vm1035_vm2, %v3182_v21, -inf  ;;  %v1422_v32 = vsel %vm1035_vm2, %v3189_v16, -inf }
 0x3ed   :  { %v1217_v17 = vpop.f32.mrf.mxu0  ;;  %v2692_v18 = vpop.f32.mrf.mxu1 }
 0x3ef   :  { %v2675_v19 = vpop.f32.mrf.mxu0  ;;  %v1355_v20 = vpop.f32.mrf.mxu1 }
 0x3f1   :  { %v3193_v22 = vpop.f32.mrf.mxu0  ;;  %v2693_v23 = vpop.f32.mrf.mxu1 }
 0x3f2   :  { %v1419_v34 = vsel %vm1035_vm2, %v3193_v22, -inf }
 0x3f3   :  { %v2686_v24 = vpop.f32.mrf.mxu0 }
 0x3f5   :  { %v1309_v25 = vpop.f32.mrf.mxu0 }
 0x3f7   :  { %v2687_v26 = vpop.f32.mrf.mxu0 }
 0x3f9   :  { %761 = vrot.lane.b32.xlu0 %v3029_v44, %s2913_s4  ;;  %v3197_v27 = vpop.f32.mrf.mxu0  ;;  %v1416_v44 = vsel %vm1035_vm2, %v3185_v4, -inf }
 0x3fa   :  { %v1425_v35 = vsel %vm1035_vm2, %v3197_v27, -inf }
 0x3fb   :  { %v2698_v28 = vpop.f32.mrf.mxu0 }
 0x3fd   :  { %v1401_v29 = vpop.f32.mrf.mxu0 }
 0x3ff   :  { %v2699_v30 = vpop.f32.mrf.mxu0 }
 0x410   :  { %1411 = vmax.xlane.f32.xlu1 %v1410_v42 }
 0x414   :  { %1423 = vmax.xlane.f32.xlu1 %v1422_v32 }
 0x418   :  { %1414 = vmax.xlane.f32.xlu0 %v1413_v33 }
 0x41c   :  { %1417 = vmax.xlane.f32.xlu0 %v1416_v44 }
 0x420   :  { %1420 = vmax.xlane.f32.xlu0 %v1419_v34 }
 0x424   :  { %1426 = vmax.xlane.f32.xlu0 %v1425_v35 }
 0x464   :  { %v1406_v37 = vpop.xlane.xlu1 %1405 }
 0x465   :  { %v1428_v38 = vsub.f32 %v1076_v58, %v1406_v37  ;;  %v786_v58 = vrot.slane %v3211_v48, %v3038_v57 }
 0x467   :  { %v1436_v41 = vpack.c.bf16 %v1428_v38, %v1428_v38 }
 0x468   :  { %v760_v47 = vpop.permute.xlu1 %759 }
 0x469   :  { %v1445_v45 = vmul.bf16 1069105081, %v1436_v41  ;;  %v775_v52 = vshrl.u32 %v760_v47, 16 }
 0x46b   :  { %2818 = vpow.bf16 %v1445_v45 }
 0x46c   :  { %v1409_v39 = vpop.xlane.xlu0 %1408 }
 0x46d   :  { %v1429_v40 = vsub.f32 %v1122_v1, %v1409_v39 }
 0x46f   :  { %v1437_v49 = vpack.c.bf16 %v1429_v40, %v1429_v40 }
 0x470   :  { %v762_v51 = vpop.permute.xlu0 %761 }
 0x471   :  { %v1448_v53 = vmul.bf16 1069105081, %v1437_v49  ;;  %v3213_v54 = vpack.i.b16 %v762_v51, %v760_v47  ;;  %v776_v55 = vshrl.u32 %v762_v51, 16  ;;  %v845_v51 = vcombine.high %v3215_v56, %v3042_v61 }
 0x473   :  { %2820 = vpow.bf16 %v1448_v53  ;;  %v3219_v14 = vpack.i.b16 %v776_v55, %v775_v52  ;;  %v801_v31 = vrot.slane %v3213_v54, %v3038_v57  ;;  %v794_v52 = vcombine.high %v3213_v54, %v3042_v61 }
 0x474   :  { %v779_v53 = vcombine.high %v3211_v48, %v3042_v61 }
 0x475   :  { %v809_v59 = vcombine.low %v786_v58, %v801_v31  ;;  %v810_v62 = vcombine.high %v786_v58, %v801_v31  ;;  %v867_v0 = vrot.slane %v3219_v14, %v3038_v57  ;;  %v860_v49 = vcombine.high %v3219_v14, %v3042_v61 }
 0x476   :  { %v859_v58 = vrot.slane %v845_v51, %v3038_v57  ;;  %v808_v14 = vrot.slane %v794_v52, %v3038_v57  ;;  %v793_v56 = vrot.slane %v779_v53, %v3038_v57 }
 0x477   :  { %v817_v1 = vrot.slane %v809_v59, %v3050_v7  ;;  %v824_v2 = vrot.slane %v810_v62, %v3050_v7  ;;  %v875_v3 = vcombine.low %v852_v63, %v867_v0  ;;  %v876_v5 = vcombine.high %v852_v63, %v867_v0 }
 0x478   :  { %v874_v55 = vrot.slane %v860_v49, %v3038_v57  ;;  %v825_v54 = vcombine.low %v793_v56, %v808_v14  ;;  %v826_v62 = vcombine.high %v793_v56, %v808_v14 }
 0x479   :  { %v911_v6 = vcombine.low %v817_v1, %v824_v2  ;;  %v2551_v8 = vcombine.high %v817_v1, %v824_v2  ;;  %v2819_v9 = vpop.eup %2818  ;;  %v883_v10 = vrot.slane %v875_v3, %v3050_v7  ;;  %v890_v12 = vrot.slane %v876_v5, %v3050_v7 }
 0x47a   :  { %v1468_v20 = vunpack.c.l.bf16 %v2819_v9  ;;  %v891_v31 = vcombine.low %v859_v58, %v874_v55  ;;  %v892_v59 = vcombine.high %v859_v58, %v874_v55  ;;  %v833_v1 = vrot.slane %v825_v54, %v3050_v7 }
 0x47b   :  { %v918_v13 = vrot.slane %v911_v6, %v3038_v57  ;;  %v926_v17 = vrot.slane %v2551_v8, %v3038_v57  ;;  %v936_v18 = vcombine.low %v883_v10, %v890_v12  ;;  %v2552_v19 = vcombine.high %v883_v10, %v890_v12 }
 0x47c   :  { %v1476_v26 = vsel %vm1035_vm2, %v1468_v20, 0.0  ;;  %v899_v63 = vrot.slane %v891_v31, %v3050_v7  ;;  %v906_v0 = vrot.slane %v892_v59, %v3050_v7  ;;  %v840_v61 = vrot.slane %v826_v62, %v3050_v7 }
 0x47d   :  { %v927_v23 = vcombine.low %v918_v13, %v926_v17  ;;  %v943_v24 = vrot.slane %v936_v18, %v3038_v57  ;;  %v951_v25 = vrot.slane %v2552_v19, %v3038_v57  ;;  %1477 = vadd.xlane.f32.xlu1 %v1476_v26 }
 0x47e   :  { %v986_v3 = vcombine.low %v899_v63, %v906_v0  ;;  %v2554_v5 = vcombine.high %v899_v63, %v906_v0  ;;  %v961_v8 = vcombine.low %v833_v1, %v840_v61 }
 0x47f   :  { %v934_v28 = vrot.slane %v927_v23, %v3050_v7  ;;  %v952_v29 = vcombine.low %v943_v24, %v951_v25 }
 0x480   :  { %v993_v17 = vrot.slane %v986_v3, %v3038_v57  ;;  %v1001_v18 = vrot.slane %v2554_v5, %v3038_v57  ;;  %v968_v19 = vrot.slane %v961_v8, %v3038_v57 }
 0x481   :  { %v2821_v30 = vpop.eup %2820  ;;  %v935_v42 = vcombine.high %v934_v28, %v2916_v60  ;;  %v959_v33 = vrot.slane %v952_v29, %v3050_v7  ;;  %v1014_v44 = vshrl.u32 %v934_v28, 16 }
 0x482   :  { %v1469_v32 = vunpack.c.l.bf16 %v2821_v30  ;;  %v1002_v25 = vcombine.low %v993_v17, %v1001_v18 }
 0x483   :  { %v1013_v35 = vpack.i.b16 %v959_v33, %v934_v28  ;;  %v1015_v36 = vshrl.u32 %v959_v33, 16  ;;  %v960_v37 = vcombine.high %v959_v33, %v2916_v60  ;;  %v1020_v38 = vshrl.u32 %v935_v42, 16 }
 0x484   :  { %v1479_v34 = vsel %vm1035_vm2, %v1469_v32, 0.0  ;;  %v1009_v32 = vrot.slane %v1002_v25, %v3050_v7 }
 0x485   :  { %1480 = vadd.xlane.f32.xlu0 %v1479_v34  ;;  %v1505_v41 = vsel %vm1503_vm3, %v1013_v35, 0  ;;  %v1016_v43 = vpack.i.b16 %v1015_v36, %v1014_v44  ;;  %v1019_v45 = vpack.i.b16 %v960_v37, %v935_v42  ;;  %v1021_v39 = vshrl.u32 %v960_v37, 16 }
 0x486   :  { %2701 = vmatpush3.bf16.msra.mxu1 %v1505_v41 }
 0x487   :  { %v1551_v40 = vsel %vm1503_vm3, %v1016_v43, 0  ;;  %2712 = vmatprep.subr.bf16.mxu1 %v2907_v15  ;;  %v1022_v46 = vpack.i.b16 %v1021_v39, %v1020_v38  ;;  %v1597_v47 = vsel %vm1503_vm3, %v1019_v45, 0 }
 0x488   :  { %2707 = vmatpush3.bf16.msra.mxu0 %v1551_v40  ;;  %v1027_v40 = vshrl.u32 %v1009_v32, 16 }
 0x489   :  { %2703 = vmatmul.mubr.msk.bf16.vlgmr.msra.gmra.mxu1 %vm1035_vm2, %v2819_v9  ;;  %2718 = vmatprep.subr.bf16.mxu0 %v2907_v15  ;;  %v1643_v50 = vsel %vm1503_vm3, %v1022_v46, 0  ;;  %v2553_v9 = vcombine.high %v833_v1, %v840_v61 }
 0x48a   :  { %2713 = vmatpush3.bf16.msra.mxu1 %v1597_v47  ;;  %2714 = vmatprep.mubr.msk.bf16.mxu1 %vm2908_vm1, %v2907_v15 }
 0x48b   :  { %2709 = vmatmul.mubr.msk.bf16.vlgmr.msra.gmra.mxu0 %vm1035_vm2, %v2821_v30  ;;  %2724 = vmatprep.subr.bf16.mxu1 %v2907_v15  ;;  %v976_v20 = vrot.slane %v2553_v9, %v3038_v57 }
 0x48c   :  { %2719 = vmatpush3.bf16.msra.mxu0 %v1643_v50  ;;  %2720 = vmatprep.mubr.msk.bf16.mxu0 %vm2908_vm1, %v2907_v15  ;;  %v1010_v50 = vcombine.high %v1009_v32, %v2916_v60 }
 0x48d   :  { %2730 = vmatprep.subr.bf16.mxu0 %v2907_v15  ;;  %v977_v29 = vcombine.low %v968_v19, %v976_v20 }
 0x48e   :  { %v1033_v14 = vshrl.u32 %v1010_v50, 16 }
 0x48f   :  { %v984_v34 = vrot.slane %v977_v29, %v3050_v7 }
 0x491   :  { %v1026_v47 = vshrl.u32 %v984_v34, 16  ;;  %v985_v51 = vcombine.high %v984_v34, %v2916_v60 }
 0x493   :  { %v1031_v58 = vpack.i.b16 %v1010_v50, %v985_v51  ;;  %v1032_v59 = vshrl.u32 %v985_v51, 16 }
 0x495   :  { %v1781_v62 = vsel %vm1503_vm3, %v1031_v58, 0  ;;  %v1034_v0 = vpack.i.b16 %v1033_v14, %v1032_v59 }
 0x499   :  { %v1412_v48 = vpop.xlane.xlu1 %1411 }
 0x49a   :  { %v1430_v2 = vsub.f32 %v3182_v21, %v1412_v48 }
 0x49c   :  { %v1438_v6 = vpack.c.bf16 %v1430_v2, %v1430_v2  ;;  %v1827_v2 = vsel %vm1503_vm3, %v1034_v0, 0 }
 0x49d   :  { %v1424_v10 = vpop.xlane.xlu1 %1423 }
 0x49e   :  { %v1451_v12 = vmul.bf16 1069105081, %v1438_v6  ;;  %v1434_v13 = vsub.f32 %v3189_v16, %v1424_v10 }
 0x4a0   :  { %2822 = vpow.bf16 %v1451_v12  ;;  %v1442_v24 = vpack.c.bf16 %v1434_v13, %v1434_v13 }
 0x4a1   :  { %v1415_v23 = vpop.xlane.xlu0 %1414 }
 0x4a2   :  { %v1431_v21 = vsub.f32 %v3187_v11, %v1415_v23  ;;  %v1463_v42 = vmul.bf16 1069105081, %v1442_v24  ;;  %v1025_v11 = vpack.i.b16 %v1009_v32, %v984_v34 }
 0x4a4   :  { %v1439_v26 = vpack.c.bf16 %v1431_v21, %v1431_v21  ;;  %v1689_v45 = vsel %vm1503_vm3, %v1025_v11, 0 }
 0x4a5   :  { %v1418_v28 = vpop.xlane.xlu0 %1417 }
 0x4a6   :  { %v1454_v30 = vmul.bf16 1069105081, %v1439_v26  ;;  %v1432_v16 = vsub.f32 %v3185_v4, %v1418_v28 }
 0x4a8   :  { %2824 = vpow.bf16 %v1454_v30  ;;  %v1440_v33 = vpack.c.bf16 %v1432_v16, %v1432_v16 }
 0x4a9   :  { %v1421_v44 = vpop.xlane.xlu0 %1420  ;;  %2826 = vpow.bf16 %v1463_v42 }
 0x4aa   :  { %v1457_v35 = vmul.bf16 1069105081, %v1440_v33  ;;  %v1433_v36 = vsub.f32 %v3193_v22, %v1421_v44 }
 0x4ac   :  { %2828 = vpow.bf16 %v1457_v35  ;;  %v1441_v37 = vpack.c.bf16 %v1433_v36, %v1433_v36 }
 0x4ad   :  { %v1427_v38 = vpop.xlane.xlu0 %1426 }
 0x4ae   :  { %v2823_v41 = vpop.eup %2822  ;;  %v1460_v43 = vmul.bf16 1069105081, %v1441_v37  ;;  %v1435_v4 = vsub.f32 %v3197_v27, %v1427_v38  ;;  %v1028_v27 = vpack.i.b16 %v1027_v40, %v1026_v47 }
 0x4af   :  { %2715 = vmatmul.mubr.msk.bf16.vlgmr.msra.gmra.mxu1 %vm1035_vm2, %v2823_v41  ;;  %v1470_v39 = vunpack.c.l.bf16 %v2823_v41 }
 0x4b0   :  { %2830 = vpow.bf16 %v1460_v43  ;;  %v1443_v46 = vpack.c.bf16 %v1435_v4, %v1435_v4  ;;  %2725 = vmatpush3.bf16.msra.mxu1 %v1689_v45  ;;  %2726 = vmatprep.mubr.msk.bf16.mxu1 %vm2908_vm1, %v2907_v15  ;;  %v1735_v53 = vsel %vm1503_vm3, %v1028_v27, 0 }
 0x4b1   :  { %v1482_v22 = vsel %vm1035_vm2, %v1470_v39, 0.0  ;;  %2736 = vmatprep.subr.bf16.mxu1 %v2907_v15 }
 0x4b2   :  { %v1466_v49 = vmul.bf16 1069105081, %v1443_v46  ;;  %1483 = vadd.xlane.f32.xlu1 %v1482_v22 }
 0x4b4   :  { %2832 = vpow.bf16 %v1466_v49 }
 0x4b6   :  { %v2825_v52 = vpop.eup %2824 }
 0x4b7   :  { %2721 = vmatmul.mubr.msk.bf16.vlgmr.msra.gmra.mxu0 %vm1035_vm2, %v2825_v52  ;;  %v1471_v55 = vunpack.c.l.bf16 %v2825_v52  ;;  %v2827_v56 = vpop.eup %2826 }
 0x4b8   :  { %2731 = vmatpush3.bf16.msra.mxu0 %v1735_v53  ;;  %2732 = vmatprep.mubr.msk.bf16.mxu0 %vm2908_vm1, %v2907_v15  ;;  %v1474_v61 = vunpack.c.l.bf16 %v2827_v56 }
 0x4b9   :  { %v1485_v31 = vsel %vm1035_vm2, %v1471_v55, 0.0  ;;  %2742 = vmatprep.subr.bf16.mxu0 %v2907_v15 }
 0x4ba   :  { %v2829_v54 = vpop.eup %2828  ;;  %1486 = vadd.xlane.f32.xlu0 %v1485_v31  ;;  %v1494_v5 = vsel %vm1035_vm2, %v1474_v61, 0.0 }
 0x4bb   :  { %2727 = vmatmul.mubr.msk.bf16.vlgmr.msra.gmra.mxu1 %vm1035_vm2, %v2829_v54  ;;  %v1472_v63 = vunpack.c.l.bf16 %v2829_v54 }
 0x4bc   :  { %2737 = vmatpush3.bf16.msra.mxu1 %v1781_v62  ;;  %2738 = vmatprep.mubr.msk.bf16.mxu1 %vm2908_vm1, %v2907_v15 }
 0x4bd   :  { %v1488_v1 = vsel %vm1035_vm2, %v1472_v63, 0.0  ;;  %2748 = vmatprep.subr.bf16.mxu1 %v2907_v15 }
 0x4be   :  { %v2831_v48 = vpop.eup %2830  ;;  %1489 = vadd.xlane.f32.xlu1 %v1488_v1 }
 0x4bf   :  { %2733 = vmatmul.mubr.msk.bf16.vlgmr.msra.gmra.mxu0 %vm1035_vm2, %v2831_v48  ;;  %v1473_v3 = vunpack.c.l.bf16 %v2831_v48 }
 0x4c0   :  { %2743 = vmatpush3.bf16.msra.mxu0 %v1827_v2  ;;  %2744 = vmatprep.mubr.msk.bf16.mxu0 %vm2908_vm1, %v2907_v15 }
 0x4c1   :  { %v1491_v6 = vsel %vm1035_vm2, %v1473_v3, 0.0  ;;  %2756 = vmatprep.subr.bf16.mxu0 %v2907_v15 }
 0x4c2   :  { %v2833_v8 = vpop.eup %2832  ;;  %1495 = vadd.xlane.f32.xlu1 %v1494_v5  ;;  %1492 = vadd.xlane.f32.xlu0 %v1491_v6 }
 0x4c3   :  { %2739 = vmatmul.mubr.msk.bf16.vlgmr.msra.gmra.mxu1 %vm1035_vm2, %v2827_v56  ;;  %v1475_v9 = vunpack.c.l.bf16 %v2833_v8 }
 0x4c4   :  { %2752 = vmatprep.mubr.msk.bf16.mxu1 %vm2908_vm1, %v2907_v15 }
 0x4c5   :  { %v1497_v10 = vsel %vm1035_vm2, %v1475_v9, 0.0 }
 0x4c6   :  { %1498 = vadd.xlane.f32.xlu0 %v1497_v10 }
 0x4c7   :  { %2745 = vmatmul.mubr.msk.bf16.vlgmr.msra.gmra.mxu0 %vm1035_vm2, %v2833_v8 }
 0x4c8   :  { %2760 = vmatprep.mubr.msk.bf16.mxu0 %vm2908_vm1, %v2907_v15 }
 0x506   :  { %v1478_v24 = vpop.xlane.xlu1 %1477 }
 0x50e   :  { %v1481_v26 = vpop.xlane.xlu0 %1480 }
 0x53b   :  { %v1484_v25 = vpop.xlane.xlu1 %1483 }
 0x53c   :  { %2834 = vrcp.f32 %v1484_v25 }
 0x53d   :  { %2836 = vrcp.f32 %v1478_v24 }
 0x53e   :  { %2838 = vrcp.f32 %v1481_v26 }
 0x543   :  { %v1487_v28 = vpop.xlane.xlu0 %1486 }
 0x544   :  { %2840 = vrcp.f32 %v1487_v28 }
 0x547   :  { %v1490_v29 = vpop.xlane.xlu1 %1489 }
 0x548   :  { %2842 = vrcp.f32 %v1490_v29 }
 0x549   :  { %v1541_v12 = vpop.f32.mrf.mxu1  ;;  %v2835_v16 = vpop.eup %2834 }
 0x54a   :  { %v2837_v34 = vpop.eup %2836 }
 0x54b   :  { %v2704_v13 = vpop.f32.mrf.mxu1  ;;  %v1587_v17 = vpop.f32.mrf.mxu0  ;;  %v1877_v11 = vmul.f32 %v2837_v34, %v1541_v12 }
 0x54c   :  { %v1493_v42 = vpop.xlane.xlu0 %1492  ;;  %v1496_v33 = vpop.xlane.xlu1 %1495 }
 0x54d   :  { %v1544_v18 = vpop.f32.mrf.mxu1  ;;  %v2710_v19 = vpop.f32.mrf.mxu0  ;;  %2844 = vrcp.f32 %v1496_v33  ;;  %v1885_v39 = vpack.c.bf16 %v1877_v11, %v1877_v11 }
 0x54e   :  { %v2839_v36 = vpop.eup %2838  ;;  %2846 = vrcp.f32 %v1493_v42 }
 0x54f   :  { %v2705_v20 = vpop.f32.mrf.mxu1  ;;  %v1590_v23 = vpop.f32.mrf.mxu0  ;;  %v1878_v37 = vmul.f32 %v2839_v36, %v1587_v17  ;;  %v1892_v51 = vrot.slane %v1885_v39, %v3038_v57 }
 0x550   :  { %v1499_v4 = vpop.xlane.xlu0 %1498 }
 0x551   :  { %v2711_v21 = vpop.f32.mrf.mxu0  ;;  %v2841_v43 = vpop.eup %2840  ;;  %v1919_v46 = vpack.c.bf16 %v1878_v37, %v1878_v37  ;;  %2848 = vrcp.f32 %v1499_v4 }
 0x553   :  { %v1926_v52 = vrot.slane %v1919_v46, %v3038_v57 }
 0x555   :  { %v2843_v14 = vpop.eup %2842 }
 0x55a   :  { %v2845_v3 = vpop.eup %2844 }
 0x55b   :  { %v2847_v5 = vpop.eup %2846 }
 0x55e   :  { %v2849_v24 = vpop.eup %2848 }
 0x56f   :  { %v1633_v30 = vpop.f32.mrf.mxu1 }
 0x570   :  { %v1879_v44 = vmul.f32 %v2835_v16, %v1633_v30 }
 0x571   :  { %v2716_v32 = vpop.f32.mrf.mxu1 }
 0x572   :  { %v1893_v41 = vpack.c.bf16 %v1879_v44, %v1879_v44 }
 0x573   :  { %v1636_v35 = vpop.f32.mrf.mxu1 }
 0x574   :  { %v1900_v47 = vrot.slane %v1893_v41, %v3038_v57 }
 0x575   :  { %v2717_v38 = vpop.f32.mrf.mxu1 }
 0x576   :  { %v1901_v56 = vcombine.low %v1892_v51, %v1900_v47  ;;  %v1902_v31 = vcombine.high %v1892_v51, %v1900_v47 }
 0x577   :  { %v1679_v45 = vpop.f32.mrf.mxu0 }
 0x578   :  { %v1880_v40 = vmul.f32 %v2841_v43, %v1679_v45  ;;  %v1909_v6 = vrot.slane %v1901_v56, %v3050_v7  ;;  %v1916_v8 = vrot.slane %v1902_v31, %v3050_v7 }
 0x579   :  { %v2722_v22 = vpop.f32.mrf.mxu0 }
 0x57a   :  { %v1927_v49 = vpack.c.bf16 %v1880_v40, %v1880_v40  ;;  %v1917_v25 = vcombine.high %v1909_v6, %v2916_v60  ;;  %v1918_v26 = vcombine.high %v1916_v8, %v2916_v60  ;;  %v2025_v45 = vshrl.u32 %v1909_v6, 16 }
 0x57b   :  { %v1682_v27 = vpop.f32.mrf.mxu0  ;;  %v1725_v50 = vpop.f32.mrf.mxu1  ;;  %v2041_v40 = vshrl.u32 %v1916_v8, 16 }
 0x57c   :  { %v1934_v53 = vrot.slane %v1927_v49, %v3038_v57  ;;  %v1881_v62 = vmul.f32 %v2843_v14, %v1725_v50  ;;  %v2033_v39 = vshrl.u32 %v1917_v25, 16  ;;  %v2049_v22 = vshrl.u32 %v1918_v26, 16 }
 0x57d   :  { %v2723_v55 = vpop.f32.mrf.mxu0  ;;  %v2728_v58 = vpop.f32.mrf.mxu1 }
 0x57e   :  { %v1935_v59 = vcombine.low %v1926_v52, %v1934_v53  ;;  %v1936_v54 = vcombine.high %v1926_v52, %v1934_v53  ;;  %v1953_v9 = vpack.c.bf16 %v1881_v62, %v1881_v62 }
 0x57f   :  { %v1728_v63 = vpop.f32.mrf.mxu1  ;;  %v1771_v0 = vpop.f32.mrf.mxu0 }
 0x580   :  { %v1943_v1 = vrot.slane %v1935_v59, %v3050_v7  ;;  %v1950_v61 = vrot.slane %v1936_v54, %v3050_v7  ;;  %v1882_v13 = vmul.f32 %v2847_v5, %v1771_v0  ;;  %v1960_v28 = vrot.slane %v1953_v9, %v3038_v57 }
 0x581   :  { %v2729_v48 = vpop.f32.mrf.mxu1  ;;  %v2734_v2 = vpop.f32.mrf.mxu0 }
 0x582   :  { %v1951_v18 = vcombine.high %v1943_v1, %v2916_v60  ;;  %v1952_v19 = vcombine.high %v1950_v61, %v2916_v60  ;;  %v2026_v16 = vshrl.u32 %v1943_v1, 16  ;;  %v1987_v42 = vpack.c.bf16 %v1882_v13, %v1882_v13 }
 0x583   :  { %v1774_v10 = vpop.f32.mrf.mxu0  ;;  %v1817_v12 = vpop.f32.mrf.mxu1  ;;  %v2042_v35 = vshrl.u32 %v1950_v61, 16  ;;  %v2023_v47 = vpack.i.b16 %v1943_v1, %v1909_v6  ;;  %v2039_v51 = vpack.i.b16 %v1950_v61, %v1916_v8 }
 0x584   :  { %v1883_v17 = vmul.f32 %v2845_v3, %v1817_v12  ;;  %v2031_v44 = vpack.i.b16 %v1951_v18, %v1917_v25  ;;  %v2034_v34 = vshrl.u32 %v1951_v18, 16  ;;  %v2047_v36 = vpack.i.b16 %v1952_v19, %v1918_v26 }
 0x585   :  { %v2735_v20 = vpop.f32.mrf.mxu0  ;;  %v2740_v23 = vpop.f32.mrf.mxu1  ;;  %v2050_v38 = vshrl.u32 %v1952_v19, 16  ;;  %v2027_v50 = vpack.i.b16 %v2026_v16, %v2025_v45  ;;  %v1994_v52 = vrot.slane %v1987_v42, %v3038_v57  ;;  %v2043_v14 = vpack.i.b16 %v2042_v35, %v2041_v40 }
 0x586   :  { %v1961_v21 = vpack.c.bf16 %v1883_v17, %v1883_v17  ;;  %v2093_v55 = vcombine.low %v2031_v44, %v2047_v36  ;;  %v2035_v58 = vpack.i.b16 %v2034_v34, %v2033_v39  ;;  %v2085_v63 = vcombine.low %v2023_v47, %v2039_v51 }
 0x587   :  { %v1820_v29 = vpop.f32.mrf.mxu1  ;;  %v1863_v30 = vpop.f32.mrf.mxu0  ;;  %v2051_v56 = vpack.i.b16 %v2050_v38, %v2049_v22  ;;  %v2135_v3 = vcombine.low %v2027_v50, %v2043_v14  ;;  %v2803_v38 = vld [vmem:[%s3447_s5] sm:$0xff]  }
 0x588   :  { %v1968_v32 = vrot.slane %v1961_v21, %v3038_v57  ;;  %v1884_v33 = vmul.f32 %v2849_v24, %v1863_v30  ;;  %v2100_v61 = vrot.slane %v2093_v55, %v3038_v57  ;;  %v2092_v42 = vrot.slane %v2085_v63, %v3038_v57 }
 0x589   :  { %v2741_v11 = vpop.f32.mrf.mxu1  ;;  %v2746_v37 = vpop.f32.mrf.mxu0  ;;  %v2143_v5 = vcombine.low %v2035_v58, %v2051_v56  ;;  %v2142_v36 = vrot.slane %v2135_v3, %v3038_v57 }
 0x58a   :  { %v1969_v41 = vcombine.low %v1960_v28, %v1968_v32  ;;  %v1970_v43 = vcombine.high %v1960_v28, %v1968_v32  ;;  %v1995_v4 = vpack.c.bf16 %v1884_v33, %v1884_v33  ;;  %v2802_v33 = vld [vmem:[%s3447_s5 + $0x8] sm:$0xff]   ;;  %v2117_v35 = vcombine.low %v2092_v42, %v2100_v61  ;;  %s2917_s5 = smov 16  }
 0x58b   :  { %v1866_v46 = vpop.f32.mrf.mxu0  ;;  %2749 = vmatpush3.bf16.msra.mxu1 %v2802_v33 }
 0x58c   :  { %v1977_v49 = vrot.slane %v1969_v41, %v3050_v7  ;;  %v2002_v27 = vrot.slane %v1995_v4, %v3038_v57  ;;  %v1984_v31 = vrot.slane %v1970_v43, %v3050_v7  ;;  %2750 = vmatprep.subr.bf16.mxu1 %v2907_v15  ;;  %v2124_v39 = vrot.slane %v2117_v35, %v3050_v7 }
 0x58d   :  { %v2747_v53 = vpop.f32.mrf.mxu0 }
 0x58e   :  { %v2003_v59 = vcombine.low %v1994_v52, %v2002_v27  ;;  %v2004_v54 = vcombine.high %v1994_v52, %v2002_v27  ;;  %v1985_v62 = vcombine.high %v1977_v49, %v2916_v60  ;;  %v1986_v48 = vcombine.high %v1984_v31, %v2916_v60 }
 0x58f   :  { %v2057_v2 = vshrl.u32 %v1977_v49, 16  ;;  %v2073_v13 = vshrl.u32 %v1984_v31, 16  ;;  %2751 = vmatpush3.bf16.msra.mxu1 %v2803_v38 }
 0x590   :  { %v2011_v0 = vrot.slane %v2003_v59, %v3050_v7  ;;  %v2018_v1 = vrot.slane %v2004_v54, %v3050_v7  ;;  %v2065_v12 = vshrl.u32 %v1985_v62, 16  ;;  %v2081_v24 = vshrl.u32 %v1986_v48, 16  ;;  %2764 = vmatprep.subr.bf16.mxu1 %v2907_v15 }
 0x592   :  { %v2019_v6 = vcombine.high %v2011_v0, %v2916_v60  ;;  %v2020_v8 = vcombine.high %v2018_v1, %v2916_v60  ;;  %v2055_v9 = vpack.i.b16 %v2011_v0, %v1977_v49  ;;  %v2058_v10 = vshrl.u32 %v2011_v0, 16  ;;  %v2571_v0 = vld [vmem:[%s3448_s6] ss:$0 sm:$0xff] }
 0x593   :  { %v2071_v17 = vpack.i.b16 %v2018_v1, %v1984_v31  ;;  %v2074_v18 = vshrl.u32 %v2018_v1, 16  ;;  %v2150_v60 = vrot.slane %v2143_v5, %v3038_v57 }
 0x594   :  { %v2059_v19 = vpack.i.b16 %v2058_v10, %v2057_v2  ;;  %v2063_v20 = vpack.i.b16 %v2019_v6, %v1985_v62  ;;  %v2066_v23 = vshrl.u32 %v2019_v6, 16  ;;  %v2079_v21 = vpack.i.b16 %v2020_v8, %v1986_v48  ;;  %v2858_v2 = vld [vmem:[#allocation2] sm:$0xff]  ;;  %v2859_v10 = vld [vmem:[#allocation2 + $0x8] sm:$0xff] }
 0x595   :  { %v2075_v25 = vpack.i.b16 %v2074_v18, %v2073_v13  ;;  %v2082_v26 = vshrl.u32 %v2020_v8, 16  ;;  %v2101_v28 = vcombine.low %v2055_v9, %v2071_v17  ;;  %v2167_v4 = vcombine.low %v2142_v36, %v2150_v60  ;;  %v2575_v36 = vld [vmem:[%s3449_s7] ss:$0 sm:$0xff] }
 0x596   :  { %v2067_v29 = vpack.i.b16 %v2066_v23, %v2065_v12  ;;  %v2109_v30 = vcombine.low %v2063_v20, %v2079_v21 }
 0x597   :  { %v2083_v16 = vpack.i.b16 %v2082_v26, %v2081_v24  ;;  %v2151_v32 = vcombine.low %v2059_v19, %v2075_v25  ;;  %v2108_v44 = vrot.slane %v2101_v28, %v3038_v57  ;;  %v2174_v46 = vrot.slane %v2167_v4, %v3050_v7 }
 0x598   :  { %v2116_v34 = vrot.slane %v2109_v30, %v3038_v57  ;;  %v2805_v30 = vld [vmem:[%s3451_s9] sm:$0xff]  }
 0x599   :  { %v2159_v11 = vcombine.low %v2067_v29, %v2083_v16  ;;  %v2158_v41 = vrot.slane %v2151_v32, %v3038_v57  ;;  %v2804_v29 = vld [vmem:[%s3451_s9 + $0x8] sm:$0xff]  }
 0x59a   :  { %v2125_v37 = vcombine.low %v2108_v44, %v2116_v34  ;;  %2757 = vmatpush3.bf16.msra.mxu0 %v2804_v29 }
 0x59b   :  { %v2166_v43 = vrot.slane %v2159_v11, %v3038_v57  ;;  %2758 = vmatprep.subr.bf16.mxu0 %v2907_v15 }
 0x59c   :  { %v2132_v45 = vrot.slane %v2125_v37, %v3050_v7 }
 0x59d   :  { %v2175_v40 = vcombine.low %v2158_v41, %v2166_v43  ;;  %v2576_v41 = vld [vmem:[%s3450_s8] ss:$0 sm:$0xff] }
 0x59e   :  { %v2133_v47 = vcombine.low %v2124_v39, %v2132_v45  ;;  %v2134_v49 = vcombine.high %v2124_v39, %v2132_v45  ;;  %2759 = vmatpush3.bf16.msra.mxu0 %v2805_v30 }
 0x59f   :  { %v2182_v22 = vrot.slane %v2175_v40, %v3050_v7  ;;  %v2806_v40 = vld [vmem:[%s3453_s11 + $0x38] sm:$0xff]  }
 0x5a0   :  { %v2188_v52 = vshrl.u32 %v2133_v47, 16  ;;  %v2194_v14 = vshrl.u32 %v2134_v49, 16 }
 0x5a1   :  { %v2184_v27 = vcombine.high %v2174_v46, %v2182_v22  ;;  %v2183_v50 = vcombine.low %v2174_v46, %v2182_v22  ;;  %v2807_v46 = vld [vmem:[%s3453_s11 + $0x30] sm:$0xff]   ;;  %v2808_v22 = vld [vmem:[%s3453_s11 + $0x28] sm:$0xff]  }
 0x5a3   :  { %v2193_v51 = vpack.i.b16 %v2184_v27, %v2134_v49  ;;  %v2189_v57 = vshrl.u32 %v2183_v50, 16  ;;  %v2187_v53 = vpack.i.b16 %v2183_v50, %v2133_v47  ;;  %v2195_v58 = vshrl.u32 %v2184_v27, 16  ;;  %v2809_v47 = vld [vmem:[%s3453_s11 + $0x20] sm:$0xff]   ;;  %v2810_v49 = vld [vmem:[%s3453_s11 + $0x18] sm:$0xff]   ;;  %v2811_v27 = vld [vmem:[%s3453_s11 + $0x10] sm:$0xff]  }
 0x5a4   :  { %v2812_v50 = vld [vmem:[%s3453_s11 + $0x8] sm:$0xff]  }
 0x5a5   :  { %2199 = vrot.lane.b32.xlu0 %v2193_v51, %s2917_s5  ;;  %v2190_v55 = vpack.i.b16 %v2189_v57, %v2188_v52  ;;  %v2196_v56 = vpack.i.b16 %v2195_v58, %v2194_v14  ;;  %v2813_v51 = vld [vmem:[%s3453_s11] sm:$0xff]  }
 0x5a6   :  { %v2577_v57 = vld [vmem:[%s3452_s10] ss:$0 sm:$0xff]  ;;  %s2919_s10 = smov [#allocation5]  }
 0x5a7   :  { %2197 = vrot.lane.b32.xlu1 %v2190_v55, %s2906_s29  ;;  %s2524_s17 = sshll.u32 %s2919_s10, 4  ;;  %s2525_s17 = int_to_ptr.vmem [resolvable:$true] %s2524_s17 }
 0x5a8   :  { %s2880_s3 = scalar_lea.vmem %s2525_s17, 256  ;;  %p2885_p6 = scmp.lt.s32.totalorder %s2525_s17, %s2525_s17 }
 0x5a9   :  { %p2881_p5 = scmp.ne.s32.totalorder %s2525_s17, %s2880_s3  ;;  %p2886_p7 = scmp.lt.s32.totalorder %s2880_s3, %s2880_s3 }
 0x5ab   :  { %2201 = vrot.lane.b32.xlu1 %v2196_v56, %s2918_s14  ;;  %p2887_p8 = por %p2886_p7, %p2885_p6 }
 0x5ad   :  { %p2888_p9 = pnand %p2887_p8, %p2881_p5 }
 0x617   :  { %v2200_v59 = vpop.permute.xlu0 %2199 }
 0x619   :  { %v2198_v31 = vpop.permute.xlu1 %2197 }
 0x61a   :  { %v2205_v7 = vsel %vm1035_vm2, %v2187_v53, %v2198_v31 }
 0x61b   :  { %v2208_v62 = vsel %vm2206_vm4, %v2205_v7, %v2200_v59 }
 0x61d   :  { %v2202_v54 = vpop.permute.xlu1 %2201 }
 0x61e   :  { %v2211_v63 = vsel %vm2209_vm5, %v2208_v62, %v2202_v54 }
 0x61f   :  { %2753 = vmatmul.mubr.msk.bf16.vlgmr.msra.gmra.mxu1 %vm72_vm0, %v2211_v63 }
 0x620   :  { %2780 = vmatprep.mubr.msk.bf16.mxu1 %vm2908_vm1, %v2907_v15  ;;  %2765 = vmatpush3.bf16.msra.mxu1 %v2806_v40 }
 0x621   :  { %2766 = vmatprep.subr.bf16.mxu1 %v2907_v15 }
 0x624   :  { %2767 = vmatpush3.bf16.msra.mxu1 %v2807_v46 }
 0x625   :  { %2768 = vmatprep.subr.bf16.mxu1 %v2907_v15 }
 0x628   :  { %2769 = vmatpush3.bf16.msra.mxu1 %v2808_v22 }
 0x629   :  { %2770 = vmatprep.subr.bf16.mxu1 %v2907_v15 }
 0x62c   :  { %2771 = vmatpush3.bf16.msra.mxu1 %v2809_v47 }
 0x62d   :  { %2772 = vmatprep.subr.bf16.mxu1 %v2907_v15 }
 0x630   :  { %2773 = vmatpush3.bf16.msra.mxu1 %v2810_v49 }
 0x631   :  { %2774 = vmatprep.subr.bf16.mxu1 %v2907_v15 }
 0x634   :  { %2775 = vmatpush3.bf16.msra.mxu1 %v2811_v27 }
 0x635   :  { %2776 = vmatprep.subr.bf16.mxu1 %v2907_v15 }
 0x638   :  { %2777 = vmatpush3.bf16.msra.mxu1 %v2812_v50 }
 0x639   :  { %2778 = vmatprep.subr.bf16.mxu1 %v2907_v15 }
 0x63c   :  { %2779 = vmatpush3.bf16.msra.mxu1 %v2813_v51 }
 0x6df   :  { %v2270_v1 = vpop.f32.mrf.mxu1 }
 0x6e0   :  { %v2271_v61 = vadd.f32 %v2571_v0, %v2270_v1  ;;  %v2583_v1 = vld [vmem:[%s3454_s12] ss:$0 sm:$0xff] }
 0x6e1   :  { %v2754_v48 = vpop.f32.mrf.mxu1 }
 0x6e2   :  { %v3369_v3 = vadd.f32 %v2858_v2, %v2271_v61 }
 0x6e3   :  { %v2273_v5 = vpop.f32.mrf.mxu1 }
 0x6e4   :  { %v2274_v6 = vadd.f32 %v2571_v0, %v2273_v5  ;;  %v2279_v8 = vsel %vm72_vm0, %v3369_v3, 0.0 }
 0x6e5   :  { %2280 = vadd.xlane.f32.xlu1 %v2279_v8  ;;  %v2755_v9 = vpop.f32.mrf.mxu1 }
 0x6e6   :  { %v3373_v12 = vadd.f32 %v2859_v10, %v2274_v6 }
 0x6e8   :  { %v2282_v13 = vsel %vm72_vm0, %v3373_v12, 0.0 }
 0x6e9   :  { %2283 = vadd.xlane.f32.xlu0 %v2282_v13 }
 0x76e   :  { %v2281_v17 = vpop.xlane.xlu1 %2280 }
 0x76f   :  { %v2285_v18 = vmul.f32 0.03125, %v2281_v17 }
 0x771   :  { %v2287_v19 = vsub.f32 %v3369_v3, %v2285_v18 }
 0x772   :  { %v2284_v20 = vpop.xlane.xlu0 %2283 }
 0x773   :  { %v2286_v23 = vmul.f32 0.03125, %v2284_v20  ;;  %v2289_v21 = vmul.f32 %v2287_v19, %v2287_v19 }
 0x775   :  { %v2288_v24 = vsub.f32 %v3373_v12, %v2286_v23  ;;  %v2291_v25 = vsel %vm72_vm0, %v2289_v21, 0.0 }
 0x776   :  { %2292 = vadd.xlane.f32.xlu0 %v2291_v25 }
 0x777   :  { %v2290_v26 = vmul.f32 %v2288_v24, %v2288_v24 }
 0x779   :  { %v2294_v28 = vsel %vm72_vm0, %v2290_v26, 0.0 }
 0x77a   :  { %2295 = vadd.xlane.f32.xlu1 %v2294_v28 }
 0x7ff   :  { %v2293_v16 = vpop.xlane.xlu0 %2292 }
 0x800   :  { %v2297_v42 = vmul.f32 0.03125, %v2293_v16 }
 0x802   :  { %v2299_v60 = vadd.f32 1e-05, %v2297_v42 }
 0x803   :  { %v2296_v32 = vpop.xlane.xlu1 %2295 }
 0x804   :  { %2850 = vrsqrt.f32 %v2299_v60  ;;  %v2298_v33 = vmul.f32 0.03125, %v2296_v32 }
 0x806   :  { %v2300_v44 = vadd.f32 1e-05, %v2298_v33 }
 0x808   :  { %2852 = vrsqrt.f32 %v2300_v44 }
 0x811   :  { %v2851_v34 = vpop.eup %2850 }
 0x812   :  { %v2303_v35 = vmul.f32 %v2851_v34, %v2287_v19 }
 0x814   :  { %v2311_v38 = vmul.f32 %v2575_v36, %v2303_v35 }
 0x815   :  { %v2853_v11 = vpop.eup %2852 }
 0x816   :  { %v2304_v37 = vmul.f32 %v2853_v11, %v2288_v24  ;;  %v2319_v4 = vadd.f32 %v2576_v41, %v2311_v38 }
 0x818   :  { %v2312_v43 = vmul.f32 %v2575_v36, %v2304_v37 }
 0x81a   :  { %v2320_v45 = vadd.f32 %v2576_v41, %v2312_v43 }
 0x81c   :  { %v2593_v39 = vpack.c.bf16 %v2320_v45, %v2319_v4 }
 0x81e   :  { %2761 = vmatmul.mubr.msk.bf16.vlgmr.msra.gmra.mxu0 %vm72_vm0, %v2593_v39 }
 0x8de   :  { %v2387_v52 = vpop.f32.mrf.mxu0 }
 0x8df   :  { %v2388_v58 = vadd.f32 %v2577_v57, %v2387_v52 }
 0x8e0   :  { %v2762_v53 = vpop.f32.mrf.mxu0 }
 0x8e2   :  { %v2390_v55 = vpop.f32.mrf.mxu0 }
 0x8e3   :  { %v2391_v14 = vadd.f32 %v2577_v57, %v2390_v55 }
 0x8e4   :  { %v2763_v56 = vpop.f32.mrf.mxu0 }
 0x8e5   :  { %v2394_v31 = vpack.c.bf16 %v2391_v14, %v2388_v58 }
 0x8e7   :  { %v2582_v7 = vmul.bf16 3218784218, %v2394_v31 }
 0x8e9   :  { %v2398_v59 = vmul.bf16 1069105081, %v2582_v7 }
 0x8eb   :  { %2854 = vpow.bf16 %v2398_v59 }
 0x8f9   :  { %v2855_v15 = vpop.eup %2854 }
 0x8fa   :  { %v2400_v54 = vadd.bf16 1065369472, %v2855_v15 }
 0x8fc   :  { %2856 = vrcp.bf16 %v2400_v54 }
 0x90a   :  { %v2857_v62 = vpop.eup %2856 }
 0x90b   :  { %v2402_v63 = vmul.bf16 1065369472, %v2857_v62 }
 0x90d   :  { %v2403_v0 = vmul.bf16 %v2402_v63, %v2394_v31 }
 0x90f   :  { %2781 = vmatmul.mubr.bf16.vlgmr.msra.gmra.mxu1 %v2403_v0 }
 0x9cf   :  { %v2508_v61 = vpop.f32.mrf.mxu1 }
 0x9d0   :  { %v2509_v48 = vadd.f32 %v2583_v1, %v2508_v61 }
 0x9d1   :  { %v2782_v2 = vpop.f32.mrf.mxu1 }
 0x9d2   :  { %v2515_v5 = vadd.f32 %v2509_v48, %v3369_v3 }
 0x9d3   :  { %v2511_v6 = vpop.f32.mrf.mxu1 }
 0x9d4   :  { %2517 = vst.msk [vmem:[#allocation5] sm:$0xff] %vm72_vm0, %v2515_v5  ;;  %v2512_v8 = vadd.f32 %v2583_v1, %v2511_v6 }
 0x9d5   :  { %v2783_v9 = vpop.f32.mrf.mxu1 }
 0x9d6   :  { %v2516_v10 = vadd.f32 %v2512_v8, %v3373_v12 }
 0x9d8   :  { %2518 = vst.msk [vmem:[#allocation5 + $0x8] sm:$0xff] %vm72_vm0, %v2516_v10 }
 0x9d9   :  { %2891 = shalt.err (!%p2888_p9)
}
 0x9da   :  { %2530 = dma.vmem_to_hbm [thread:$0]  %s2525_s17, 256, %s3455_s13, [#allocation4], %s2905_s28, %s2905_s28, %s2906_s29  }
 0x9db   :  { %2902 = dma.done.wait [#allocation4], 256  }
 0x9dc   :  { %2903 = vsyncadd [#allocation4], 4294967040 }
 0x9dd   :  { %2534 = vsyncpa [#allocation3], 1 }
 0x9de   :  { %2535 = vsyncpa [#allocation4], 1 }

// kernel: tpu_custom_call.1
= control target key start
LH: loop header
LB: loop body
LE: loop exit
PB: predicated region body
PF: predicated region fallthrough
CT: control target
= control target key end

     0   :  { %vm58_vm0 = vcmask 261120   ;;  %s3407_s0 = inlined_call_operand.vmem [shape: f32[2,8,32], index: 0, kind: input, shape index: {}]   ;;  %s3408_s1 = inlined_call_operand.vmem [shape: f32[1,32], index: 1, kind: input, shape index: {}]   ;;  %s3409_s2 = inlined_call_operand.vmem [shape: f32[1,32], index: 2, kind: input, shape index: {}]   ;;  %s3410_s3 = inlined_call_operand.vmem [shape: bf16[32,96], index: 3, kind: input, shape index: {}]   ;;  %s3411_s4 = inlined_call_operand.vmem [shape: f32[1,96], index: 4, kind: input, shape index: {}]   ;;  %s3412_s5 = inlined_call_operand.vmem [shape: bf16[32,32], index: 5, kind: input, shape index: {}]   ;;  %s3413_s6 = inlined_call_operand.vmem [shape: f32[1,32], index: 6, kind: input, shape index: {}]   ;;  %s3414_s7 = inlined_call_operand.vmem [shape: f32[1,32], index: 7, kind: input, shape index: {}]   ;;  %s3415_s8 = inlined_call_operand.vmem [shape: f32[1,32], index: 8, kind: input, shape index: {}]   ;;  %s3416_s9 = inlined_call_operand.vmem [shape: bf16[32,128], index: 9, kind: input, shape index: {}]   ;;  %s3417_s10 = inlined_call_operand.vmem [shape: f32[1,128], index: 10, kind: input, shape index: {}]   ;;  %s3418_s11 = inlined_call_operand.vmem [shape: bf16[128,32], index: 11, kind: input, shape index: {}]   ;;  %s3419_s12 = inlined_call_operand.vmem [shape: f32[1,32], index: 12, kind: input, shape index: {}]   ;;  %s3420_s13 = inlined_call_operand.hbm [shape: f32[2,8,32], index: 13, kind: output, shape index: {}]  }
   0x1   :  { %v48_v0 = vld [vmem:[%s3407_s0] sm:$0xff]  ;;  %v49_v1 = vld [vmem:[%s3407_s0 + $0x8] sm:$0xff] }
   0x2   :  { %v59_v2 = vsel %vm58_vm0, %v48_v0, 0.0  ;;  %v62_v3 = vsel %vm58_vm0, %v49_v1, 0.0 }
   0x3   :  { %60 = vadd.xlane.f32.xlu0 %v59_v2 }
   0x7   :  { %63 = vadd.xlane.f32.xlu0 %v62_v3 }
   0x8   :  { %18 = vsyncpa [#allocation3], 0  ;;  %v2784_v14 = vld [vmem:[%s3410_s3 + $0x8] sm:$0xff]   ;;  %v2866_v15 = vmov 0.0   ;;  %vm2867_vm1 = vmmov 0   ;;  %v2785_v16 = vld [vmem:[%s3410_s3] sm:$0xff]   ;;  %v209_v47 = vlaneseq }
   0x9   :  { %2629 = vmatprep.subr.bf16.mxu0 %v2866_v15  ;;  %2633 = vmatprep.mubr.msk.bf16.mxu0 %vm2867_vm1, %v2866_v15  ;;  %v2521_v25 = vld [vmem:[%s3408_s1] ss:$0 sm:$0xff]  ;;  %s2868_s1 = smov 112   ;;  %s2870_s21 = smov 104   ;;  %v2873_v45 = vmov 1983009808  }
   0xa   :  { %2630 = vmatpush3.bf16.msra.mxu0 %v2784_v14  ;;  %2649 = vmatprep.subr.bf16.mxu1 %v2866_v15  ;;  %v2522_v29 = vld [vmem:[%s3409_s2] ss:$0 sm:$0xff]  ;;  %s2869_s2 = smov 120   ;;  %s2871_s22 = smov 96   ;;  %v207_v46 = vunpack.c.l.s4 %v2873_v45  ;;  %v210_v49 = vshrl.u32 %v209_v47, 7  ;;  %v2875_v60 = vmov 0  }
   0xb   :  { %2631 = vmatprep.subr.bf16.mxu0 %v2866_v15  ;;  %2651 = vmatprep.mubr.msk.bf16.mxu1 %vm2867_vm1, %v2866_v15  ;;  %v2523_v35 = vld [vmem:[%s3411_s4] ss:$0 sm:$0xff]  ;;  %s2872_s4 = smov 64   ;;  %v2874_v52 = vmov 1934713408   ;;  %v3003_v61 = vpack.i.b16 %v2875_v60, %v2875_v60  ;;  %vm1021_vm2 = vcmask 64512  }
   0xc   :  { %v208_v48 = vunpack.c.0.s8 %v207_v46  ;;  %v238_v53 = vunpack.c.l.s4 %v2874_v52  ;;  %vm1489_vm3 = vcmask 1043456   ;;  %s2877_s27 = smov 8   ;;  %s2878_s28 = smov 24   ;;  %vm2192_vm4 = vcmask 130048  }
   0xd   :  { %vm2195_vm5 = vcmask 195584  }
   0xe   :  { %2632 = vmatpush3.bf16.msra.mxu0 %v2785_v16  ;;  %v2999_v57 = vsub.s32 %v208_v48, %v210_v49  ;;  %v239_v63 = vunpack.c.0.s8 %v238_v53 }
   0xf   :  { %2637 = vmatprep.subr.bf16.mxu0 %v2866_v15 }
  0x8c   :  { %v61_v4 = vpop.xlane.xlu0 %60 }
  0x8d   :  { %v66_v5 = vmul.f32 0.03125, %v61_v4 }
  0x8f   :  { %v68_v6 = vsub.f32 %v48_v0, %v66_v5 }
  0x90   :  { %v64_v7 = vpop.xlane.xlu0 %63 }
  0x91   :  { %v67_v8 = vmul.f32 0.03125, %v64_v7  ;;  %v70_v9 = vmul.f32 %v68_v6, %v68_v6  ;;  %v3011_v7 = vsub.s32 %v239_v63, %v210_v49 }
  0x93   :  { %v69_v10 = vsub.f32 %v49_v1, %v67_v8  ;;  %v72_v11 = vsel %vm58_vm0, %v70_v9, 0.0 }
  0x94   :  { %73 = vadd.xlane.f32.xlu1 %v72_v11 }
  0x95   :  { %v71_v12 = vmul.f32 %v69_v10, %v69_v10 }
  0x97   :  { %v75_v13 = vsel %vm58_vm0, %v71_v12, 0.0 }
  0x98   :  { %76 = vadd.xlane.f32.xlu1 %v75_v13 }
 0x11d   :  { %v74_v17 = vpop.xlane.xlu1 %73 }
 0x11e   :  { %v78_v18 = vmul.f32 0.03125, %v74_v17 }
 0x120   :  { %v80_v19 = vadd.f32 1e-05, %v78_v18 }
 0x121   :  { %v77_v20 = vpop.xlane.xlu1 %76 }
 0x122   :  { %2798 = vrsqrt.f32 %v80_v19  ;;  %v79_v21 = vmul.f32 0.03125, %v77_v20 }
 0x124   :  { %v81_v22 = vadd.f32 1e-05, %v79_v21 }
 0x126   :  { %2800 = vrsqrt.f32 %v81_v22 }
 0x12f   :  { %v2799_v23 = vpop.eup %2798 }
 0x130   :  { %v84_v24 = vmul.f32 %v2799_v23, %v68_v6 }
 0x132   :  { %v92_v28 = vmul.f32 %v2521_v25, %v84_v24 }
 0x133   :  { %v2801_v26 = vpop.eup %2800 }
 0x134   :  { %v85_v27 = vmul.f32 %v2801_v26, %v69_v10  ;;  %v100_v31 = vadd.f32 %v2522_v29, %v92_v28 }
 0x136   :  { %v93_v30 = vmul.f32 %v2521_v25, %v85_v27 }
 0x138   :  { %v101_v32 = vadd.f32 %v2522_v29, %v93_v30 }
 0x13a   :  { %v2577_v33 = vpack.c.bf16 %v101_v32, %v100_v31 }
 0x13c   :  { %2634 = vmatmul.mubr.msk.bf16.vlgmr.msra.gmra.mxu0 %vm58_vm0, %v2577_v33 }
 0x13d   :  { %2639 = vmatprep.mubr.msk.bf16.mxu0 %vm2867_vm1, %v2866_v15 }
 0x1fc   :  { %v168_v34 = vpop.f32.mrf.mxu0 }
 0x1fd   :  { %v169_v38 = vadd.f32 %v2523_v35, %v168_v34 }
 0x1fe   :  { %v2635_v36 = vpop.f32.mrf.mxu0 }
 0x200   :  { %v171_v37 = vpop.f32.mrf.mxu0 }
 0x201   :  { %v172_v39 = vadd.f32 %v2523_v35, %v171_v37 }
 0x202   :  { %v2636_v40 = vpop.f32.mrf.mxu0 }
 0x203   :  { %v175_v41 = vpack.c.bf16 %v172_v39, %v169_v38 }
 0x205   :  { %179 = vrot.lane.b32.xlu1 %v175_v41, %s2868_s1  ;;  %177 = vrot.lane.b32.xlu0 %v175_v41, %s2869_s2  ;;  %v187_v56 = vshrl.u32 %v175_v41, 16 }
 0x209   :  { %181 = vrot.lane.b32.xlu1 %v175_v41, %s2870_s21 }
 0x20d   :  { %461 = vrot.lane.b32.xlu1 %v175_v41, %s2871_s22 }
 0x277   :  { %v2987_v42 = vpop.permute.xlu1 %179  ;;  %v178_v43 = vpop.permute.xlu0 %177 }
 0x278   :  { %465 = vrot.lane.b32.xlu1 %v2987_v42, %s2871_s22  ;;  %463 = vrot.lane.b32.xlu0 %v178_v43, %s2871_s22  ;;  %v188_v51 = vshrl.u32 %v178_v43, 16  ;;  %v195_v54 = vshrl.u32 %v2987_v42, 16  ;;  %v185_v58 = vpack.i.b16 %v178_v43, %v175_v41 }
 0x27a   :  { %v189_v62 = vpack.i.b16 %v188_v51, %v187_v56  ;;  %v212_v2 = vrot.slane %v185_v58, %v2999_v57  ;;  %v205_v5 = vcombine.high %v185_v58, %v3003_v61 }
 0x27b   :  { %v2990_v44 = vpop.permute.xlu1 %181 }
 0x27c   :  { %743 = vrot.lane.b32.xlu1 %v178_v43, %s2872_s4  ;;  %467 = vrot.lane.b32.xlu0 %v2990_v44, %s2871_s22  ;;  %v196_v50 = vshrl.u32 %v2990_v44, 16  ;;  %v193_v55 = vpack.i.b16 %v2990_v44, %v2987_v42  ;;  %v278_v6 = vrot.slane %v189_v62, %v2999_v57  ;;  %v271_v13 = vcombine.high %v189_v62, %v3003_v61 }
 0x27d   :  { %v3019_v21 = vrot.slane %v205_v5, %v2999_v57 }
 0x27e   :  { %v197_v59 = vpack.i.b16 %v196_v50, %v195_v54  ;;  %v227_v0 = vrot.slane %v193_v55, %v2999_v57  ;;  %v220_v1 = vcombine.high %v193_v55, %v3003_v61  ;;  %v3029_v27 = vrot.slane %v271_v13, %v2999_v57 }
 0x27f   :  { %v462_v4 = vpop.permute.xlu1 %461 }
 0x280   :  { %741 = vrot.lane.b32.xlu0 %v175_v41, %s2872_s4  ;;  %v293_v3 = vrot.slane %v197_v59, %v2999_v57  ;;  %v235_v9 = vcombine.low %v212_v2, %v227_v0  ;;  %v236_v10 = vcombine.high %v212_v2, %v227_v0  ;;  %v3015_v14 = vrot.slane %v220_v1, %v2999_v57 }
 0x281   :  { %v286_v16 = vcombine.high %v197_v59, %v3003_v61  ;;  %v473_v19 = vshrl.u32 %v462_v4, 16 }
 0x282   :  { %v301_v17 = vcombine.low %v278_v6, %v293_v3  ;;  %v302_v18 = vcombine.high %v278_v6, %v293_v3  ;;  %v3022_v22 = vrot.slane %v235_v9, %v3011_v7  ;;  %v3025_v23 = vrot.slane %v236_v10, %v3011_v7 }
 0x283   :  { %v251_v31 = vcombine.low %v3019_v21, %v3015_v14  ;;  %v300_v32 = vrot.slane %v286_v16, %v2999_v57 }
 0x284   :  { %v309_v33 = vrot.slane %v301_v17, %v3011_v7  ;;  %v316_v34 = vrot.slane %v302_v18, %v3011_v7  ;;  %v337_v39 = vcombine.low %v3022_v22, %v3025_v23  ;;  %v2528_v40 = vcombine.high %v3022_v22, %v3025_v23 }
 0x285   :  { %v317_v9 = vcombine.low %v3029_v27, %v300_v32  ;;  %v318_v10 = vcombine.high %v3029_v27, %v300_v32 }
 0x286   :  { %v362_v49 = vcombine.low %v309_v33, %v316_v34  ;;  %v2529_v50 = vcombine.high %v309_v33, %v316_v34 }
 0x2ea   :  { %v464_v8 = vpop.permute.xlu0 %463  ;;  %v466_v20 = vpop.permute.xlu1 %465 }
 0x2eb   :  { %v471_v11 = vpack.i.b16 %v464_v8, %v462_v4  ;;  %v474_v12 = vshrl.u32 %v464_v8, 16  ;;  %v481_v28 = vshrl.u32 %v466_v20, 16 }
 0x2ed   :  { %v475_v24 = vpack.i.b16 %v474_v12, %v473_v19  ;;  %v485_v25 = vcombine.high %v471_v11, %v3003_v61  ;;  %v492_v35 = vrot.slane %v471_v11, %v2999_v57  ;;  %v369_v19 = vrot.slane %v362_v49, %v2999_v57 }
 0x2ee   :  { %v468_v26 = vpop.permute.xlu0 %467 }
 0x2ef   :  { %v479_v29 = vpack.i.b16 %v468_v26, %v466_v20  ;;  %v482_v30 = vshrl.u32 %v468_v26, 16  ;;  %v499_v41 = vrot.slane %v485_v25, %v2999_v57  ;;  %v551_v43 = vcombine.high %v475_v24, %v3003_v61 }
 0x2f0   :  { %v558_v51 = vrot.slane %v475_v24, %v2999_v57  ;;  %v377_v20 = vrot.slane %v2529_v50, %v2999_v57 }
 0x2f1   :  { %v483_v36 = vpack.i.b16 %v482_v30, %v481_v28  ;;  %v500_v37 = vcombine.high %v479_v29, %v3003_v61  ;;  %v507_v38 = vrot.slane %v479_v29, %v2999_v57  ;;  %v565_v58 = vrot.slane %v551_v43, %v2999_v57 }
 0x2f2   :  { %v252_v28 = vcombine.high %v3019_v21, %v3015_v14  ;;  %v344_v29 = vrot.slane %v337_v39, %v2999_v57  ;;  %v352_v30 = vrot.slane %v2528_v40, %v2999_v57  ;;  %v259_v40 = vrot.slane %v251_v31, %v3011_v7 }
 0x2f3   :  { %v514_v45 = vrot.slane %v500_v37, %v2999_v57  ;;  %v515_v46 = vcombine.low %v492_v35, %v507_v38  ;;  %v516_v47 = vcombine.high %v492_v35, %v507_v38  ;;  %v566_v48 = vcombine.high %v483_v36, %v3003_v61 }
 0x2f4   :  { %v573_v52 = vrot.slane %v483_v36, %v2999_v57  ;;  %v325_v36 = vrot.slane %v317_v9, %v3011_v7  ;;  %v332_v37 = vrot.slane %v318_v10, %v3011_v7 }
 0x2f5   :  { %v523_v53 = vrot.slane %v515_v46, %v3011_v7  ;;  %v530_v54 = vrot.slane %v516_v47, %v3011_v7  ;;  %v531_v55 = vcombine.low %v499_v41, %v514_v45  ;;  %v532_v56 = vcombine.high %v499_v41, %v514_v45 }
 0x2f6   :  { %v580_v59 = vrot.slane %v566_v48, %v2999_v57  ;;  %v581_v62 = vcombine.low %v558_v51, %v573_v52  ;;  %v582_v63 = vcombine.high %v558_v51, %v573_v52  ;;  %v378_v41 = vcombine.low %v369_v19, %v377_v20 }
 0x2f7   :  { %v539_v0 = vrot.slane %v531_v55, %v3011_v7  ;;  %v546_v1 = vrot.slane %v532_v56, %v3011_v7  ;;  %v617_v2 = vcombine.low %v523_v53, %v530_v54  ;;  %v2532_v3 = vcombine.high %v523_v53, %v530_v54 }
 0x2f8   :  { %v589_v4 = vrot.slane %v581_v62, %v3011_v7  ;;  %v596_v5 = vrot.slane %v582_v63, %v3011_v7  ;;  %v597_v6 = vcombine.low %v565_v58, %v580_v59  ;;  %v598_v8 = vcombine.high %v565_v58, %v580_v59 }
 0x2f9   :  { %v624_v11 = vrot.slane %v617_v2, %v2999_v57  ;;  %v632_v12 = vrot.slane %v2532_v3, %v2999_v57  ;;  %v667_v22 = vcombine.low %v539_v0, %v546_v1  ;;  %v2534_v23 = vcombine.high %v539_v0, %v546_v1 }
 0x2fa   :  { %v605_v13 = vrot.slane %v597_v6, %v3011_v7  ;;  %v612_v16 = vrot.slane %v598_v8, %v3011_v7  ;;  %v642_v17 = vcombine.low %v589_v4, %v596_v5  ;;  %v2533_v18 = vcombine.high %v589_v4, %v596_v5 }
 0x2fb   :  { %v633_v32 = vcombine.low %v624_v11, %v632_v12  ;;  %v674_v43 = vrot.slane %v667_v22, %v2999_v57  ;;  %v682_v45 = vrot.slane %v2534_v23, %v2999_v57  ;;  %v266_v46 = vrot.slane %v252_v28, %v3011_v7 }
 0x2fc   :  { %v649_v24 = vrot.slane %v642_v17, %v2999_v57  ;;  %v657_v25 = vrot.slane %v2533_v18, %v2999_v57  ;;  %v692_v26 = vcombine.low %v605_v13, %v612_v16  ;;  %v2535_v27 = vcombine.high %v605_v13, %v612_v16 }
 0x2fd   :  { %v640_v38 = vrot.slane %v633_v32, %v3011_v7  ;;  %v353_v47 = vcombine.low %v344_v29, %v352_v30  ;;  %v412_v52 = vcombine.low %v325_v36, %v332_v37  ;;  %v2531_v53 = vcombine.high %v325_v36, %v332_v37 }
 0x2fe   :  { %v658_v33 = vcombine.low %v649_v24, %v657_v25  ;;  %v699_v34 = vrot.slane %v692_v26, %v2999_v57  ;;  %v707_v35 = vrot.slane %v2535_v27, %v2999_v57  ;;  %v385_v54 = vrot.slane %v378_v41, %v3011_v7 }
 0x2ff   :  { %v641_v49 = vcombine.high %v640_v38, %v2875_v60  ;;  %v683_v14 = vcombine.low %v674_v43, %v682_v45  ;;  %v387_v21 = vcombine.low %v259_v40, %v266_v46  ;;  %v2530_v31 = vcombine.high %v259_v40, %v266_v46 }
 0x300   :  { %v665_v39 = vrot.slane %v658_v33, %v3011_v7  ;;  %v708_v51 = vcombine.low %v699_v34, %v707_v35  ;;  %v360_v62 = vrot.slane %v353_v47, %v3011_v7  ;;  %v720_v63 = vshrl.u32 %v640_v38, 16 }
 0x301   :  { %v419_v1 = vrot.slane %v412_v52, %v2999_v57  ;;  %v427_v2 = vrot.slane %v2531_v53, %v2999_v57  ;;  %v386_v4 = vcombine.high %v385_v54, %v2875_v60  ;;  %v690_v5 = vrot.slane %v683_v14, %v3011_v7 }
 0x302   :  { %v719_v48 = vpack.i.b16 %v665_v39, %v640_v38  ;;  %v666_v50 = vcombine.high %v665_v39, %v2875_v60  ;;  %v721_v58 = vshrl.u32 %v665_v39, 16  ;;  %v715_v0 = vrot.slane %v708_v51, %v3011_v7 }
 0x303   :  { %v394_v6 = vrot.slane %v387_v21, %v2999_v57  ;;  %v402_v8 = vrot.slane %v2530_v31, %v2999_v57  ;;  %v439_v9 = vpack.i.b16 %v385_v54, %v360_v62  ;;  %v361_v10 = vcombine.high %v360_v62, %v2875_v60 }
 0x304   :  { %v1026_v55 = vsel %vm1021_vm2, %v719_v48, 0  ;;  %v725_v56 = vpack.i.b16 %v666_v50, %v641_v49  ;;  %v722_v3 = vpack.i.b16 %v721_v58, %v720_v63  ;;  %v731_v11 = vpack.i.b16 %v715_v0, %v690_v5 }
 0x305   :  { %2638 = vmatpush3.bf16.xpose.msra.mxu0 %v1026_v55  ;;  %v727_v12 = vshrl.u32 %v666_v50, 16  ;;  %v445_v16 = vpack.i.b16 %v386_v4, %v361_v10  ;;  %v428_v17 = vcombine.low %v419_v1, %v427_v2  ;;  %v403_v18 = vcombine.low %v394_v6, %v402_v8 }
 0x306   :  { %v1118_v59 = vsel %vm1021_vm2, %v725_v56, 0  ;;  %2643 = vmatprep.subr.bf16.mxu0 %v2866_v15  ;;  %v1072_v13 = vsel %vm1021_vm2, %v722_v3, 0  ;;  %v726_v19 = vshrl.u32 %v641_v49, 16  ;;  %v1210_v20 = vsel %vm1021_vm2, %v731_v11, 0 }
 0x307   :  { %2650 = vmatpush3.bf16.xpose.msra.mxu1 %v1118_v59  ;;  %v441_v22 = vshrl.u32 %v385_v54, 16  ;;  %v716_v23 = vcombine.high %v715_v0, %v2875_v60  ;;  %v440_v24 = vshrl.u32 %v360_v62, 16  ;;  %v435_v26 = vrot.slane %v428_v17, %v3011_v7 }
 0x308   :  { %2661 = vmatprep.subr.bf16.mxu1 %v2866_v15  ;;  %v728_v25 = vpack.i.b16 %v727_v12, %v726_v19  ;;  %v691_v27 = vcombine.high %v690_v5, %v2875_v60  ;;  %v410_v29 = vrot.slane %v403_v18, %v3011_v7  ;;  %v733_v34 = vshrl.u32 %v715_v0, 16 }
 0x309   :  { %v442_v28 = vpack.i.b16 %v441_v22, %v440_v24  ;;  %v447_v35 = vshrl.u32 %v386_v4, 16  ;;  %v732_v37 = vshrl.u32 %v690_v5, 16  ;;  %v446_v38 = vshrl.u32 %v361_v10, 16 }
 0x30a   :  { %v737_v30 = vpack.i.b16 %v716_v23, %v691_v27  ;;  %v1164_v32 = vsel %vm1021_vm2, %v728_v25, 0  ;;  %v451_v33 = vpack.i.b16 %v435_v26, %v410_v29  ;;  %v436_v43 = vcombine.high %v435_v26, %v2875_v60 }
 0x30b   :  { %v734_v41 = vpack.i.b16 %v733_v34, %v732_v37  ;;  %v448_v45 = vpack.i.b16 %v447_v35, %v446_v38  ;;  %v411_v39 = vcombine.high %v410_v29, %v2875_v60  ;;  %v739_v47 = vshrl.u32 %v716_v23, 16 }
 0x30c   :  { %2640 = vmatmul.mubr.msk.bf16.vlgmr.msra.gmra.mxu0 %vm1021_vm2, %v439_v9  ;;  %v1302_v36 = vsel %vm1021_vm2, %v737_v30, 0  ;;  %v453_v48 = vshrl.u32 %v435_v26, 16  ;;  %v738_v49 = vshrl.u32 %v691_v27, 16  ;;  %v452_v50 = vshrl.u32 %v410_v29, 16 }
 0x30d   :  { %2644 = vmatpush3.bf16.xpose.msra.mxu0 %v1072_v13  ;;  %2645 = vmatprep.mubr.msk.bf16.mxu0 %vm2867_vm1, %v2866_v15  ;;  %v1256_v40 = vsel %vm1021_vm2, %v734_v41, 0  ;;  %v457_v46 = vpack.i.b16 %v436_v43, %v411_v39  ;;  %v459_v54 = vshrl.u32 %v436_v43, 16  ;;  %v458_v55 = vshrl.u32 %v411_v39, 16  ;;  %v742_v43 = vpop.permute.xlu0 %741 }
 0x30e   :  { %2652 = vmatmul.mubr.msk.bf16.vlgmr.msra.gmra.mxu1 %vm1021_vm2, %v445_v16  ;;  %2655 = vmatprep.subr.bf16.mxu0 %v2866_v15  ;;  %v740_v51 = vpack.i.b16 %v739_v47, %v738_v49  ;;  %v454_v52 = vpack.i.b16 %v453_v48, %v452_v50 }
 0x30f   :  { %2662 = vmatpush3.bf16.xpose.msra.mxu1 %v1210_v20  ;;  %2663 = vmatprep.mubr.msk.bf16.mxu1 %vm2867_vm1, %v2866_v15  ;;  %v460_v56 = vpack.i.b16 %v459_v54, %v458_v55 }
 0x310   :  { %2673 = vmatprep.subr.bf16.mxu1 %v2866_v15  ;;  %v1348_v53 = vsel %vm1021_vm2, %v740_v51, 0 }
 0x314   :  { %2646 = vmatmul.mubr.msk.bf16.vlgmr.msra.gmra.mxu0 %vm1021_vm2, %v442_v28 }
 0x315   :  { %2656 = vmatpush3.bf16.xpose.msra.mxu0 %v1164_v32  ;;  %2657 = vmatprep.mubr.msk.bf16.mxu0 %vm2867_vm1, %v2866_v15 }
 0x316   :  { %2664 = vmatmul.mubr.msk.bf16.vlgmr.msra.gmra.mxu1 %vm1021_vm2, %v451_v33  ;;  %2667 = vmatprep.subr.bf16.mxu0 %v2866_v15 }
 0x317   :  { %2674 = vmatpush3.bf16.xpose.msra.mxu1 %v1302_v36  ;;  %2675 = vmatprep.mubr.msk.bf16.mxu1 %vm2867_vm1, %v2866_v15  ;;  %v744_v36 = vpop.permute.xlu1 %743 }
 0x318   :  { %2685 = vmatprep.subr.bf16.mxu1 %v2866_v15  ;;  %v3172_v48 = vpack.i.b16 %v744_v36, %v742_v43  ;;  %v754_v50 = vshrl.u32 %v744_v36, 16 }
 0x31c   :  { %2658 = vmatmul.mubr.msk.bf16.vlgmr.msra.gmra.mxu0 %vm1021_vm2, %v448_v45 }
 0x31d   :  { %2668 = vmatpush3.bf16.xpose.msra.mxu0 %v1256_v40  ;;  %2669 = vmatprep.mubr.msk.bf16.mxu0 %vm2867_vm1, %v2866_v15 }
 0x31e   :  { %2676 = vmatmul.mubr.msk.bf16.vlgmr.msra.gmra.mxu1 %vm1021_vm2, %v457_v46  ;;  %2679 = vmatprep.subr.bf16.mxu0 %v2866_v15  ;;  %v753_v46 = vshrl.u32 %v742_v43, 16 }
 0x31f   :  { %2687 = vmatprep.mubr.msk.bf16.mxu1 %vm2867_vm1, %v2866_v15 }
 0x324   :  { %2670 = vmatmul.mubr.msk.bf16.vlgmr.msra.gmra.mxu0 %vm1021_vm2, %v454_v52 }
 0x325   :  { %2680 = vmatpush3.bf16.xpose.msra.mxu0 %v1348_v53  ;;  %2681 = vmatprep.mubr.msk.bf16.mxu0 %vm2867_vm1, %v2866_v15 }
 0x326   :  { %2691 = vmatprep.subr.bf16.mxu0 %v2866_v15 }
 0x32c   :  { %2682 = vmatmul.mubr.msk.bf16.vlgmr.msra.gmra.mxu0 %vm1021_vm2, %v460_v56  ;;  %v3176_v56 = vpack.i.b16 %v754_v50, %v753_v46 }
 0x32d   :  { %2693 = vmatprep.mubr.msk.bf16.mxu0 %vm2867_vm1, %v2866_v15 }
 0x3cc   :  { %v1062_v58 = vpop.f32.mrf.mxu0 }
 0x3cd   :  { %v1390_v14 = vsel %vm1021_vm2, %v1062_v58, -inf }
 0x3ce   :  { %v3143_v21 = vpop.f32.mrf.mxu1  ;;  %1391 = vmax.xlane.f32.xlu1 %v1390_v14  ;;  %v2641_v31 = vpop.f32.mrf.mxu0 }
 0x3d0   :  { %v1065_v59 = vpop.f32.mrf.mxu0  ;;  %v2653_v62 = vpop.f32.mrf.mxu1 }
 0x3d2   :  { %v2642_v63 = vpop.f32.mrf.mxu0  ;;  %v1157_v0 = vpop.f32.mrf.mxu1 }
 0x3d3   :  { %v838_v63 = vrot.slane %v3176_v56, %v2999_v57 }
 0x3d4   :  { %v1108_v1 = vpop.f32.mrf.mxu0  ;;  %v2654_v2 = vpop.f32.mrf.mxu1 }
 0x3d5   :  { %v1393_v3 = vsel %vm1021_vm2, %v1108_v1, -inf }
 0x3d6   :  { %v3146_v4 = vpop.f32.mrf.mxu1  ;;  %1394 = vmax.xlane.f32.xlu0 %v1393_v3  ;;  %v2647_v5 = vpop.f32.mrf.mxu0 }
 0x3d8   :  { %v1111_v6 = vpop.f32.mrf.mxu0  ;;  %v2665_v8 = vpop.f32.mrf.mxu1 }
 0x3da   :  { %v2648_v9 = vpop.f32.mrf.mxu0  ;;  %v1249_v10 = vpop.f32.mrf.mxu1 }
 0x3dc   :  { %v3148_v11 = vpop.f32.mrf.mxu0  ;;  %v2666_v12 = vpop.f32.mrf.mxu1 }
 0x3dd   :  { %v1399_v33 = vsel %vm1021_vm2, %v3148_v11, -inf }
 0x3de   :  { %v2659_v13 = vpop.f32.mrf.mxu0  ;;  %v3150_v16 = vpop.f32.mrf.mxu1 }
 0x3df   :  { %745 = vrot.lane.b32.xlu1 %v2987_v42, %s2872_s4  ;;  %v1396_v42 = vsel %vm1021_vm2, %v3143_v21, -inf  ;;  %v1408_v32 = vsel %vm1021_vm2, %v3150_v16, -inf }
 0x3e0   :  { %v1203_v17 = vpop.f32.mrf.mxu0  ;;  %v2677_v18 = vpop.f32.mrf.mxu1 }
 0x3e2   :  { %v2660_v19 = vpop.f32.mrf.mxu0  ;;  %v1341_v20 = vpop.f32.mrf.mxu1 }
 0x3e4   :  { %v3154_v22 = vpop.f32.mrf.mxu0  ;;  %v2678_v23 = vpop.f32.mrf.mxu1 }
 0x3e5   :  { %v1405_v34 = vsel %vm1021_vm2, %v3154_v22, -inf }
 0x3e6   :  { %v2671_v24 = vpop.f32.mrf.mxu0 }
 0x3e8   :  { %v1295_v25 = vpop.f32.mrf.mxu0 }
 0x3ea   :  { %v2672_v26 = vpop.f32.mrf.mxu0 }
 0x3ec   :  { %747 = vrot.lane.b32.xlu0 %v2990_v44, %s2872_s4  ;;  %v3158_v27 = vpop.f32.mrf.mxu0  ;;  %v1402_v44 = vsel %vm1021_vm2, %v3146_v4, -inf }
 0x3ed   :  { %v1411_v35 = vsel %vm1021_vm2, %v3158_v27, -inf }
 0x3ee   :  { %v2683_v28 = vpop.f32.mrf.mxu0 }
 0x3f0   :  { %v1387_v29 = vpop.f32.mrf.mxu0 }
 0x3f2   :  { %v2684_v30 = vpop.f32.mrf.mxu0 }
 0x403   :  { %1397 = vmax.xlane.f32.xlu1 %v1396_v42 }
 0x407   :  { %1409 = vmax.xlane.f32.xlu1 %v1408_v32 }
 0x40b   :  { %1400 = vmax.xlane.f32.xlu0 %v1399_v33 }
 0x40f   :  { %1403 = vmax.xlane.f32.xlu0 %v1402_v44 }
 0x413   :  { %1406 = vmax.xlane.f32.xlu0 %v1405_v34 }
 0x417   :  { %1412 = vmax.xlane.f32.xlu0 %v1411_v35 }
 0x457   :  { %v1392_v37 = vpop.xlane.xlu1 %1391 }
 0x458   :  { %v1414_v38 = vsub.f32 %v1062_v58, %v1392_v37  ;;  %v772_v58 = vrot.slane %v3172_v48, %v2999_v57 }
 0x45a   :  { %v1422_v41 = vpack.c.bf16 %v1414_v38, %v1414_v38 }
 0x45b   :  { %v746_v47 = vpop.permute.xlu1 %745 }
 0x45c   :  { %v1431_v45 = vmul.bf16 1069105081, %v1422_v41  ;;  %v761_v52 = vshrl.u32 %v746_v47, 16 }
 0x45e   :  { %2802 = vpow.bf16 %v1431_v45 }
 0x45f   :  { %v1395_v39 = vpop.xlane.xlu0 %1394 }
 0x460   :  { %v1415_v40 = vsub.f32 %v1108_v1, %v1395_v39 }
 0x462   :  { %v1423_v49 = vpack.c.bf16 %v1415_v40, %v1415_v40 }
 0x463   :  { %v748_v51 = vpop.permute.xlu0 %747 }
 0x464   :  { %v1434_v53 = vmul.bf16 1069105081, %v1423_v49  ;;  %v3174_v54 = vpack.i.b16 %v748_v51, %v746_v47  ;;  %v762_v55 = vshrl.u32 %v748_v51, 16  ;;  %v831_v51 = vcombine.high %v3176_v56, %v3003_v61 }
 0x466   :  { %2804 = vpow.bf16 %v1434_v53  ;;  %v3180_v14 = vpack.i.b16 %v762_v55, %v761_v52  ;;  %v787_v31 = vrot.slane %v3174_v54, %v2999_v57  ;;  %v780_v52 = vcombine.high %v3174_v54, %v3003_v61 }
 0x467   :  { %v765_v53 = vcombine.high %v3172_v48, %v3003_v61 }
 0x468   :  { %v795_v59 = vcombine.low %v772_v58, %v787_v31  ;;  %v796_v62 = vcombine.high %v772_v58, %v787_v31  ;;  %v853_v0 = vrot.slane %v3180_v14, %v2999_v57  ;;  %v846_v49 = vcombine.high %v3180_v14, %v3003_v61 }
 0x469   :  { %v845_v58 = vrot.slane %v831_v51, %v2999_v57  ;;  %v794_v14 = vrot.slane %v780_v52, %v2999_v57  ;;  %v779_v56 = vrot.slane %v765_v53, %v2999_v57 }
 0x46a   :  { %v803_v1 = vrot.slane %v795_v59, %v3011_v7  ;;  %v810_v2 = vrot.slane %v796_v62, %v3011_v7  ;;  %v861_v3 = vcombine.low %v838_v63, %v853_v0  ;;  %v862_v5 = vcombine.high %v838_v63, %v853_v0 }
 0x46b   :  { %v860_v55 = vrot.slane %v846_v49, %v2999_v57  ;;  %v811_v54 = vcombine.low %v779_v56, %v794_v14  ;;  %v812_v62 = vcombine.high %v779_v56, %v794_v14 }
 0x46c   :  { %v897_v6 = vcombine.low %v803_v1, %v810_v2  ;;  %v2536_v8 = vcombine.high %v803_v1, %v810_v2  ;;  %v2803_v9 = vpop.eup %2802  ;;  %v869_v10 = vrot.slane %v861_v3, %v3011_v7  ;;  %v876_v12 = vrot.slane %v862_v5, %v3011_v7 }
 0x46d   :  { %v1454_v20 = vunpack.c.l.bf16 %v2803_v9  ;;  %v877_v31 = vcombine.low %v845_v58, %v860_v55  ;;  %v878_v59 = vcombine.high %v845_v58, %v860_v55  ;;  %v819_v1 = vrot.slane %v811_v54, %v3011_v7 }
 0x46e   :  { %v904_v13 = vrot.slane %v897_v6, %v2999_v57  ;;  %v912_v17 = vrot.slane %v2536_v8, %v2999_v57  ;;  %v922_v18 = vcombine.low %v869_v10, %v876_v12  ;;  %v2537_v19 = vcombine.high %v869_v10, %v876_v12 }
 0x46f   :  { %v1462_v26 = vsel %vm1021_vm2, %v1454_v20, 0.0  ;;  %v885_v63 = vrot.slane %v877_v31, %v3011_v7  ;;  %v892_v0 = vrot.slane %v878_v59, %v3011_v7  ;;  %v826_v61 = vrot.slane %v812_v62, %v3011_v7 }
 0x470   :  { %v913_v23 = vcombine.low %v904_v13, %v912_v17  ;;  %v929_v24 = vrot.slane %v922_v18, %v2999_v57  ;;  %v937_v25 = vrot.slane %v2537_v19, %v2999_v57  ;;  %1463 = vadd.xlane.f32.xlu1 %v1462_v26 }
 0x471   :  { %v972_v3 = vcombine.low %v885_v63, %v892_v0  ;;  %v2539_v5 = vcombine.high %v885_v63, %v892_v0  ;;  %v947_v8 = vcombine.low %v819_v1, %v826_v61 }
 0x472   :  { %v920_v28 = vrot.slane %v913_v23, %v3011_v7  ;;  %v938_v29 = vcombine.low %v929_v24, %v937_v25 }
 0x473   :  { %v979_v17 = vrot.slane %v972_v3, %v2999_v57  ;;  %v987_v18 = vrot.slane %v2539_v5, %v2999_v57  ;;  %v954_v19 = vrot.slane %v947_v8, %v2999_v57 }
 0x474   :  { %v2805_v30 = vpop.eup %2804  ;;  %v921_v42 = vcombine.high %v920_v28, %v2875_v60  ;;  %v945_v33 = vrot.slane %v938_v29, %v3011_v7  ;;  %v1000_v44 = vshrl.u32 %v920_v28, 16 }
 0x475   :  { %v1455_v32 = vunpack.c.l.bf16 %v2805_v30  ;;  %v988_v25 = vcombine.low %v979_v17, %v987_v18 }
 0x476   :  { %v999_v35 = vpack.i.b16 %v945_v33, %v920_v28  ;;  %v1001_v36 = vshrl.u32 %v945_v33, 16  ;;  %v946_v37 = vcombine.high %v945_v33, %v2875_v60  ;;  %v1006_v38 = vshrl.u32 %v921_v42, 16 }
 0x477   :  { %v1465_v34 = vsel %vm1021_vm2, %v1455_v32, 0.0  ;;  %v995_v32 = vrot.slane %v988_v25, %v3011_v7 }
 0x478   :  { %1466 = vadd.xlane.f32.xlu0 %v1465_v34  ;;  %v1491_v41 = vsel %vm1489_vm3, %v999_v35, 0  ;;  %v1002_v43 = vpack.i.b16 %v1001_v36, %v1000_v44  ;;  %v1005_v45 = vpack.i.b16 %v946_v37, %v921_v42  ;;  %v1007_v39 = vshrl.u32 %v946_v37, 16 }
 0x479   :  { %2686 = vmatpush3.bf16.msra.mxu1 %v1491_v41 }
 0x47a   :  { %v1537_v40 = vsel %vm1489_vm3, %v1002_v43, 0  ;;  %2697 = vmatprep.subr.bf16.mxu1 %v2866_v15  ;;  %v1008_v46 = vpack.i.b16 %v1007_v39, %v1006_v38  ;;  %v1583_v47 = vsel %vm1489_vm3, %v1005_v45, 0 }
 0x47b   :  { %2692 = vmatpush3.bf16.msra.mxu0 %v1537_v40  ;;  %v1013_v40 = vshrl.u32 %v995_v32, 16 }
 0x47c   :  { %2688 = vmatmul.mubr.msk.bf16.vlgmr.msra.gmra.mxu1 %vm1021_vm2, %v2803_v9  ;;  %2703 = vmatprep.subr.bf16.mxu0 %v2866_v15  ;;  %v1629_v50 = vsel %vm1489_vm3, %v1008_v46, 0  ;;  %v2538_v9 = vcombine.high %v819_v1, %v826_v61 }
 0x47d   :  { %2698 = vmatpush3.bf16.msra.mxu1 %v1583_v47  ;;  %2699 = vmatprep.mubr.msk.bf16.mxu1 %vm2867_vm1, %v2866_v15 }
 0x47e   :  { %2694 = vmatmul.mubr.msk.bf16.vlgmr.msra.gmra.mxu0 %vm1021_vm2, %v2805_v30  ;;  %2709 = vmatprep.subr.bf16.mxu1 %v2866_v15  ;;  %v962_v20 = vrot.slane %v2538_v9, %v2999_v57 }
 0x47f   :  { %2704 = vmatpush3.bf16.msra.mxu0 %v1629_v50  ;;  %2705 = vmatprep.mubr.msk.bf16.mxu0 %vm2867_vm1, %v2866_v15  ;;  %v996_v50 = vcombine.high %v995_v32, %v2875_v60 }
 0x480   :  { %2715 = vmatprep.subr.bf16.mxu0 %v2866_v15  ;;  %v963_v29 = vcombine.low %v954_v19, %v962_v20 }
 0x481   :  { %v1019_v14 = vshrl.u32 %v996_v50, 16 }
 0x482   :  { %v970_v34 = vrot.slane %v963_v29, %v3011_v7 }
 0x484   :  { %v1012_v47 = vshrl.u32 %v970_v34, 16  ;;  %v971_v51 = vcombine.high %v970_v34, %v2875_v60 }
 0x486   :  { %v1017_v58 = vpack.i.b16 %v996_v50, %v971_v51  ;;  %v1018_v59 = vshrl.u32 %v971_v51, 16 }
 0x488   :  { %v1767_v62 = vsel %vm1489_vm3, %v1017_v58, 0  ;;  %v1020_v0 = vpack.i.b16 %v1019_v14, %v1018_v59 }
 0x48c   :  { %v1398_v48 = vpop.xlane.xlu1 %1397 }
 0x48d   :  { %v1416_v2 = vsub.f32 %v3143_v21, %v1398_v48 }
 0x48f   :  { %v1424_v6 = vpack.c.bf16 %v1416_v2, %v1416_v2  ;;  %v1813_v2 = vsel %vm1489_vm3, %v1020_v0, 0 }
 0x490   :  { %v1410_v10 = vpop.xlane.xlu1 %1409 }
 0x491   :  { %v1437_v12 = vmul.bf16 1069105081, %v1424_v6  ;;  %v1420_v13 = vsub.f32 %v3150_v16, %v1410_v10 }
 0x493   :  { %2806 = vpow.bf16 %v1437_v12  ;;  %v1428_v24 = vpack.c.bf16 %v1420_v13, %v1420_v13 }
 0x494   :  { %v1401_v23 = vpop.xlane.xlu0 %1400 }
 0x495   :  { %v1417_v21 = vsub.f32 %v3148_v11, %v1401_v23  ;;  %v1449_v42 = vmul.bf16 1069105081, %v1428_v24  ;;  %v1011_v11 = vpack.i.b16 %v995_v32, %v970_v34 }
 0x497   :  { %v1425_v26 = vpack.c.bf16 %v1417_v21, %v1417_v21  ;;  %v1675_v45 = vsel %vm1489_vm3, %v1011_v11, 0 }
 0x498   :  { %v1404_v28 = vpop.xlane.xlu0 %1403 }
 0x499   :  { %v1440_v30 = vmul.bf16 1069105081, %v1425_v26  ;;  %v1418_v16 = vsub.f32 %v3146_v4, %v1404_v28 }
 0x49b   :  { %2808 = vpow.bf16 %v1440_v30  ;;  %v1426_v33 = vpack.c.bf16 %v1418_v16, %v1418_v16 }
 0x49c   :  { %v1407_v44 = vpop.xlane.xlu0 %1406  ;;  %2810 = vpow.bf16 %v1449_v42 }
 0x49d   :  { %v1443_v35 = vmul.bf16 1069105081, %v1426_v33  ;;  %v1419_v36 = vsub.f32 %v3154_v22, %v1407_v44 }
 0x49f   :  { %2812 = vpow.bf16 %v1443_v35  ;;  %v1427_v37 = vpack.c.bf16 %v1419_v36, %v1419_v36 }
 0x4a0   :  { %v1413_v38 = vpop.xlane.xlu0 %1412 }
 0x4a1   :  { %v2807_v41 = vpop.eup %2806  ;;  %v1446_v43 = vmul.bf16 1069105081, %v1427_v37  ;;  %v1421_v4 = vsub.f32 %v3158_v27, %v1413_v38  ;;  %v1014_v27 = vpack.i.b16 %v1013_v40, %v1012_v47 }
 0x4a2   :  { %2700 = vmatmul.mubr.msk.bf16.vlgmr.msra.gmra.mxu1 %vm1021_vm2, %v2807_v41  ;;  %v1456_v39 = vunpack.c.l.bf16 %v2807_v41 }
 0x4a3   :  { %2814 = vpow.bf16 %v1446_v43  ;;  %v1429_v46 = vpack.c.bf16 %v1421_v4, %v1421_v4  ;;  %2710 = vmatpush3.bf16.msra.mxu1 %v1675_v45  ;;  %2711 = vmatprep.mubr.msk.bf16.mxu1 %vm2867_vm1, %v2866_v15  ;;  %v1721_v53 = vsel %vm1489_vm3, %v1014_v27, 0 }
 0x4a4   :  { %v1468_v22 = vsel %vm1021_vm2, %v1456_v39, 0.0  ;;  %2721 = vmatprep.subr.bf16.mxu1 %v2866_v15 }
 0x4a5   :  { %v1452_v49 = vmul.bf16 1069105081, %v1429_v46  ;;  %1469 = vadd.xlane.f32.xlu1 %v1468_v22 }
 0x4a7   :  { %2816 = vpow.bf16 %v1452_v49 }
 0x4a9   :  { %v2809_v52 = vpop.eup %2808 }
 0x4aa   :  { %2706 = vmatmul.mubr.msk.bf16.vlgmr.msra.gmra.mxu0 %vm1021_vm2, %v2809_v52  ;;  %v1457_v55 = vunpack.c.l.bf16 %v2809_v52  ;;  %v2811_v56 = vpop.eup %2810 }
 0x4ab   :  { %2716 = vmatpush3.bf16.msra.mxu0 %v1721_v53  ;;  %2717 = vmatprep.mubr.msk.bf16.mxu0 %vm2867_vm1, %v2866_v15  ;;  %v1460_v61 = vunpack.c.l.bf16 %v2811_v56 }
 0x4ac   :  { %v1471_v31 = vsel %vm1021_vm2, %v1457_v55, 0.0  ;;  %2727 = vmatprep.subr.bf16.mxu0 %v2866_v15 }
 0x4ad   :  { %v2813_v54 = vpop.eup %2812  ;;  %1472 = vadd.xlane.f32.xlu0 %v1471_v31  ;;  %v1480_v5 = vsel %vm1021_vm2, %v1460_v61, 0.0 }
 0x4ae   :  { %2712 = vmatmul.mubr.msk.bf16.vlgmr.msra.gmra.mxu1 %vm1021_vm2, %v2813_v54  ;;  %v1458_v63 = vunpack.c.l.bf16 %v2813_v54 }
 0x4af   :  { %2722 = vmatpush3.bf16.msra.mxu1 %v1767_v62  ;;  %2723 = vmatprep.mubr.msk.bf16.mxu1 %vm2867_vm1, %v2866_v15 }
 0x4b0   :  { %v1474_v1 = vsel %vm1021_vm2, %v1458_v63, 0.0  ;;  %2733 = vmatprep.subr.bf16.mxu1 %v2866_v15 }
 0x4b1   :  { %v2815_v48 = vpop.eup %2814  ;;  %1475 = vadd.xlane.f32.xlu1 %v1474_v1 }
 0x4b2   :  { %2718 = vmatmul.mubr.msk.bf16.vlgmr.msra.gmra.mxu0 %vm1021_vm2, %v2815_v48  ;;  %v1459_v3 = vunpack.c.l.bf16 %v2815_v48 }
 0x4b3   :  { %2728 = vmatpush3.bf16.msra.mxu0 %v1813_v2  ;;  %2729 = vmatprep.mubr.msk.bf16.mxu0 %vm2867_vm1, %v2866_v15 }
 0x4b4   :  { %v1477_v6 = vsel %vm1021_vm2, %v1459_v3, 0.0  ;;  %2741 = vmatprep.subr.bf16.mxu0 %v2866_v15 }
 0x4b5   :  { %v2817_v8 = vpop.eup %2816  ;;  %1481 = vadd.xlane.f32.xlu1 %v1480_v5  ;;  %1478 = vadd.xlane.f32.xlu0 %v1477_v6 }
 0x4b6   :  { %2724 = vmatmul.mubr.msk.bf16.vlgmr.msra.gmra.mxu1 %vm1021_vm2, %v2811_v56  ;;  %v1461_v9 = vunpack.c.l.bf16 %v2817_v8 }
 0x4b7   :  { %2737 = vmatprep.mubr.msk.bf16.mxu1 %vm2867_vm1, %v2866_v15 }
 0x4b8   :  { %v1483_v10 = vsel %vm1021_vm2, %v1461_v9, 0.0 }
 0x4b9   :  { %1484 = vadd.xlane.f32.xlu0 %v1483_v10 }
 0x4ba   :  { %2730 = vmatmul.mubr.msk.bf16.vlgmr.msra.gmra.mxu0 %vm1021_vm2, %v2817_v8 }
 0x4bb   :  { %2745 = vmatprep.mubr.msk.bf16.mxu0 %vm2867_vm1, %v2866_v15 }
 0x4f9   :  { %v1464_v24 = vpop.xlane.xlu1 %1463 }
 0x501   :  { %v1467_v26 = vpop.xlane.xlu0 %1466 }
 0x52e   :  { %v1470_v25 = vpop.xlane.xlu1 %1469 }
 0x52f   :  { %2818 = vrcp.f32 %v1470_v25 }
 0x530   :  { %2820 = vrcp.f32 %v1464_v24 }
 0x531   :  { %2822 = vrcp.f32 %v1467_v26 }
 0x536   :  { %v1473_v28 = vpop.xlane.xlu0 %1472 }
 0x537   :  { %2824 = vrcp.f32 %v1473_v28 }
 0x53a   :  { %v1476_v29 = vpop.xlane.xlu1 %1475 }
 0x53b   :  { %2826 = vrcp.f32 %v1476_v29 }
 0x53c   :  { %v1527_v12 = vpop.f32.mrf.mxu1  ;;  %v2819_v16 = vpop.eup %2818 }
 0x53d   :  { %v2821_v34 = vpop.eup %2820 }
 0x53e   :  { %v2689_v13 = vpop.f32.mrf.mxu1  ;;  %v1573_v17 = vpop.f32.mrf.mxu0  ;;  %v1863_v11 = vmul.f32 %v2821_v34, %v1527_v12 }
 0x53f   :  { %v1479_v42 = vpop.xlane.xlu0 %1478  ;;  %v1482_v33 = vpop.xlane.xlu1 %1481 }
 0x540   :  { %v1530_v18 = vpop.f32.mrf.mxu1  ;;  %v2695_v19 = vpop.f32.mrf.mxu0  ;;  %2828 = vrcp.f32 %v1482_v33  ;;  %v1871_v39 = vpack.c.bf16 %v1863_v11, %v1863_v11 }
 0x541   :  { %v2823_v36 = vpop.eup %2822  ;;  %2830 = vrcp.f32 %v1479_v42 }
 0x542   :  { %v2690_v20 = vpop.f32.mrf.mxu1  ;;  %v1576_v23 = vpop.f32.mrf.mxu0  ;;  %v1864_v37 = vmul.f32 %v2823_v36, %v1573_v17  ;;  %v1878_v51 = vrot.slane %v1871_v39, %v2999_v57 }
 0x543   :  { %v1485_v4 = vpop.xlane.xlu0 %1484 }
 0x544   :  { %v2696_v21 = vpop.f32.mrf.mxu0  ;;  %v2825_v43 = vpop.eup %2824  ;;  %v1905_v46 = vpack.c.bf16 %v1864_v37, %v1864_v37  ;;  %2832 = vrcp.f32 %v1485_v4 }
 0x546   :  { %v1912_v52 = vrot.slane %v1905_v46, %v2999_v57 }
 0x548   :  { %v2827_v14 = vpop.eup %2826 }
 0x54d   :  { %v2829_v3 = vpop.eup %2828 }
 0x54e   :  { %v2831_v5 = vpop.eup %2830 }
 0x551   :  { %v2833_v24 = vpop.eup %2832 }
 0x562   :  { %v1619_v30 = vpop.f32.mrf.mxu1 }
 0x563   :  { %v1865_v44 = vmul.f32 %v2819_v16, %v1619_v30 }
 0x564   :  { %v2701_v32 = vpop.f32.mrf.mxu1 }
 0x565   :  { %v1879_v41 = vpack.c.bf16 %v1865_v44, %v1865_v44 }
 0x566   :  { %v1622_v35 = vpop.f32.mrf.mxu1 }
 0x567   :  { %v1886_v47 = vrot.slane %v1879_v41, %v2999_v57 }
 0x568   :  { %v2702_v38 = vpop.f32.mrf.mxu1 }
 0x569   :  { %v1887_v56 = vcombine.low %v1878_v51, %v1886_v47  ;;  %v1888_v31 = vcombine.high %v1878_v51, %v1886_v47 }
 0x56a   :  { %v1665_v45 = vpop.f32.mrf.mxu0 }
 0x56b   :  { %v1866_v40 = vmul.f32 %v2825_v43, %v1665_v45  ;;  %v1895_v6 = vrot.slane %v1887_v56, %v3011_v7  ;;  %v1902_v8 = vrot.slane %v1888_v31, %v3011_v7 }
 0x56c   :  { %v2707_v22 = vpop.f32.mrf.mxu0 }
 0x56d   :  { %v1913_v49 = vpack.c.bf16 %v1866_v40, %v1866_v40  ;;  %v1903_v25 = vcombine.high %v1895_v6, %v2875_v60  ;;  %v1904_v26 = vcombine.high %v1902_v8, %v2875_v60  ;;  %v2011_v45 = vshrl.u32 %v1895_v6, 16 }
 0x56e   :  { %v1668_v27 = vpop.f32.mrf.mxu0  ;;  %v1711_v50 = vpop.f32.mrf.mxu1  ;;  %v2027_v40 = vshrl.u32 %v1902_v8, 16 }
 0x56f   :  { %v1920_v53 = vrot.slane %v1913_v49, %v2999_v57  ;;  %v1867_v62 = vmul.f32 %v2827_v14, %v1711_v50  ;;  %v2019_v39 = vshrl.u32 %v1903_v25, 16  ;;  %v2035_v22 = vshrl.u32 %v1904_v26, 16 }
 0x570   :  { %v2708_v55 = vpop.f32.mrf.mxu0  ;;  %v2713_v58 = vpop.f32.mrf.mxu1 }
 0x571   :  { %v1921_v59 = vcombine.low %v1912_v52, %v1920_v53  ;;  %v1922_v54 = vcombine.high %v1912_v52, %v1920_v53  ;;  %v1939_v9 = vpack.c.bf16 %v1867_v62, %v1867_v62 }
 0x572   :  { %v1714_v63 = vpop.f32.mrf.mxu1  ;;  %v1757_v0 = vpop.f32.mrf.mxu0 }
 0x573   :  { %v1929_v1 = vrot.slane %v1921_v59, %v3011_v7  ;;  %v1936_v61 = vrot.slane %v1922_v54, %v3011_v7  ;;  %v1868_v13 = vmul.f32 %v2831_v5, %v1757_v0  ;;  %v1946_v28 = vrot.slane %v1939_v9, %v2999_v57 }
 0x574   :  { %v2714_v48 = vpop.f32.mrf.mxu1  ;;  %v2719_v2 = vpop.f32.mrf.mxu0 }
 0x575   :  { %v1937_v18 = vcombine.high %v1929_v1, %v2875_v60  ;;  %v1938_v19 = vcombine.high %v1936_v61, %v2875_v60  ;;  %v2012_v16 = vshrl.u32 %v1929_v1, 16  ;;  %v1973_v42 = vpack.c.bf16 %v1868_v13, %v1868_v13 }
 0x576   :  { %v1760_v10 = vpop.f32.mrf.mxu0  ;;  %v1803_v12 = vpop.f32.mrf.mxu1  ;;  %v2028_v35 = vshrl.u32 %v1936_v61, 16  ;;  %v2009_v47 = vpack.i.b16 %v1929_v1, %v1895_v6  ;;  %v2025_v51 = vpack.i.b16 %v1936_v61, %v1902_v8 }
 0x577   :  { %v1869_v17 = vmul.f32 %v2829_v3, %v1803_v12  ;;  %v2017_v44 = vpack.i.b16 %v1937_v18, %v1903_v25  ;;  %v2020_v34 = vshrl.u32 %v1937_v18, 16  ;;  %v2033_v36 = vpack.i.b16 %v1938_v19, %v1904_v26 }
 0x578   :  { %v2720_v20 = vpop.f32.mrf.mxu0  ;;  %v2725_v23 = vpop.f32.mrf.mxu1  ;;  %v2036_v38 = vshrl.u32 %v1938_v19, 16  ;;  %v2013_v50 = vpack.i.b16 %v2012_v16, %v2011_v45  ;;  %v1980_v52 = vrot.slane %v1973_v42, %v2999_v57  ;;  %v2029_v14 = vpack.i.b16 %v2028_v35, %v2027_v40 }
 0x579   :  { %v1947_v21 = vpack.c.bf16 %v1869_v17, %v1869_v17  ;;  %v2079_v55 = vcombine.low %v2017_v44, %v2033_v36  ;;  %v2021_v58 = vpack.i.b16 %v2020_v34, %v2019_v39  ;;  %v2071_v63 = vcombine.low %v2009_v47, %v2025_v51 }
 0x57a   :  { %v1806_v29 = vpop.f32.mrf.mxu1  ;;  %v1849_v30 = vpop.f32.mrf.mxu0  ;;  %v2037_v56 = vpack.i.b16 %v2036_v38, %v2035_v22  ;;  %v2121_v3 = vcombine.low %v2013_v50, %v2029_v14  ;;  %v2787_v38 = vld [vmem:[%s3412_s5] sm:$0xff]  }
 0x57b   :  { %v1954_v32 = vrot.slane %v1947_v21, %v2999_v57  ;;  %v1870_v33 = vmul.f32 %v2833_v24, %v1849_v30  ;;  %v2086_v61 = vrot.slane %v2079_v55, %v2999_v57  ;;  %v2078_v42 = vrot.slane %v2071_v63, %v2999_v57 }
 0x57c   :  { %v2726_v11 = vpop.f32.mrf.mxu1  ;;  %v2731_v37 = vpop.f32.mrf.mxu0  ;;  %v2129_v5 = vcombine.low %v2021_v58, %v2037_v56  ;;  %v2128_v36 = vrot.slane %v2121_v3, %v2999_v57 }
 0x57d   :  { %v1955_v41 = vcombine.low %v1946_v28, %v1954_v32  ;;  %v1956_v43 = vcombine.high %v1946_v28, %v1954_v32  ;;  %v1981_v4 = vpack.c.bf16 %v1870_v33, %v1870_v33  ;;  %v2786_v33 = vld [vmem:[%s3412_s5 + $0x8] sm:$0xff]   ;;  %v2103_v35 = vcombine.low %v2078_v42, %v2086_v61  ;;  %s2876_s5 = smov 16  }
 0x57e   :  { %v1852_v46 = vpop.f32.mrf.mxu0  ;;  %2734 = vmatpush3.bf16.msra.mxu1 %v2786_v33 }
 0x57f   :  { %v1963_v49 = vrot.slane %v1955_v41, %v3011_v7  ;;  %v1988_v27 = vrot.slane %v1981_v4, %v2999_v57  ;;  %v1970_v31 = vrot.slane %v1956_v43, %v3011_v7  ;;  %2735 = vmatprep.subr.bf16.mxu1 %v2866_v15  ;;  %v2110_v39 = vrot.slane %v2103_v35, %v3011_v7 }
 0x580   :  { %v2732_v53 = vpop.f32.mrf.mxu0 }
 0x581   :  { %v1989_v59 = vcombine.low %v1980_v52, %v1988_v27  ;;  %v1990_v54 = vcombine.high %v1980_v52, %v1988_v27  ;;  %v1971_v62 = vcombine.high %v1963_v49, %v2875_v60  ;;  %v1972_v48 = vcombine.high %v1970_v31, %v2875_v60 }
 0x582   :  { %v2043_v2 = vshrl.u32 %v1963_v49, 16  ;;  %v2059_v13 = vshrl.u32 %v1970_v31, 16  ;;  %2736 = vmatpush3.bf16.msra.mxu1 %v2787_v38 }
 0x583   :  { %v1997_v0 = vrot.slane %v1989_v59, %v3011_v7  ;;  %v2004_v1 = vrot.slane %v1990_v54, %v3011_v7  ;;  %v2051_v12 = vshrl.u32 %v1971_v62, 16  ;;  %v2067_v24 = vshrl.u32 %v1972_v48, 16  ;;  %2749 = vmatprep.subr.bf16.mxu1 %v2866_v15 }
 0x585   :  { %v2005_v6 = vcombine.high %v1997_v0, %v2875_v60  ;;  %v2006_v8 = vcombine.high %v2004_v1, %v2875_v60  ;;  %v2041_v9 = vpack.i.b16 %v1997_v0, %v1963_v49  ;;  %v2044_v10 = vshrl.u32 %v1997_v0, 16  ;;  %v2556_v0 = vld [vmem:[%s3413_s6] ss:$0 sm:$0xff] }
 0x586   :  { %v2057_v17 = vpack.i.b16 %v2004_v1, %v1970_v31  ;;  %v2060_v18 = vshrl.u32 %v2004_v1, 16  ;;  %v2136_v60 = vrot.slane %v2129_v5, %v2999_v57 }
 0x587   :  { %v2045_v19 = vpack.i.b16 %v2044_v10, %v2043_v2  ;;  %v2049_v20 = vpack.i.b16 %v2005_v6, %v1971_v62  ;;  %v2052_v23 = vshrl.u32 %v2005_v6, 16  ;;  %v2065_v21 = vpack.i.b16 %v2006_v8, %v1972_v48  ;;  %v2842_v2 = vld [vmem:[%s3407_s0] sm:$0xff]  ;;  %v2843_v10 = vld [vmem:[%s3407_s0 + $0x8] sm:$0xff] }
 0x588   :  { %v2061_v25 = vpack.i.b16 %v2060_v18, %v2059_v13  ;;  %v2068_v26 = vshrl.u32 %v2006_v8, 16  ;;  %v2087_v28 = vcombine.low %v2041_v9, %v2057_v17  ;;  %v2153_v4 = vcombine.low %v2128_v36, %v2136_v60  ;;  %v2560_v36 = vld [vmem:[%s3414_s7] ss:$0 sm:$0xff] }
 0x589   :  { %v2053_v29 = vpack.i.b16 %v2052_v23, %v2051_v12  ;;  %v2095_v30 = vcombine.low %v2049_v20, %v2065_v21 }
 0x58a   :  { %v2069_v16 = vpack.i.b16 %v2068_v26, %v2067_v24  ;;  %v2137_v32 = vcombine.low %v2045_v19, %v2061_v25  ;;  %v2094_v44 = vrot.slane %v2087_v28, %v2999_v57  ;;  %v2160_v46 = vrot.slane %v2153_v4, %v3011_v7 }
 0x58b   :  { %v2102_v34 = vrot.slane %v2095_v30, %v2999_v57  ;;  %v2789_v30 = vld [vmem:[%s3416_s9] sm:$0xff]  }
 0x58c   :  { %v2145_v11 = vcombine.low %v2053_v29, %v2069_v16  ;;  %v2144_v41 = vrot.slane %v2137_v32, %v2999_v57  ;;  %v2788_v29 = vld [vmem:[%s3416_s9 + $0x8] sm:$0xff]  }
 0x58d   :  { %v2111_v37 = vcombine.low %v2094_v44, %v2102_v34  ;;  %2742 = vmatpush3.bf16.msra.mxu0 %v2788_v29 }
 0x58e   :  { %v2152_v43 = vrot.slane %v2145_v11, %v2999_v57  ;;  %2743 = vmatprep.subr.bf16.mxu0 %v2866_v15 }
 0x58f   :  { %v2118_v45 = vrot.slane %v2111_v37, %v3011_v7 }
 0x590   :  { %v2161_v40 = vcombine.low %v2144_v41, %v2152_v43  ;;  %v2561_v41 = vld [vmem:[%s3415_s8] ss:$0 sm:$0xff] }
 0x591   :  { %v2119_v47 = vcombine.low %v2110_v39, %v2118_v45  ;;  %v2120_v49 = vcombine.high %v2110_v39, %v2118_v45  ;;  %2744 = vmatpush3.bf16.msra.mxu0 %v2789_v30 }
 0x592   :  { %v2168_v22 = vrot.slane %v2161_v40, %v3011_v7  ;;  %v2790_v40 = vld [vmem:[%s3418_s11 + $0x38] sm:$0xff]  }
 0x593   :  { %v2174_v52 = vshrl.u32 %v2119_v47, 16  ;;  %v2180_v14 = vshrl.u32 %v2120_v49, 16 }
 0x594   :  { %v2170_v27 = vcombine.high %v2160_v46, %v2168_v22  ;;  %v2169_v50 = vcombine.low %v2160_v46, %v2168_v22  ;;  %v2791_v46 = vld [vmem:[%s3418_s11 + $0x30] sm:$0xff]   ;;  %v2792_v22 = vld [vmem:[%s3418_s11 + $0x28] sm:$0xff]  }
 0x596   :  { %v2179_v51 = vpack.i.b16 %v2170_v27, %v2120_v49  ;;  %v2175_v57 = vshrl.u32 %v2169_v50, 16  ;;  %v2173_v53 = vpack.i.b16 %v2169_v50, %v2119_v47  ;;  %v2181_v58 = vshrl.u32 %v2170_v27, 16  ;;  %v2793_v47 = vld [vmem:[%s3418_s11 + $0x20] sm:$0xff]   ;;  %v2794_v49 = vld [vmem:[%s3418_s11 + $0x18] sm:$0xff]   ;;  %v2795_v27 = vld [vmem:[%s3418_s11 + $0x10] sm:$0xff]  }
 0x597   :  { %v2796_v50 = vld [vmem:[%s3418_s11 + $0x8] sm:$0xff]  }
 0x598   :  { %2185 = vrot.lane.b32.xlu0 %v2179_v51, %s2876_s5  ;;  %v2176_v55 = vpack.i.b16 %v2175_v57, %v2174_v52  ;;  %v2182_v56 = vpack.i.b16 %v2181_v58, %v2180_v14  ;;  %v2797_v51 = vld [vmem:[%s3418_s11] sm:$0xff]  }
 0x599   :  { %v2562_v57 = vld [vmem:[%s3417_s10] ss:$0 sm:$0xff]  ;;  %s2879_s10 = smov [#allocation2]  }
 0x59a   :  { %2183 = vrot.lane.b32.xlu1 %v2176_v55, %s2877_s27  ;;  %s2510_s6 = sshll.u32 %s2879_s10, 4  ;;  %s2511_s6 = int_to_ptr.vmem [resolvable:$true] %s2510_s6 }
 0x59b   :  { %s2844_s17 = scalar_lea.vmem %s2511_s6, 256  ;;  %p2849_p1 = scmp.lt.s32.totalorder %s2511_s6, %s2511_s6 }
 0x59c   :  { %p2845_p0 = scmp.ne.s32.totalorder %s2511_s6, %s2844_s17  ;;  %p2850_p2 = scmp.lt.s32.totalorder %s2844_s17, %s2844_s17 }
 0x59e   :  { %2187 = vrot.lane.b32.xlu1 %v2182_v56, %s2878_s28  ;;  %p2851_p3 = por %p2850_p2, %p2849_p1 }
 0x5a0   :  { %p2852_p4 = pnand %p2851_p3, %p2845_p0 }
 0x60a   :  { %v2186_v59 = vpop.permute.xlu0 %2185 }
 0x60c   :  { %v2184_v7 = vpop.permute.xlu1 %2183 }
 0x60d   :  { %v2191_v31 = vsel %vm1021_vm2, %v2173_v53, %v2184_v7 }
 0x60e   :  { %v2194_v62 = vsel %vm2192_vm4, %v2191_v31, %v2186_v59 }
 0x610   :  { %v2188_v54 = vpop.permute.xlu1 %2187 }
 0x611   :  { %v2197_v63 = vsel %vm2195_vm5, %v2194_v62, %v2188_v54 }
 0x612   :  { %2738 = vmatmul.mubr.msk.bf16.vlgmr.msra.gmra.mxu1 %vm58_vm0, %v2197_v63 }
 0x613   :  { %2765 = vmatprep.mubr.msk.bf16.mxu1 %vm2867_vm1, %v2866_v15  ;;  %2750 = vmatpush3.bf16.msra.mxu1 %v2790_v40 }
 0x614   :  { %2751 = vmatprep.subr.bf16.mxu1 %v2866_v15 }
 0x617   :  { %2752 = vmatpush3.bf16.msra.mxu1 %v2791_v46 }
 0x618   :  { %2753 = vmatprep.subr.bf16.mxu1 %v2866_v15 }
 0x61b   :  { %2754 = vmatpush3.bf16.msra.mxu1 %v2792_v22 }
 0x61c   :  { %2755 = vmatprep.subr.bf16.mxu1 %v2866_v15 }
 0x61f   :  { %2756 = vmatpush3.bf16.msra.mxu1 %v2793_v47 }
 0x620   :  { %2757 = vmatprep.subr.bf16.mxu1 %v2866_v15 }
 0x623   :  { %2758 = vmatpush3.bf16.msra.mxu1 %v2794_v49 }
 0x624   :  { %2759 = vmatprep.subr.bf16.mxu1 %v2866_v15 }
 0x627   :  { %2760 = vmatpush3.bf16.msra.mxu1 %v2795_v27 }
 0x628   :  { %2761 = vmatprep.subr.bf16.mxu1 %v2866_v15 }
 0x62b   :  { %2762 = vmatpush3.bf16.msra.mxu1 %v2796_v50 }
 0x62c   :  { %2763 = vmatprep.subr.bf16.mxu1 %v2866_v15 }
 0x62f   :  { %2764 = vmatpush3.bf16.msra.mxu1 %v2797_v51 }
 0x6d2   :  { %v2256_v1 = vpop.f32.mrf.mxu1 }
 0x6d3   :  { %v2257_v61 = vadd.f32 %v2556_v0, %v2256_v1  ;;  %v2568_v1 = vld [vmem:[%s3419_s12] ss:$0 sm:$0xff] }
 0x6d4   :  { %v2739_v48 = vpop.f32.mrf.mxu1 }
 0x6d5   :  { %v3333_v3 = vadd.f32 %v2842_v2, %v2257_v61 }
 0x6d6   :  { %v2259_v5 = vpop.f32.mrf.mxu1 }
 0x6d7   :  { %v2260_v6 = vadd.f32 %v2556_v0, %v2259_v5  ;;  %v2265_v8 = vsel %vm58_vm0, %v3333_v3, 0.0 }
 0x6d8   :  { %2266 = vadd.xlane.f32.xlu1 %v2265_v8  ;;  %v2740_v9 = vpop.f32.mrf.mxu1 }
 0x6d9   :  { %v3340_v12 = vadd.f32 %v2843_v10, %v2260_v6 }
 0x6db   :  { %v2268_v13 = vsel %vm58_vm0, %v3340_v12, 0.0 }
 0x6dc   :  { %2269 = vadd.xlane.f32.xlu0 %v2268_v13 }
 0x761   :  { %v2267_v17 = vpop.xlane.xlu1 %2266 }
 0x762   :  { %v2271_v18 = vmul.f32 0.03125, %v2267_v17 }
 0x764   :  { %v2273_v19 = vsub.f32 %v3333_v3, %v2271_v18 }
 0x765   :  { %v2270_v20 = vpop.xlane.xlu0 %2269 }
 0x766   :  { %v2272_v23 = vmul.f32 0.03125, %v2270_v20  ;;  %v2275_v21 = vmul.f32 %v2273_v19, %v2273_v19 }
 0x768   :  { %v2274_v24 = vsub.f32 %v3340_v12, %v2272_v23  ;;  %v2277_v25 = vsel %vm58_vm0, %v2275_v21, 0.0 }
 0x769   :  { %2278 = vadd.xlane.f32.xlu0 %v2277_v25 }
 0x76a   :  { %v2276_v26 = vmul.f32 %v2274_v24, %v2274_v24 }
 0x76c   :  { %v2280_v28 = vsel %vm58_vm0, %v2276_v26, 0.0 }
 0x76d   :  { %2281 = vadd.xlane.f32.xlu1 %v2280_v28 }
 0x7f2   :  { %v2279_v16 = vpop.xlane.xlu0 %2278 }
 0x7f3   :  { %v2283_v42 = vmul.f32 0.03125, %v2279_v16 }
 0x7f5   :  { %v2285_v60 = vadd.f32 1e-05, %v2283_v42 }
 0x7f6   :  { %v2282_v32 = vpop.xlane.xlu1 %2281 }
 0x7f7   :  { %2834 = vrsqrt.f32 %v2285_v60  ;;  %v2284_v33 = vmul.f32 0.03125, %v2282_v32 }
 0x7f9   :  { %v2286_v44 = vadd.f32 1e-05, %v2284_v33 }
 0x7fb   :  { %2836 = vrsqrt.f32 %v2286_v44 }
 0x804   :  { %v2835_v34 = vpop.eup %2834 }
 0x805   :  { %v2289_v35 = vmul.f32 %v2835_v34, %v2273_v19 }
 0x807   :  { %v2297_v38 = vmul.f32 %v2560_v36, %v2289_v35 }
 0x808   :  { %v2837_v11 = vpop.eup %2836 }
 0x809   :  { %v2290_v37 = vmul.f32 %v2837_v11, %v2274_v24  ;;  %v2305_v4 = vadd.f32 %v2561_v41, %v2297_v38 }
 0x80b   :  { %v2298_v43 = vmul.f32 %v2560_v36, %v2290_v37 }
 0x80d   :  { %v2306_v45 = vadd.f32 %v2561_v41, %v2298_v43 }
 0x80f   :  { %v2578_v39 = vpack.c.bf16 %v2306_v45, %v2305_v4 }
 0x811   :  { %2746 = vmatmul.mubr.msk.bf16.vlgmr.msra.gmra.mxu0 %vm58_vm0, %v2578_v39 }
 0x8d1   :  { %v2373_v52 = vpop.f32.mrf.mxu0 }
 0x8d2   :  { %v2374_v58 = vadd.f32 %v2562_v57, %v2373_v52 }
 0x8d3   :  { %v2747_v53 = vpop.f32.mrf.mxu0 }
 0x8d5   :  { %v2376_v55 = vpop.f32.mrf.mxu0 }
 0x8d6   :  { %v2377_v14 = vadd.f32 %v2562_v57, %v2376_v55 }
 0x8d7   :  { %v2748_v56 = vpop.f32.mrf.mxu0 }
 0x8d8   :  { %v2380_v7 = vpack.c.bf16 %v2377_v14, %v2374_v58 }
 0x8da   :  { %v2567_v31 = vmul.bf16 3218784218, %v2380_v7 }
 0x8dc   :  { %v2384_v59 = vmul.bf16 1069105081, %v2567_v31 }
 0x8de   :  { %2838 = vpow.bf16 %v2384_v59 }
 0x8ec   :  { %v2839_v15 = vpop.eup %2838 }
 0x8ed   :  { %v2386_v54 = vadd.bf16 1065369472, %v2839_v15 }
 0x8ef   :  { %2840 = vrcp.bf16 %v2386_v54 }
 0x8fd   :  { %v2841_v62 = vpop.eup %2840 }
 0x8fe   :  { %v2388_v63 = vmul.bf16 1065369472, %v2841_v62 }
 0x900   :  { %v2389_v0 = vmul.bf16 %v2388_v63, %v2380_v7 }
 0x902   :  { %2766 = vmatmul.mubr.bf16.vlgmr.msra.gmra.mxu1 %v2389_v0 }
 0x9c2   :  { %v2494_v61 = vpop.f32.mrf.mxu1 }
 0x9c3   :  { %v2495_v48 = vadd.f32 %v2568_v1, %v2494_v61 }
 0x9c4   :  { %v2767_v2 = vpop.f32.mrf.mxu1 }
 0x9c5   :  { %v2501_v5 = vadd.f32 %v2495_v48, %v3333_v3 }
 0x9c6   :  { %v2497_v6 = vpop.f32.mrf.mxu1 }
 0x9c7   :  { %2503 = vst.msk [vmem:[#allocation2] sm:$0xff] %vm58_vm0, %v2501_v5  ;;  %v2498_v8 = vadd.f32 %v2568_v1, %v2497_v6 }
 0x9c8   :  { %v2768_v9 = vpop.f32.mrf.mxu1 }
 0x9c9   :  { %v2502_v10 = vadd.f32 %v2498_v8, %v3340_v12 }
 0x9cb   :  { %2504 = vst.msk [vmem:[#allocation2 + $0x8] sm:$0xff] %vm58_vm0, %v2502_v10 }
 0x9cc   :  { %2855 = shalt.err (!%p2852_p4)
}
 0x9cd   :  { %s2880_s12 = smov 128  }
 0x9ce   :  { %2516 = dma.vmem_to_hbm [thread:$0]  %s2511_s6, 256, %s3420_s13, [#allocation3], %s2880_s12, %s2880_s12, %s2877_s27  }
 0x9cf   :  { %2864 = dma.done.wait [#allocation3], 256  }
 0x9d0   :  { %2865 = vsyncadd [#allocation3], 4294967040 }
 0x9d1   :  { %2520 = vsyncpa [#allocation3], 1 }

</bundles_post_ra>
